<compile_context>
chip_gen: v6e
topology: v6e:2x2x1
jax: 0.10.0
libtpu: 0.0.40
codegen_flags: <defaults>
</compile_context>

<pallas_src>
import jax
import jax.numpy as jnp
from jax.experimental import pallas as pl
from jax.experimental.pallas import tpu as pltpu

EMB1 = 768
EMB2 = 600
NUM_LABELS = 3
H1 = 512
H2 = 128
OUT_PAD = 128  # lane-dense output width; sliced back to NUM_LABELS in wrapper


def _cdiv(a, b):
    return (a + b - 1) // b


def _round_up(x, m):
    return ((x + m - 1) // m) * m


def classifier_kernel(x1_ref, x2_ref, w1a_ref, w1b_ref, b1_ref,
                      w2_ref, b2_ref, w3_ref, b3_ref, o_ref):
    """Fused 3-layer MLP on one batch tile: (TB,768)+(TB,600) -> (TB,OUT_PAD)."""
    x1 = x1_ref[...]
    x2 = x2_ref[...]
    # Inputs are expected in bf16 already; only cast if a caller passed f32.
    if x1.dtype != jnp.bfloat16:
        x1 = x1.astype(jnp.bfloat16)
    if x2.dtype != jnp.bfloat16:
        x2 = x2.astype(jnp.bfloat16)

    # fc1: the concat is folded into two dots against the split weight.
    h1 = jnp.dot(x1, w1a_ref[...], preferred_element_type=jnp.float32)
    h1 = h1 + jnp.dot(x2, w1b_ref[...], preferred_element_type=jnp.float32)
    h1 = jnp.maximum(h1 + b1_ref[...], 0.0)

    # fc2
    h2 = jnp.dot(h1.astype(jnp.bfloat16), w2_ref[...],
                 preferred_element_type=jnp.float32)
    h2 = jnp.maximum(h2 + b2_ref[...], 0.0)

    # fc3 (lane-padded head; padded columns are zero weights/biases)
    out = jnp.dot(h2.astype(jnp.bfloat16), w3_ref[...],
                  preferred_element_type=jnp.float32)
    o_ref[...] = (out + b3_ref[...]).astype(o_ref.dtype)


def classifier_forward(x1, x2, kparams, *, tb=1024):
    """Run the fused Pallas MLP. kparams come from prepare_params()."""
    w1a, w1b, b1, w2, b2, w3p, b3p = kparams
    B = x1.shape[0]
    itemsize = jnp.dtype(x1.dtype).itemsize

    # Batch tile: multiple of 16 for bf16 inputs (8 for f32), capped at `tb`,
    # and also capped at ~B/2 so v7x's two TensorCores both get grid steps.
    mult = 16 if itemsize < 4 else 8
    TB = max(mult, min(_round_up(tb, mult), _round_up(_cdiv(B, 2), mult)))
    grid = (_cdiv(B, TB),)   # no wrapper pad; Pallas masks the ragged edge block

    # VMEM budget: double-buffered x/out tiles, single-buffered resident
    # weights, plus f32 intermediates; clamp to device capacity minus headroom.
    w_bytes = ((EMB1 + EMB2) * H1 + H1 * H2 + H2 * OUT_PAD) * 2 \
              + (H1 + H2 + OUT_PAD) * 4
    x_bytes = 2 * TB * (EMB1 + EMB2) * itemsize
    o_bytes = 2 * TB * OUT_PAD * 4
    act_bytes = TB * (H1 + H2) * 4
    computed = w_bytes + x_bytes + o_bytes + act_bytes
    try:
        vmem_cap = int(pltpu.get_tpu_info().vmem_capacity_bytes)
    except Exception:
        vmem_cap = 64 << 20  # conservative (v7x per-TC)
    vmem_limit = min(int(1.5 * computed) + (4 << 20), vmem_cap - (8 << 20))

    cost = pl.CostEstimate(
        flops=2 * B * ((EMB1 + EMB2) * H1 + H1 * H2 + H2 * NUM_LABELS),
        transcendentals=0,
        bytes_accessed=((EMB1 + EMB2) * H1 + H1 * H2 + H2 * OUT_PAD) * 2
                       + B * (EMB1 + EMB2) * itemsize + B * OUT_PAD * 4,
    )

    def build(single_buffer_weights):
        if single_buffer_weights:
            wspec = lambda shape: pl.BlockSpec(shape, lambda i: (0, 0),
                                               pipeline_mode=pl.Buffered(1))
        else:
            wspec = lambda shape: pl.BlockSpec(shape, lambda i: (0, 0))
        return pl.pallas_call(
            classifier_kernel,
            out_shape=jax.ShapeDtypeStruct((B, OUT_PAD), jnp.float32),
            grid_spec=pltpu.PrefetchScalarGridSpec(
                num_scalar_prefetch=0,
                grid=grid,
                in_specs=[
                    pl.BlockSpec((TB, EMB1), lambda i: (i, 0)),   # x1 tile
                    pl.BlockSpec((TB, EMB2), lambda i: (i, 0)),   # x2 tile
                    wspec((EMB1, H1)), wspec((EMB2, H1)), wspec((1, H1)),
                    wspec((H1, H2)), wspec((1, H2)),
                    wspec((H2, OUT_PAD)), wspec((1, OUT_PAD)),
                ],
                out_specs=pl.BlockSpec((TB, OUT_PAD), lambda i: (i, 0)),
            ),
            compiler_params=pltpu.CompilerParams(
                dimension_semantics=("parallel",),
                vmem_limit_bytes=vmem_limit,
            ),
            cost_estimate=cost,
        )

    args = (x1, x2, w1a, w1b, b1, w2, b2, w3p, b3p)
    try:
        out = build(True)(*args)
    except Exception:
        # Fallback if this JAX build rejects single-buffered weight specs.
        out = build(False)(*args)

    return out[:B, :NUM_LABELS]


def init_params(key):
    """PyTorch-nn.Linear-style f32 params (weights stored (in, out))."""
    k1, k2, k3, k4, k5, k6 = jax.random.split(key, 6)
    d_in = EMB1 + EMB2

    def lin(kw, kb, fan_in, fan_out):
        bound = 1.0 / jnp.sqrt(fan_in)
        w = jax.random.uniform(kw, (fan_in, fan_out), jnp.float32, -bound, bound)
        b = jax.random.uniform(kb, (1, fan_out), jnp.float32, -bound, bound)
        return w, b

    w1, b1 = lin(k1, k2, d_in, H1)
    w2, b2 = lin(k3, k4, H1, H2)
    w3, b3 = lin(k5, k6, H2, NUM_LABELS)
    return (w1, b1, w2, b2, w3, b3)


def prepare_params(params):
    """One-time conversion to kernel layout: split w1, bf16 weights, padded head."""
    w1, b1, w2, b2, w3, b3 = params
    w1a = w1[:EMB1].astype(jnp.bfloat16)            # (768, 512)
    w1b = w1[EMB1:].astype(jnp.bfloat16)            # (600, 512)
    w3p = jnp.zeros((H2, OUT_PAD), jnp.bfloat16).at[:, :NUM_LABELS].set(
        w3.astype(jnp.bfloat16))
    b3p = jnp.zeros((1, OUT_PAD), jnp.float32).at[:, :NUM_LABELS].set(b3)
    return (w1a, w1b, b1, w2.astype(jnp.bfloat16), b2, w3p, b3p)


def reference_forward(x1, x2, params):
    """Reference mimicking the kernel's bf16 weight / f32 accumulate numerics."""
    w1, b1, w2, b2, w3, b3 = params
    bf = jnp.bfloat16
    h1 = (jnp.dot(x1.astype(bf), w1[:EMB1].astype(bf),
                  preferred_element_type=jnp.float32)
          + jnp.dot(x2.astype(bf), w1[EMB1:].astype(bf),
                    preferred_element_type=jnp.float32))
    h1 = jnp.maximum(h1 + b1, 0.0)
    h2 = jnp.dot(h1.astype(bf), w2.astype(bf),
                 preferred_element_type=jnp.float32)
    h2 = jnp.maximum(h2 + b2, 0.0)
    return jnp.dot(h2.astype(bf), w3.astype(bf),
                   preferred_element_type=jnp.float32) + b3


if __name__ == "__main__":
    key = jax.random.PRNGKey(0)
    kx1, kx2, kp = jax.random.split(key, 3)

    B = 64  # small batch for the demo (TB=32 -> 2 grid steps)
    # Upstream producer emits bf16 activations (no wrapper-side cast).
    x1 = jax.random.normal(kx1, (B, EMB1), jnp.float32).astype(jnp.bfloat16)
    x2 = jax.random.normal(kx2, (B, EMB2), jnp.float32).astype(jnp.bfloat16)

    params = init_params(kp)
    kparams = prepare_params(params)

    out = classifier_forward(x1, x2, kparams)
    out = jax.block_until_ready(out)

    ref = reference_forward(x1, x2, params)
    assert out.shape == (B, NUM_LABELS)
    assert jnp.allclose(out, ref, atol=1e-2, rtol=1e-2), "mismatch vs reference"

    print("KERNEL_OK")
</pallas_src>

<mosaic_0001>
module attributes {stable_mosaic.version = 11 : i64} {
  func.func @classifier_kernel(%arg0: i32, %arg1: memref<32x768xbf16, #tpu.memory_space<vmem>>, %arg2: memref<32x600xbf16, #tpu.memory_space<vmem>>, %arg3: memref<768x512xbf16, #tpu.memory_space<vmem>>, %arg4: memref<600x512xbf16, #tpu.memory_space<vmem>>, %arg5: memref<1x512xf32, #tpu.memory_space<vmem>>, %arg6: memref<512x128xbf16, #tpu.memory_space<vmem>>, %arg7: memref<1x128xf32, #tpu.memory_space<vmem>>, %arg8: memref<128x128xbf16, #tpu.memory_space<vmem>>, %arg9: memref<1x128xf32, #tpu.memory_space<vmem>>, %arg10: memref<32x128xf32, #tpu.memory_space<vmem>>) attributes {dimension_semantics = [#tpu.dimension_semantics<parallel>], iteration_bounds = array<i64: 2>, scalar_prefetch = 0 : i64, scratch_operands = 0 : i64, tpu.core_type = #tpu.core_type<tc>, window_params = [{transform_indices = @transform_0, window_bounds = array<i64: 32, 768>}, {transform_indices = @transform_1, window_bounds = array<i64: 32, 600>}, {pipeline_mode = #tpu.pipeline_mode<synchronous>, transform_indices = @transform_2, window_bounds = array<i64: 768, 512>}, {pipeline_mode = #tpu.pipeline_mode<synchronous>, transform_indices = @transform_3, window_bounds = array<i64: 600, 512>}, {pipeline_mode = #tpu.pipeline_mode<synchronous>, transform_indices = @transform_4, window_bounds = array<i64: 1, 512>}, {pipeline_mode = #tpu.pipeline_mode<synchronous>, transform_indices = @transform_5, window_bounds = array<i64: 512, 128>}, {pipeline_mode = #tpu.pipeline_mode<synchronous>, transform_indices = @transform_6, window_bounds = array<i64: 1, 128>}, {pipeline_mode = #tpu.pipeline_mode<synchronous>, transform_indices = @transform_7, window_bounds = array<i64: 128, 128>}, {pipeline_mode = #tpu.pipeline_mode<synchronous>, transform_indices = @transform_8, window_bounds = array<i64: 1, 128>}, {transform_indices = @transform_9, window_bounds = array<i64: 32, 128>}]} {
    %c0 = arith.constant 0 : index
    %c0_0 = arith.constant 0 : index
    %0 = vector.load %arg1[%c0, %c0_0] : memref<32x768xbf16, #tpu.memory_space<vmem>>, vector<32x768xbf16>
    %c0_1 = arith.constant 0 : index
    %c0_2 = arith.constant 0 : index
    %1 = vector.load %arg2[%c0_1, %c0_2] : memref<32x600xbf16, #tpu.memory_space<vmem>>, vector<32x600xbf16>
    %c0_3 = arith.constant 0 : index
    %c0_4 = arith.constant 0 : index
    %2 = vector.load %arg3[%c0_3, %c0_4] : memref<768x512xbf16, #tpu.memory_space<vmem>>, vector<768x512xbf16>
    %cst = arith.constant dense<0.000000e+00> : vector<32x512xf32>
    %3 = tpu.matmul %0, %2, %cst {dimension_numbers = #tpu.dot_dimension_numbers<[1], [0], [0], [1], [0, 0, 1, 1], [], []>} : vector<32x768xbf16>, vector<768x512xbf16>, vector<32x512xf32> -> vector<32x512xf32>
    %c0_5 = arith.constant 0 : index
    %c0_6 = arith.constant 0 : index
    %4 = vector.load %arg4[%c0_5, %c0_6] : memref<600x512xbf16, #tpu.memory_space<vmem>>, vector<600x512xbf16>
    %cst_7 = arith.constant dense<0.000000e+00> : vector<32x512xf32>
    %5 = tpu.matmul %1, %4, %cst_7 {dimension_numbers = #tpu.dot_dimension_numbers<[1], [0], [0], [1], [0, 0, 1, 1], [], []>} : vector<32x600xbf16>, vector<600x512xbf16>, vector<32x512xf32> -> vector<32x512xf32>
    %6 = arith.addf %3, %5 : vector<32x512xf32>
    %c0_8 = arith.constant 0 : index
    %c0_9 = arith.constant 0 : index
    %7 = vector.load %arg5[%c0_8, %c0_9] : memref<1x512xf32, #tpu.memory_space<vmem>>, vector<1x512xf32>
    %8 = vector.broadcast %7 : vector<1x512xf32> to vector<32x512xf32>
    %9 = arith.addf %6, %8 : vector<32x512xf32>
    %cst_10 = arith.constant 0.000000e+00 : f32
    %10 = vector.broadcast %cst_10 : f32 to vector<32x512xf32>
    %11 = arith.maximumf %9, %10 : vector<32x512xf32>
    %12 = arith.truncf %11 : vector<32x512xf32> to vector<32x512xbf16>
    %c0_11 = arith.constant 0 : index
    %c0_12 = arith.constant 0 : index
    %13 = vector.load %arg6[%c0_11, %c0_12] : memref<512x128xbf16, #tpu.memory_space<vmem>>, vector<512x128xbf16>
    %cst_13 = arith.constant dense<0.000000e+00> : vector<32x128xf32>
    %14 = tpu.matmul %12, %13, %cst_13 {dimension_numbers = #tpu.dot_dimension_numbers<[1], [0], [0], [1], [0, 0, 1, 1], [], []>} : vector<32x512xbf16>, vector<512x128xbf16>, vector<32x128xf32> -> vector<32x128xf32>
    %c0_14 = arith.constant 0 : index
    %c0_15 = arith.constant 0 : index
    %15 = vector.load %arg7[%c0_14, %c0_15] : memref<1x128xf32, #tpu.memory_space<vmem>>, vector<1x128xf32>
    %16 = vector.broadcast %15 : vector<1x128xf32> to vector<32x128xf32>
    %17 = arith.addf %14, %16 : vector<32x128xf32>
    %cst_16 = arith.constant 0.000000e+00 : f32
    %18 = vector.broadcast %cst_16 : f32 to vector<32x128xf32>
    %19 = arith.maximumf %17, %18 : vector<32x128xf32>
    %20 = arith.truncf %19 : vector<32x128xf32> to vector<32x128xbf16>
    %c0_17 = arith.constant 0 : index
    %c0_18 = arith.constant 0 : index
    %21 = vector.load %arg8[%c0_17, %c0_18] : memref<128x128xbf16, #tpu.memory_space<vmem>>, vector<128x128xbf16>
    %cst_19 = arith.constant dense<0.000000e+00> : vector<32x128xf32>
    %22 = tpu.matmul %20, %21, %cst_19 {dimension_numbers = #tpu.dot_dimension_numbers<[1], [0], [0], [1], [0, 0, 1, 1], [], []>} : vector<32x128xbf16>, vector<128x128xbf16>, vector<32x128xf32> -> vector<32x128xf32>
    %c0_20 = arith.constant 0 : index
    %c0_21 = arith.constant 0 : index
    %23 = vector.load %arg9[%c0_20, %c0_21] : memref<1x128xf32, #tpu.memory_space<vmem>>, vector<1x128xf32>
    %24 = vector.broadcast %23 : vector<1x128xf32> to vector<32x128xf32>
    %25 = arith.addf %22, %24 : vector<32x128xf32>
    %c0_22 = arith.constant 0 : index
    %c0_23 = arith.constant 0 : index
    %26 = vector.load %arg10[%c0_22, %c0_23] : memref<32x128xf32, #tpu.memory_space<vmem>>, vector<32x128xf32>
    tpu.vector_store %arg10[%c0_22, %c0_23], %25 {strides = array<i32>} : memref<32x128xf32, #tpu.memory_space<vmem>>, vector<32x128xf32>,
    return
  }
  func.func @transform_0(%arg0: i32) -> (i32, i32) {
    %c0_i32 = arith.constant 0 : i32
    %c0_i32_0 = arith.constant 0 : i32
    return %arg0, %c0_i32 : i32, i32
  }
  func.func @transform_1(%arg0: i32) -> (i32, i32) {
    %c0_i32 = arith.constant 0 : i32
    %c0_i32_0 = arith.constant 0 : i32
    return %arg0, %c0_i32 : i32, i32
  }
  func.func @transform_2(%arg0: i32) -> (i32, i32) {
    %c0_i32 = arith.constant 0 : i32
    %c0_i32_0 = arith.constant 0 : i32
    %c0_i32_1 = arith.constant 0 : i32
    return %c0_i32, %c0_i32_0 : i32, i32
  }
  func.func @transform_3(%arg0: i32) -> (i32, i32) {
    %c0_i32 = arith.constant 0 : i32
    %c0_i32_0 = arith.constant 0 : i32
    %c0_i32_1 = arith.constant 0 : i32
    return %c0_i32, %c0_i32_0 : i32, i32
  }
  func.func @transform_4(%arg0: i32) -> (i32, i32) {
    %c0_i32 = arith.constant 0 : i32
    %c0_i32_0 = arith.constant 0 : i32
    %c0_i32_1 = arith.constant 0 : i32
    return %c0_i32, %c0_i32_0 : i32, i32
  }
  func.func @transform_5(%arg0: i32) -> (i32, i32) {
    %c0_i32 = arith.constant 0 : i32
    %c0_i32_0 = arith.constant 0 : i32
    %c0_i32_1 = arith.constant 0 : i32
    return %c0_i32, %c0_i32_0 : i32, i32
  }
  func.func @transform_6(%arg0: i32) -> (i32, i32) {
    %c0_i32 = arith.constant 0 : i32
    %c0_i32_0 = arith.constant 0 : i32
    %c0_i32_1 = arith.constant 0 : i32
    return %c0_i32, %c0_i32_0 : i32, i32
  }
  func.func @transform_7(%arg0: i32) -> (i32, i32) {
    %c0_i32 = arith.constant 0 : i32
    %c0_i32_0 = arith.constant 0 : i32
    %c0_i32_1 = arith.constant 0 : i32
    return %c0_i32, %c0_i32_0 : i32, i32
  }
  func.func @transform_8(%arg0: i32) -> (i32, i32) {
    %c0_i32 = arith.constant 0 : i32
    %c0_i32_0 = arith.constant 0 : i32
    %c0_i32_1 = arith.constant 0 : i32
    return %c0_i32, %c0_i32_0 : i32, i32
  }
  func.func @transform_9(%arg0: i32) -> (i32, i32) {
    %c0_i32 = arith.constant 0 : i32
    %c0_i32_0 = arith.constant 0 : i32
    return %arg0, %c0_i32 : i32, i32
  }
}

module attributes {stable_mosaic.version = 11 : i64} {
  func.func @classifier_kernel(%arg0: i32, %arg1: memref<32x768xbf16, #tpu.memory_space<vmem>>, %arg2: memref<32x600xbf16, #tpu.memory_space<vmem>>, %arg3: memref<768x512xbf16, #tpu.memory_space<vmem>>, %arg4: memref<600x512xbf16, #tpu.memory_space<vmem>>, %arg5: memref<1x512xf32, #tpu.memory_space<vmem>>, %arg6: memref<512x128xbf16, #tpu.memory_space<vmem>>, %arg7: memref<1x128xf32, #tpu.memory_space<vmem>>, %arg8: memref<128x128xbf16, #tpu.memory_space<vmem>>, %arg9: memref<1x128xf32, #tpu.memory_space<vmem>>, %arg10: memref<32x128xf32, #tpu.memory_space<vmem>>) attributes {dimension_semantics = [#tpu.dimension_semantics<parallel>], iteration_bounds = array<i64: 2>, scalar_prefetch = 0 : i64, scratch_operands = 0 : i64, tpu.core_type = #tpu.core_type<tc>, window_params = [{transform_indices = @transform_0, window_bounds = array<i64: 32, 768>}, {transform_indices = @transform_1, window_bounds = array<i64: 32, 600>}, {pipeline_mode = #tpu.pipeline_mode<synchronous>, transform_indices = @transform_2, window_bounds = array<i64: 768, 512>}, {pipeline_mode = #tpu.pipeline_mode<synchronous>, transform_indices = @transform_3, window_bounds = array<i64: 600, 512>}, {pipeline_mode = #tpu.pipeline_mode<synchronous>, transform_indices = @transform_4, window_bounds = array<i64: 1, 512>}, {pipeline_mode = #tpu.pipeline_mode<synchronous>, transform_indices = @transform_5, window_bounds = array<i64: 512, 128>}, {pipeline_mode = #tpu.pipeline_mode<synchronous>, transform_indices = @transform_6, window_bounds = array<i64: 1, 128>}, {pipeline_mode = #tpu.pipeline_mode<synchronous>, transform_indices = @transform_7, window_bounds = array<i64: 128, 128>}, {pipeline_mode = #tpu.pipeline_mode<synchronous>, transform_indices = @transform_8, window_bounds = array<i64: 1, 128>}, {transform_indices = @transform_9, window_bounds = array<i64: 32, 128>}]} {
    %c0 = arith.constant 0 : index
    %c0_0 = arith.constant 0 : index
    %0 = vector.load %arg1[%c0, %c0_0] : memref<32x768xbf16, #tpu.memory_space<vmem>>, vector<32x768xbf16>
    %c0_1 = arith.constant 0 : index
    %c0_2 = arith.constant 0 : index
    %1 = vector.load %arg2[%c0_1, %c0_2] : memref<32x600xbf16, #tpu.memory_space<vmem>>, vector<32x600xbf16>
    %c0_3 = arith.constant 0 : index
    %c0_4 = arith.constant 0 : index
    %2 = vector.load %arg3[%c0_3, %c0_4] : memref<768x512xbf16, #tpu.memory_space<vmem>>, vector<768x512xbf16>
    %cst = arith.constant dense<0.000000e+00> : vector<32x512xf32>
    %3 = tpu.matmul %0, %2, %cst {dimension_numbers = #tpu.dot_dimension_numbers<[1], [0], [0], [1], [0, 0, 1, 1], [], []>} : vector<32x768xbf16>, vector<768x512xbf16>, vector<32x512xf32> -> vector<32x512xf32>
    %c0_5 = arith.constant 0 : index
    %c0_6 = arith.constant 0 : index
    %4 = vector.load %arg4[%c0_5, %c0_6] : memref<600x512xbf16, #tpu.memory_space<vmem>>, vector<600x512xbf16>
    %cst_7 = arith.constant dense<0.000000e+00> : vector<32x512xf32>
    %5 = tpu.matmul %1, %4, %cst_7 {dimension_numbers = #tpu.dot_dimension_numbers<[1], [0], [0], [1], [0, 0, 1, 1], [], []>} : vector<32x600xbf16>, vector<600x512xbf16>, vector<32x512xf32> -> vector<32x512xf32>
    %6 = arith.addf %3, %5 : vector<32x512xf32>
    %c0_8 = arith.constant 0 : index
    %c0_9 = arith.constant 0 : index
    %7 = vector.load %arg5[%c0_8, %c0_9] : memref<1x512xf32, #tpu.memory_space<vmem>>, vector<1x512xf32>
    %8 = vector.broadcast %7 : vector<1x512xf32> to vector<32x512xf32>
    %9 = arith.addf %6, %8 : vector<32x512xf32>
    %cst_10 = arith.constant 0.000000e+00 : f32
    %10 = vector.broadcast %cst_10 : f32 to vector<32x512xf32>
    %11 = arith.maximumf %9, %10 : vector<32x512xf32>
    %12 = arith.truncf %11 : vector<32x512xf32> to vector<32x512xbf16>
    %c0_11 = arith.constant 0 : index
    %c0_12 = arith.constant 0 : index
    %13 = vector.load %arg6[%c0_11, %c0_12] : memref<512x128xbf16, #tpu.memory_space<vmem>>, vector<512x128xbf16>
    %cst_13 = arith.constant dense<0.000000e+00> : vector<32x128xf32>
    %14 = tpu.matmul %12, %13, %cst_13 {dimension_numbers = #tpu.dot_dimension_numbers<[1], [0], [0], [1], [0, 0, 1, 1], [], []>} : vector<32x512xbf16>, vector<512x128xbf16>, vector<32x128xf32> -> vector<32x128xf32>
    %c0_14 = arith.constant 0 : index
    %c0_15 = arith.constant 0 : index
    %15 = vector.load %arg7[%c0_14, %c0_15] : memref<1x128xf32, #tpu.memory_space<vmem>>, vector<1x128xf32>
    %16 = vector.broadcast %15 : vector<1x128xf32> to vector<32x128xf32>
    %17 = arith.addf %14, %16 : vector<32x128xf32>
    %cst_16 = arith.constant 0.000000e+00 : f32
    %18 = vector.broadcast %cst_16 : f32 to vector<32x128xf32>
    %19 = arith.maximumf %17, %18 : vector<32x128xf32>
    %20 = arith.truncf %19 : vector<32x128xf32> to vector<32x128xbf16>
    %c0_17 = arith.constant 0 : index
    %c0_18 = arith.constant 0 : index
    %21 = vector.load %arg8[%c0_17, %c0_18] : memref<128x128xbf16, #tpu.memory_space<vmem>>, vector<128x128xbf16>
    %cst_19 = arith.constant dense<0.000000e+00> : vector<32x128xf32>
    %22 = tpu.matmul %20, %21, %cst_19 {dimension_numbers = #tpu.dot_dimension_numbers<[1], [0], [0], [1], [0, 0, 1, 1], [], []>} : vector<32x128xbf16>, vector<128x128xbf16>, vector<32x128xf32> -> vector<32x128xf32>
    %c0_20 = arith.constant 0 : index
    %c0_21 = arith.constant 0 : index
    %23 = vector.load %arg9[%c0_20, %c0_21] : memref<1x128xf32, #tpu.memory_space<vmem>>, vector<1x128xf32>
    %24 = vector.broadcast %23 : vector<1x128xf32> to vector<32x128xf32>
    %25 = arith.addf %22, %24 : vector<32x128xf32>
    %c0_22 = arith.constant 0 : index
    %c0_23 = arith.constant 0 : index
    %26 = vector.load %arg10[%c0_22, %c0_23] : memref<32x128xf32, #tpu.memory_space<vmem>>, vector<32x128xf32>
    tpu.vector_store %arg10[%c0_22, %c0_23], %25 {strides = array<i32>} : memref<32x128xf32, #tpu.memory_space<vmem>>, vector<32x128xf32>,
    return
  }
  func.func @transform_0(%arg0: i32) -> (i32, i32) {
    %c0_i32 = arith.constant 0 : i32
    %c0_i32_0 = arith.constant 0 : i32
    return %arg0, %c0_i32 : i32, i32
  }
  func.func @transform_1(%arg0: i32) -> (i32, i32) {
    %c0_i32 = arith.constant 0 : i32
    %c0_i32_0 = arith.constant 0 : i32
    return %arg0, %c0_i32 : i32, i32
  }
  func.func @transform_2(%arg0: i32) -> (i32, i32) {
    %c0_i32 = arith.constant 0 : i32
    %c0_i32_0 = arith.constant 0 : i32
    %c0_i32_1 = arith.constant 0 : i32
    return %c0_i32, %c0_i32_0 : i32, i32
  }
  func.func @transform_3(%arg0: i32) -> (i32, i32) {
    %c0_i32 = arith.constant 0 : i32
    %c0_i32_0 = arith.constant 0 : i32
    %c0_i32_1 = arith.constant 0 : i32
    return %c0_i32, %c0_i32_0 : i32, i32
  }
  func.func @transform_4(%arg0: i32) -> (i32, i32) {
    %c0_i32 = arith.constant 0 : i32
    %c0_i32_0 = arith.constant 0 : i32
    %c0_i32_1 = arith.constant 0 : i32
    return %c0_i32, %c0_i32_0 : i32, i32
  }
  func.func @transform_5(%arg0: i32) -> (i32, i32) {
    %c0_i32 = arith.constant 0 : i32
    %c0_i32_0 = arith.constant 0 : i32
    %c0_i32_1 = arith.constant 0 : i32
    return %c0_i32, %c0_i32_0 : i32, i32
  }
  func.func @transform_6(%arg0: i32) -> (i32, i32) {
    %c0_i32 = arith.constant 0 : i32
    %c0_i32_0 = arith.constant 0 : i32
    %c0_i32_1 = arith.constant 0 : i32
    return %c0_i32, %c0_i32_0 : i32, i32
  }
  func.func @transform_7(%arg0: i32) -> (i32, i32) {
    %c0_i32 = arith.constant 0 : i32
    %c0_i32_0 = arith.constant 0 : i32
    %c0_i32_1 = arith.constant 0 : i32
    return %c0_i32, %c0_i32_0 : i32, i32
  }
  func.func @transform_8(%arg0: i32) -> (i32, i32) {
    %c0_i32 = arith.constant 0 : i32
    %c0_i32_0 = arith.constant 0 : i32
    %c0_i32_1 = arith.constant 0 : i32
    return %c0_i32, %c0_i32_0 : i32, i32
  }
  func.func @transform_9(%arg0: i32) -> (i32, i32) {
    %c0_i32 = arith.constant 0 : i32
    %c0_i32_0 = arith.constant 0 : i32
    return %arg0, %c0_i32 : i32, i32
  }
}

</mosaic_0001>

<bundles_post_ra>
// kernel: tpu_custom_call.1
= control target key start
LH: loop header
LB: loop body
LE: loop exit
PB: predicated region body
PF: predicated region fallthrough
CT: control target
= control target key end

     0   :  { %s6042_s0 = inlined_call_operand.hbm [shape: bf16[64,768], index: 0, kind: input, shape index: {}]   ;;  %s6043_s1 = inlined_call_operand.hbm [shape: bf16[64,600], index: 1, kind: input, shape index: {}]   ;;  %s6044_s2 = inlined_call_operand.hbm [shape: bf16[768,512], index: 2, kind: input, shape index: {}]   ;;  %s6045_s3 = inlined_call_operand.hbm [shape: bf16[600,512], index: 3, kind: input, shape index: {}]   ;;  %s6046_s4 = inlined_call_operand.vmem [shape: f32[1,512], index: 4, kind: input, shape index: {}]   ;;  %s6047_s5 = inlined_call_operand.hbm [shape: bf16[512,128], index: 5, kind: input, shape index: {}]   ;;  %s6048_s6 = inlined_call_operand.vmem [shape: f32[1,128], index: 6, kind: input, shape index: {}]   ;;  %s6049_s7 = inlined_call_operand.hbm [shape: bf16[128,128], index: 7, kind: input, shape index: {}]   ;;  %s6050_s8 = inlined_call_operand.vmem [shape: f32[1,128], index: 8, kind: input, shape index: {}]   ;;  %s6051_s9 = inlined_call_operand.hbm [shape: f32[64,128], index: 9, kind: output, shape index: {}]  }
   0x1   :  { %6056 = sst [smem:[#allocation22_spill]] %s6042_s0 }
   0x2   :  { %6057 = sst [smem:[#allocation23_spill]] %s6044_s2 }
   0x3   :  { %6058 = sst [smem:[#allocation24_spill]] %s6045_s3 }
   0x4   :  { %6059 = sst [smem:[#allocation25_spill]] %s6047_s5 }
   0x5   :  { %6060 = sst [smem:[#allocation26_spill]] %s6049_s7 }
   0x6   :  { %14 = vsyncpa [#allocation3], 0 }
   0x7   :  { %16 = vsyncpa [#allocation3 + $0x1], 0 }
   0x8   :  { %17 = vsyncpa [#allocation6], 0 }
   0x9   :  { %19 = vsyncpa [#allocation6 + $0x1], 0 }
   0xa   :  { %20 = vsyncpa [#allocation9], 0 }
   0xb   :  { %21 = vsyncpa [#allocation12], 0 }
   0xc   :  { %22 = vsyncpa [#allocation4], 0 }
   0xd   :  { %24 = vsyncpa [#allocation4 + $0x1], 0  ;;  %s5528_s30 = smov 0   ;;  %s5530_s10 = smov 0  }
   0xe   :  { %s5532_s11 = smov 0   ;;  %s5534_s12 = smov 0  }
   0xf LB: > { %6061 = sst [smem:[#allocation20_spill]] %s5454_s11  ;;  %s5549_s13 = sadd.s32 4294967295, %s5458_s12   ;;  %s5458_s12 = sphi %s5534_s12, %s6090_s12   ;;  %s5454_s11 = sphi %s5532_s11, %s6087_s11   ;;  %s5450_s10 = sphi %s5530_s10, %s6089_s10   ;;  %s5446_s30 = sphi %s5528_s30, %s6088_s30  }
  0x10   : > { %s3998_s14 = sadd.s32 4294967294, %s5458_s12   ;;  %p50_p0 = scmp.ne.s32.totalorder %s5450_s10, %s5446_s30 }
  0x11   : > { %p6052_p1 = scmp.eq.s32.totalorder %s5549_s13, 0  ;;  %p253_p3 = scmp.eq.s32.totalorder %s3998_s14, 1 }
  0x12   : > { %p3999_p5 = scmp.ge.s32.totalorder %s5458_s12, 1  ;;  %p260_p7 = scmp.lt.s32.totalorder %s5458_s12, 3 }
  0x13   : > { %p5558_p4 = por %p6052_p1, %p50_p0  ;;  %p5563_p6 = por %p253_p3, %p50_p0 }
  0x14   : > { %p5568_p8 = pnand %p3999_p5, %p260_p7  ;;  %s5460_s18 = smov [#allocation7]  }
  0x15   : > { %s6062_s15 = scalar_select %p5558_p4, 1, 0 }
  0x16   : > { %s6063_s16 = scalar_select %p5563_p6, 1, 0 }
  0x17   : > { %s272_s19 = sshll.u32 %s5460_s18, 4  ;;  %p4551_p9 = pneg %p5568_p8  ;;  %s273_s19 = int_to_ptr.vmem [resolvable:$true] %s272_s19 }
  0x18   : > { %s5461_s21 = smov [#allocation8]   ;;  %s5462_s23 = smov [#allocation10]  }
  0x19   : > { %p5577_p11 = pnand %p4551_p9, %p6052_p1  ;;  %s285_s22 = sshll.u32 %s5461_s21, 4  ;;  %s286_s22 = int_to_ptr.vmem [resolvable:$true] %s285_s22 }
  0x1a   : > { %s301_s24 = sshll.u32 %s5462_s23, 4  ;;  %s5229_s25 = scalar_lea.vmem %s273_s19, 24576  ;;  %s302_s24 = int_to_ptr.vmem [resolvable:$true] %s301_s24 }
  0x1b   : > { %p5220_p12 = pneg %p5577_p11  ;;  %p5230_p13 = scmp.ne.s32.totalorder %s273_s19, %s5229_s25 }
  0x1c   : > { %p5237_p5 = scmp.lt.s32.totalorder %s273_s19, %s273_s19  ;;  %p5238_p7 = scmp.lt.s32.totalorder %s5229_s25, %s5229_s25 }
  0x1d   : > { %p5232_p0 = pnand %p5230_p13, %p5220_p12 }
  0x1e   : > { %p5239_p9 = por %p5238_p7, %p5237_p5 }
  0x1f   : > { %p5233_p3 = pneg %p5232_p0 }
  0x21   : > { %p5240_p10 = pnand %p5239_p9, %p5233_p3 }
  0x23   : > { %5243 = shalt.err (!%p5240_p10)
}
  0x24   : > { %s5463_s26 = smov 256   ;;  %s5464_s27 = smov 16  }
  0x25   : > { %s6066_s2 = sld [smem:[#allocation23_spill]]  ;;  %s5255_s14 = scalar_lea.vmem %s286_s22, 19200 }
  0x26   : > { %p5256_p1 = scmp.ne.s32.totalorder %s286_s22, %s5255_s14  ;;  %p5263_p2 = scmp.lt.s32.totalorder %s286_s22, %s286_s22 }
  0x27   : > { %p5264_p6 = scmp.lt.s32.totalorder %s5255_s14, %s5255_s14 }
  0x28   : > { %p5258_p13 = pnand %p5256_p1, %p5220_p12 }
  0x29   : > { %p5265_p5 = por %p5264_p6, %p5263_p2 }
  0x2a   : > { %p5259_p0 = pneg %p5258_p13 }
  0x2b   : > { %4554 = dma.hbm_to_vmem [thread:$0]  (!%p5577_p11), %s6066_s2, 24576, %s273_s19, [#allocation6], %s5463_s26, %s5463_s26, %s5464_s27  }
  0x2c   : > { %p5266_p3 = pnand %p5265_p5, %p5259_p0 }
  0x2e   : > { %5269 = shalt.err (!%p5266_p3)
}
  0x2f   : > { %s6067_s3 = sld [smem:[#allocation24_spill]]  ;;  %s5281_s19 = scalar_lea.vmem %s302_s24, 4096 }
  0x30   : > { %p5282_p10 = scmp.ne.s32.totalorder %s302_s24, %s5281_s19  ;;  %p5289_p9 = scmp.lt.s32.totalorder %s302_s24, %s302_s24 }
  0x31   : > { %p5290_p13 = scmp.lt.s32.totalorder %s5281_s19, %s5281_s19 }
  0x32   : > { %p5284_p7 = pnand %p5282_p10, %p5220_p12 }
  0x33   : > { %p5291_p4 = por %p5290_p13, %p5289_p9 }
  0x34   : > { %p5285_p1 = pneg %p5284_p7 }
  0x35   : > { %4557 = dma.hbm_to_vmem [thread:$0]  (!%p5577_p11), %s6067_s3, 19200, %s286_s22, [#allocation9], %s5463_s26, %s5463_s26, %s5464_s27  }
  0x36   : > { %p5292_p2 = pnand %p5291_p4, %p5285_p1 }
  0x38   : > { %5295 = shalt.err (!%p5292_p2)
}
  0x39   : > { %s5465_s23 = smov 64   ;;  %s5466_s25 = smov 4  }
  0x3a   : > { %s6068_s5 = sld [smem:[#allocation25_spill]]  ;;  %s5467_s22 = smov [#allocation11]  }
  0x3b   : > { %s317_s26 = sshll.u32 %s5467_s22, 4  ;;  %s318_s26 = int_to_ptr.vmem [resolvable:$true] %s317_s26 }
  0x3c   : > { %s5307_s27 = scalar_lea.vmem %s318_s26, 1024  ;;  %p5315_p4 = scmp.lt.s32.totalorder %s318_s26, %s318_s26 }
  0x3d   : > { %p5308_p6 = scmp.ne.s32.totalorder %s318_s26, %s5307_s27  ;;  %p5316_p3 = scmp.lt.s32.totalorder %s5307_s27, %s5307_s27 }
  0x3f   : > { %p5310_p0 = pnand %p5308_p6, %p5220_p12  ;;  %p5317_p10 = por %p5316_p3, %p5315_p4 }
  0x40   : > { %4560 = dma.hbm_to_vmem [thread:$0]  (!%p5577_p11), %s6068_s5, 4096, %s302_s24, [#allocation9], %s5465_s23, %s5465_s23, %s5466_s25  }
  0x41   : > { %p5311_p5 = pneg %p5310_p0 }
  0x43   : > { %p5318_p7 = pnand %p5317_p10, %p5311_p5 }
  0x45   : > { %5321 = shalt.err (!%p5318_p7)
}
  0x46   : > { %s6069_s7 = sld [smem:[#allocation26_spill]]  ;;  %s5616_s24 = sadd.s32 1, %s5458_s12  }
  0x47   : > { %s37_s21 = sadd.s32 1, %s5454_s11  ;;  %s34_s20 = ssub.s32 %s5458_s12, %s5616_s24 }
  0x48   : > { %p44_p12 = scmp.ne.s32.totalorder %s5454_s11, %s5450_s10  ;;  %p35_p1 = scmp.eq.s32.totalorder %s34_s20, 0 }
  0x49   : > { %p45_p9 = scmp.eq.s32.totalorder %s5458_s12, 0  ;;  %p6070_p13 = scmp.eq.s32.totalorder %s5549_s13, 1 }
  0x4a   : > { %p4579_p6 = scmp.lt.s32.totalorder %s5458_s12, 2  ;;  %s5635_s29 = sand.u32 1, %s5454_s11  }
  0x4b   : > { %p5626_p2 = por %p6070_p13, %p44_p12  ;;  %p46_p0 = por %p45_p9, %p44_p12 }
  0x4c   : > { %4563 = dma.hbm_to_vmem [thread:$0]  (!%p5577_p11), %s6069_s7, 1024, %s318_s26, [#allocation12], %s5465_s23, %s5465_s23, %s5466_s25  }
  0x4d   : > { %s6071_s19 = scalar_select %p5626_p2, 1, 0 }
  0x4e   : > { %s5632_s28 = scalar_select %p35_p1, %s5454_s11, %s37_s21  }
  0x4f   : > { %s4523_s23 = smul.u32 96, %s5635_s29  ;;  %p5639_p11 = pnand %p4579_p6, %p46_p0 }
  0x50   : > { %6072 = sst [smem:[#allocation21_spill]] %s5632_s28  ;;  %s4524_s25 = smul.u32 1536, %s5458_s12 }
  0x51   : > { %s6074_s0 = sld [smem:[#allocation22_spill]]  ;;  %s338_s18 = scalar_lea.vmem [#allocation2], %s4523_s23 }
  0x52   : > { %s346_s21 = sshll.u32 %s338_s18, 4  ;;  %s335_s2 = scalar_lea.sflag [#allocation3], %s5635_s29  ;;  %s5648_s21 = int_to_ptr.vmem [resolvable:$true] %s346_s21 }
  0x53   : > { %p5324_p4 = pneg %p5639_p11 }
  0x57   : > { %s5646_s14 = scalar_lea.hbm %s6074_s0, %s4524_s25  ;;  %s5327_s27 = scalar_lea.hbm %s6074_s0, 3072 }
  0x58   : > { %s5322_s3 = scalar_lea.hbm %s5646_s14, 1536  ;;  %p5328_p7 = scmp.lt.s32.totalorder %s5646_s14, %s6074_s0 }
  0x59   : > { %p5323_p5 = scmp.ne.s32.totalorder %s5646_s14, %s5322_s3  ;;  %p5329_p12 = scmp.lt.s32.totalorder %s5327_s27, %s5322_s3 }
  0x5b   : > { %p5325_p3 = pnand %p5324_p4, %p5323_p5  ;;  %p5330_p1 = por %p5329_p12, %p5328_p7 }
  0x5d   : > { %p5326_p10 = pneg %p5325_p3 }
  0x5f   : > { %p5331_p9 = pnand %p5330_p1, %p5326_p10 }
  0x61   : > { %5334 = shalt.err (!%p5331_p9)
}
  0x62   : > { %s5335_s23 = scalar_lea.vmem %s5648_s21, 1536  ;;  %s5468_s18 = smov [#allocation2]  }
  0x63   : > { %p5336_p13 = scmp.ne.s32.totalorder %s5648_s21, %s5335_s23  ;;  %s5340_s26 = sshll.u32 %s5468_s18, 4  ;;  %s5341_s26 = int_to_ptr.vmem [resolvable:$false] %s5340_s26 }
  0x64   : > { %s5342_s25 = scalar_lea.vmem %s5341_s26, 3072  ;;  %p5343_p5 = scmp.lt.s32.totalorder %s5648_s21, %s5341_s26 }
  0x65   : > { %p5338_p6 = pnand %p5336_p13, %p5324_p4  ;;  %p5344_p3 = scmp.lt.s32.totalorder %s5342_s25, %s5335_s23 }
  0x67   : > { %p5339_p0 = pneg %p5338_p6  ;;  %p5345_p2 = por %p5344_p3, %p5343_p5 }
  0x69   : > { %p5346_p7 = pnand %p5345_p2, %p5339_p0 }
  0x6b   : > { %5349 = shalt.err (!%p5346_p7)
}
  0x6c   : > { %s5469_s3 = smov 384   ;;  %s5470_s5 = smov 24  }
  0x6d   : > { %4567 = dma.hbm_to_vmem [thread:$0]  (!%p5639_p11), %s5646_s14, 1536, %s5648_s21, %s335_s2, %s5469_s3, %s5469_s3, %s5470_s5  }
  0x6e   : > { %s4525_s7 = smul.u32 80, %s5635_s29  ;;  %s6075_s0 = sand.u32 1, %s5458_s12  }
  0x6f   : > { %s4526_s27 = smul.u32 1280, %s5458_s12  ;;  %s5689_s28 = scalar_lea.sflag [#allocation6], %s6075_s0 }
  0x70   : > { %s360_s25 = scalar_lea.vmem [#allocation5], %s4525_s7  ;;  %s5355_s14 = scalar_lea.hbm %s6043_s1, 2560 }
  0x71   : > { %s5683_s26 = scalar_lea.hbm %s6043_s1, %s4526_s27  ;;  %s368_s20 = sshll.u32 %s360_s25, 4  ;;  %s5685_s20 = int_to_ptr.vmem [resolvable:$true] %s368_s20 }
  0x72   : > { %s5350_s11 = scalar_lea.hbm %s5683_s26, 1280  ;;  %p5356_p1 = scmp.lt.s32.totalorder %s5683_s26, %s6043_s1 }
  0x73   : > { %p5351_p2 = scmp.ne.s32.totalorder %s5683_s26, %s5350_s11  ;;  %p5357_p9 = scmp.lt.s32.totalorder %s5355_s14, %s5350_s11 }
  0x75   : > { %p5353_p10 = pnand %p5351_p2, %p5324_p4  ;;  %p5358_p13 = por %p5357_p9, %p5356_p1 }
  0x77   : > { %p5354_p12 = pneg %p5353_p10 }
  0x79   : > { %p5359_p6 = pnand %p5358_p13, %p5354_p12 }
  0x7b   : > { %5362 = shalt.err (!%p5359_p6)
}
  0x7c   : > { %s5363_s0 = scalar_lea.vmem %s5685_s20, 1280  ;;  %s5471_s5 = smov [#allocation5]  }
  0x7d   : > { %p5364_p0 = scmp.ne.s32.totalorder %s5685_s20, %s5363_s0  ;;  %s5368_s7 = sshll.u32 %s5471_s5, 4  ;;  %s5369_s7 = int_to_ptr.vmem [resolvable:$false] %s5368_s7 }
  0x7e   : > { %s5370_s27 = scalar_lea.vmem %s5369_s7, 2560  ;;  %p5371_p7 = scmp.lt.s32.totalorder %s5685_s20, %s5369_s7 }
  0x7f   : > { %p5366_p5 = pnand %p5364_p0, %p5324_p4  ;;  %p5372_p2 = scmp.lt.s32.totalorder %s5370_s27, %s5363_s0 }
  0x81   : > { %p5367_p3 = pneg %p5366_p5  ;;  %p5373_p10 = por %p5372_p2, %p5371_p7 }
  0x83   : > { %p5374_p1 = pnand %p5373_p10, %p5367_p3 }
  0x85   : > { %5377 = shalt.err (!%p5374_p1)
}
  0x86   : > { %s5472_s11 = smov 320   ;;  %s5473_s18 = smov 20  }
  0x87   : > { %4570 = dma.hbm_to_vmem [thread:$0]  (!%p5639_p11), %s5683_s26, 1280, %s5685_s20, %s5689_s28, %s5472_s11, %s5472_s11, %s5473_s18  }
  0x88   : > { %380 = sbr.rel (%p5568_p8) target bundleno = 1140 (0x474), region = 56  ;;  %s5717_s23 = sand.u32 (!%p5568_p8), 1, %s5450_s10  }
  0x89   : > { %s4527_s25 = smul.u32 (!%p5568_p8), 96, %s5717_s23  ;;  %s383_s2 = scalar_lea.sflag (!%p5568_p8), [#allocation3], %s5717_s23 }
  0x8a   : > { %p6076_p4 = scmp.ne.s32.totalorder (!%p5568_p8), %s6062_s15, 0 }
  0x8b   : > { %s5721_s29 = scalar_lea.vmem (!%p5568_p8), [#allocation2], %s4527_s25 }
  0x8d   : > { %5421 = dma.done.wait (%p6076_p4), %s383_s2, 1536  }
  0x8e   : > { %5423 = vsyncadd (%p6076_p4), %s383_s2, 4294965760  ;;  %s391_s17 = sand.u32 1, %s5549_s13   ;;  %s4528_s28 = smul.u32 80, %s5717_s23 }
  0x8f   : > { %s392_s22 = scalar_lea.sflag [#allocation6], %s391_s17 }
  0x90   : > { %s5729_s20 = scalar_lea.vmem [#allocation5], %s4528_s28 }
  0x91   : > { %5425 = dma.done.wait (%p6076_p4), %s392_s22, 1280  }
  0x92   : > { %5427 = vsyncadd (%p6076_p4), %s392_s22, 4294966016  ;;  %p6077_p8 = scmp.eq.s32.totalorder %s5549_s13, 0 }
  0x94   : > { %5429 = dma.done.wait (%p6077_p8), [#allocation6], 24576   ;;  %p6078_p11 = pmov %p6077_p8 }
  0x95   : > { %p6079_p12 = pmov %p6077_p8 }
  0x96   : > { %5431 = vsyncadd (%p6078_p11), [#allocation6], 4294942720 }
  0x97   : > { %5433 = dma.done.wait (%p6079_p12), [#allocation9], 23296   ;;  %p6080_p9 = pmov %p6077_p8 }
  0x98   : > { %p6081_p13 = pmov %p6077_p8 }
  0x99   : > { %5435 = vsyncadd (%p6080_p9), [#allocation9], 4294944000 }
  0x9a   : > { %5437 = dma.done.wait (%p6081_p13), [#allocation12], 1024   ;;  %p6082_p6 = pmov %p6077_p8 }
  0x9b   : > { %v4632_v0 = vld [vmem:[#allocation8 + $0xe4] ss:$16 sps:$4 sm:$0xff]   ;;  %v4636_v2 = vld [vmem:[#allocation8 + $0xe0] ss:$16 sps:$4 sm:$0xff]   ;;  %vm1628_vm0 = vcmask 1043456   ;;  %vm1621_vm1 = vcmask 719872  }
  0x9c   : > { %5439 = vsyncadd (%p6082_p6), [#allocation12], 4294966272  ;;  %v4634_v1 = vld [vmem:[#allocation8 + $0x2e4] ss:$16 sps:$4 sm:$0xff]   ;;  %1641 = vmatprep.subr.bf16.mxu0 %v4632_v0  ;;  %v4637_v3 = vld [vmem:[#allocation8 + $0x2e0] ss:$16 sps:$4 sm:$0xff]  }
  0x9d   : > { %1694 = vmatprep.subr.bf16.mxu1 %v4634_v1  ;;  %v4638_v4 = vld [vmem:[#allocation8 + $0xc4] ss:$16 sps:$4 sm:$0xff]   ;;  %1642 = vmatpush1.bf16.msra.mxu0 %v4636_v2  ;;  %v4642_v6 = vld [vmem:[#allocation8 + $0xc0] ss:$16 sps:$4 sm:$0xff]   ;;  %s4016_s3 = sshll.u32 %s5717_s23, 5  ;;  %s4436_s11 = sshll.u32 %s5549_s13, 9 }
  0x9e   : > { %1695 = vmatpush1.bf16.msra.mxu1 %v4637_v3  ;;  %v4640_v5 = vld [vmem:[#allocation8 + $0x2c4] ss:$16 sps:$4 sm:$0xff]   ;;  %1643 = vmatprep.subr.bf16.mxu0 %v4638_v4  ;;  %v4643_v7 = vld [vmem:[#allocation8 + $0x2c0] ss:$16 sps:$4 sm:$0xff]   ;;  %v4737_v4 = vld [vmem:[#allocation8 + $0xec] ss:$16 sps:$4 sm:$0xff]   ;;  %s5999_s2 = scalar_lea.hbm %s6051_s9, %s4436_s11 }
  0x9f   : > { %1696 = vmatprep.subr.bf16.mxu1 %v4640_v5  ;;  %v4644_v8 = vld [vmem:[#allocation8 + $0xa4] ss:$16 sps:$4 sm:$0xff]   ;;  %v4648_v10 = vld [vmem:[#allocation8 + $0xa0] ss:$16 sps:$4 sm:$0xff]   ;;  %s450_s7 = scalar_lea.vmem [#allocation13], %s4016_s3  ;;  %p6083_p5 = scmp.ne.s32.totalorder %s6071_s19, 0 }
  0xa0   : > { %v4646_v9 = vld [vmem:[#allocation8 + $0x2a4] ss:$16 sps:$4 sm:$0xff]   ;;  %v4649_v11 = vld [vmem:[#allocation8 + $0x2a0] ss:$16 sps:$4 sm:$0xff]   ;;  %s3864_s27 = sshll.u32 %s450_s7, 4  ;;  %s5475_s13 = smov [#allocation13]   ;;  %s5994_s27 = int_to_ptr.vmem [resolvable:$true] %s3864_s27 }
  0xa1   : > { %1644 = vmatpush1.bf16.msra.mxu0 %v4642_v6  ;;  %v4650_v12 = vld [vmem:[#allocation8 + $0x84] ss:$16 sps:$4 sm:$0xff]   ;;  %v4654_v14 = vld [vmem:[#allocation8 + $0x80] ss:$16 sps:$4 sm:$0xff]   ;;  %s5378_s17 = scalar_lea.vmem %s5994_s27, 512  ;;  %s5382_s28 = sshll.u32 %s5475_s13, 4  ;;  %s5383_s28 = int_to_ptr.vmem [resolvable:$false] %s5382_s28 }
  0xa2   : > { %1697 = vmatpush1.bf16.msra.mxu1 %v4643_v7  ;;  %1645 = vmatprep.subr.bf16.mxu0 %v4644_v8  ;;  %v4652_v13 = vld [vmem:[#allocation8 + $0x284] ss:$16 sps:$4 sm:$0xff]   ;;  %v4655_v15 = vld [vmem:[#allocation8 + $0x280] ss:$16 sps:$4 sm:$0xff]   ;;  %v5759_v7 = vld [vmem:[%s5729_s20 + $0x8] ss:$20 sps:$4 sm:$0xff]   ;;  %p5379_p0 = scmp.ne.s32.totalorder %s5994_s27, %s5378_s17  ;;  %p5385_p2 = scmp.lt.s32.totalorder %s5994_s27, %s5383_s28 }
  0xa3   : > { %1698 = vmatprep.subr.bf16.mxu1 %v4646_v9  ;;  %v4656_v16 = vld [vmem:[#allocation8 + $0x64] ss:$16 sps:$4 sm:$0xff]   ;;  %v4660_v18 = vld [vmem:[#allocation8 + $0x60] ss:$16 sps:$4 sm:$0xff]   ;;  %v4735_v8 = vld [vmem:[#allocation8 + $0xe8] ss:$16 sps:$4 sm:$0xff]  }
  0xa4   : > { %v4658_v17 = vld [vmem:[#allocation8 + $0x264] ss:$16 sps:$4 sm:$0xff]   ;;  %v4661_v19 = vld [vmem:[#allocation8 + $0x260] ss:$16 sps:$4 sm:$0xff]   ;;  %p5380_p3 = pnand %p5379_p0, %p6083_p5  ;;  %s5384_s22 = scalar_lea.vmem %s5383_s28, 1024 }
  0xa5   : > { %1646 = vmatpush1.bf16.msra.mxu0 %v4648_v10  ;;  %v4662_v20 = vld [vmem:[#allocation8 + $0x44] ss:$16 sps:$4 sm:$0xff]   ;;  %v4666_v22 = vld [vmem:[#allocation8 + $0x40] ss:$16 sps:$4 sm:$0xff]   ;;  %p5386_p10 = scmp.lt.s32.totalorder %s5384_s22, %s5378_s17 }
  0xa6   : > { %1699 = vmatpush1.bf16.msra.mxu1 %v4649_v11  ;;  %1647 = vmatprep.subr.bf16.mxu0 %v4650_v12  ;;  %v4664_v21 = vld [vmem:[#allocation8 + $0x244] ss:$16 sps:$4 sm:$0xff]   ;;  %v4667_v23 = vld [vmem:[#allocation8 + $0x240] ss:$16 sps:$4 sm:$0xff]   ;;  %v4744_v11 = vld [vmem:[#allocation8 + $0xcc] ss:$16 sps:$4 sm:$0xff]   ;;  %p5381_p7 = pneg %p5380_p3 }
  0xa7   : > { %1700 = vmatprep.subr.bf16.mxu1 %v4652_v13  ;;  %v4668_v24 = vld [vmem:[#allocation8 + $0x24] ss:$16 sps:$4 sm:$0xff]   ;;  %v4672_v26 = vld [vmem:[#allocation8 + $0x20] ss:$16 sps:$4 sm:$0xff]   ;;  %p5387_p1 = por %p5386_p10, %p5385_p2 }
  0xa8   : > { %v4670_v25 = vld [vmem:[#allocation8 + $0x224] ss:$16 sps:$4 sm:$0xff]   ;;  %v4673_v27 = vld [vmem:[#allocation8 + $0x220] ss:$16 sps:$4 sm:$0xff]  }
  0xa9   : > { %1648 = vmatpush1.bf16.msra.mxu0 %v4654_v14  ;;  %v4674_v28 = vld [vmem:[#allocation8 + $0x4] ss:$16 sps:$4 sm:$0xff]   ;;  %v4678_v30 = vld [vmem:[#allocation8] ss:$16 sps:$4 sm:$0xff]   ;;  %p5388_p4 = pnand %p5387_p1, %p5381_p7 }
  0xaa   : > { %1701 = vmatpush1.bf16.msra.mxu1 %v4655_v15  ;;  %1649 = vmatprep.subr.bf16.mxu0 %v4656_v16  ;;  %v4676_v29 = vld [vmem:[#allocation8 + $0x204] ss:$16 sps:$4 sm:$0xff]   ;;  %v4679_v31 = vld [vmem:[#allocation8 + $0x200] ss:$16 sps:$4 sm:$0xff]   ;;  %v4742_v15 = vld [vmem:[#allocation8 + $0xc8] ss:$16 sps:$4 sm:$0xff]  }
  0xab   : > { %1702 = vmatprep.subr.bf16.mxu1 %v4658_v17  ;;  %v4680_v32 = vld [vmem:[#allocation8 + $0x1e4] ss:$16 sps:$4 sm:$0xff]   ;;  %v4684_v34 = vld [vmem:[#allocation8 + $0x1e0] ss:$16 sps:$4 sm:$0xff]   ;;  %v4750_v17 = vld [vmem:[#allocation8 + $0xac] ss:$16 sps:$4 sm:$0xff]  }
  0xac   : > { %v4682_v33 = vld [vmem:[#allocation8 + $0x3e4] ss:$16 sps:$4 sm:$0xff]   ;;  %v4685_v35 = vld [vmem:[#allocation8 + $0x3e0] ss:$16 sps:$4 sm:$0xff]  }
  0xad   : > { %1650 = vmatpush1.bf16.msra.mxu0 %v4660_v18  ;;  %v4686_v36 = vld [vmem:[#allocation8 + $0x1c4] ss:$16 sps:$4 sm:$0xff]   ;;  %v4690_v38 = vld [vmem:[#allocation8 + $0x1c0] ss:$16 sps:$4 sm:$0xff]  }
  0xae   : > { %1703 = vmatpush1.bf16.msra.mxu1 %v4661_v19  ;;  %1651 = vmatprep.subr.bf16.mxu0 %v4662_v20  ;;  %v4688_v37 = vld [vmem:[#allocation8 + $0x3c4] ss:$16 sps:$4 sm:$0xff]   ;;  %v4691_v39 = vld [vmem:[#allocation8 + $0x3c0] ss:$16 sps:$4 sm:$0xff]   ;;  %v5774_v19 = vld [vmem:[%s5729_s20 + $0x28] ss:$20 sps:$4 sm:$0xff]  }
  0xaf   : > { %1704 = vmatprep.subr.bf16.mxu1 %v4664_v21  ;;  %v4692_v40 = vld [vmem:[#allocation8 + $0x1a4] ss:$16 sps:$4 sm:$0xff]   ;;  %v4696_v42 = vld [vmem:[#allocation8 + $0x1a0] ss:$16 sps:$4 sm:$0xff]   ;;  %v4748_v21 = vld [vmem:[#allocation8 + $0xa8] ss:$16 sps:$4 sm:$0xff]  }
  0xb0   : > { %v4694_v41 = vld [vmem:[#allocation8 + $0x3a4] ss:$16 sps:$4 sm:$0xff]   ;;  %v4697_v43 = vld [vmem:[#allocation8 + $0x3a0] ss:$16 sps:$4 sm:$0xff]  }
  0xb1   : > { %1652 = vmatpush1.bf16.msra.mxu0 %v4666_v22  ;;  %v4698_v44 = vld [vmem:[#allocation8 + $0x184] ss:$16 sps:$4 sm:$0xff]   ;;  %v4702_v46 = vld [vmem:[#allocation8 + $0x180] ss:$16 sps:$4 sm:$0xff]  }
  0xb2   : > { %1705 = vmatpush1.bf16.msra.mxu1 %v4667_v23  ;;  %1653 = vmatprep.subr.bf16.mxu0 %v4668_v24  ;;  %v4700_v45 = vld [vmem:[#allocation8 + $0x384] ss:$16 sps:$4 sm:$0xff]   ;;  %v4703_v47 = vld [vmem:[#allocation8 + $0x380] ss:$16 sps:$4 sm:$0xff]   ;;  %v4762_v23 = vld [vmem:[#allocation8 + $0x8c] ss:$16 sps:$4 sm:$0xff]  }
  0xb3   : > { %1706 = vmatprep.subr.bf16.mxu1 %v4670_v25  ;;  %v5748_v48 = vld [vmem:[%s5729_s20 + $0x4] ss:$20 sps:$4 sm:$0xff]   ;;  %v5751_v51 = vld [vmem:[%s5729_s20 + $0xc] ss:$20 sps:$4 sm:$0xff]   ;;  %v5767_v13 = vld [vmem:[%s5729_s20 + $0x34] ss:$20 sps:$4 sm:$0xff]  }
  0xb4   : > { %v4704_v49 = vld [vmem:[#allocation8 + $0x164] ss:$16 sps:$4 sm:$0xff]   ;;  %1673 = vmatprep.mubr.bf16.mxu0 %v5748_v48  ;;  %v4708_v52 = vld [vmem:[#allocation8 + $0x160] ss:$16 sps:$4 sm:$0xff]   ;;  %1726 = vmatprep.mubr.bf16.mxu1 %v5751_v51  ;;  %v4760_v25 = vld [vmem:[#allocation8 + $0x88] ss:$16 sps:$4 sm:$0xff]  }
  0xb5   : > { %1654 = vmatpush1.bf16.msra.mxu0 %v4672_v26  ;;  %v4706_v50 = vld [vmem:[#allocation8 + $0x364] ss:$16 sps:$4 sm:$0xff]   ;;  %v4709_v53 = vld [vmem:[#allocation8 + $0x360] ss:$16 sps:$4 sm:$0xff]  }
  0xb6   : > { %1707 = vmatpush1.bf16.msra.mxu1 %v4673_v27  ;;  %1655 = vmatprep.subr.bf16.mxu0 %v4674_v28  ;;  %v4710_v54 = vld [vmem:[#allocation8 + $0x144] ss:$16 sps:$4 sm:$0xff]   ;;  %v4714_v56 = vld [vmem:[#allocation8 + $0x140] ss:$16 sps:$4 sm:$0xff]   ;;  %v4768_v27 = vld [vmem:[#allocation8 + $0x6c] ss:$16 sps:$4 sm:$0xff]  }
  0xb7   : > { %1708 = vmatprep.subr.bf16.mxu1 %v4676_v29  ;;  %v4712_v55 = vld [vmem:[#allocation8 + $0x344] ss:$16 sps:$4 sm:$0xff]   ;;  %v4715_v57 = vld [vmem:[#allocation8 + $0x340] ss:$16 sps:$4 sm:$0xff]   ;;  %v5474_v28 = vmov 0  }
  0xb8   : > { %v4716_v58 = vld [vmem:[#allocation8 + $0x124] ss:$16 sps:$4 sm:$0xff]   ;;  %v4720_v60 = vld [vmem:[#allocation8 + $0x120] ss:$16 sps:$4 sm:$0xff]  }
  0xb9   : > { %1656 = vmatpush1.bf16.msra.mxu0 %v4678_v30  ;;  %v4718_v59 = vld [vmem:[#allocation8 + $0x324] ss:$16 sps:$4 sm:$0xff]   ;;  %v4721_v61 = vld [vmem:[#allocation8 + $0x320] ss:$16 sps:$4 sm:$0xff]   ;;  %v4766_v30 = vld [vmem:[#allocation8 + $0x68] ss:$16 sps:$4 sm:$0xff]  }
  0xba   : > { %1709 = vmatpush1.bf16.msra.mxu1 %v4679_v31  ;;  %1657 = vmatprep.subr.bf16.mxu0 %v4680_v32  ;;  %v4722_v62 = vld [vmem:[#allocation8 + $0x104] ss:$16 sps:$4 sm:$0xff]   ;;  %v4726_v1 = vld [vmem:[#allocation8 + $0x100] ss:$16 sps:$4 sm:$0xff]   ;;  %v4774_v32 = vld [vmem:[#allocation8 + $0x4c] ss:$16 sps:$4 sm:$0xff]  }
  0xbb   : > { %1710 = vmatprep.subr.bf16.mxu1 %v4682_v33  ;;  %v4724_v63 = vld [vmem:[#allocation8 + $0x304] ss:$16 sps:$4 sm:$0xff]   ;;  %v4727_v2 = vld [vmem:[#allocation8 + $0x300] ss:$16 sps:$4 sm:$0xff]  }
  0xbc   : > { %v819_v0 = vld [vmem:[#allocation8 + $0x4a0] sm:$0xff] }
  0xbd   : > { %1658 = vmatpush2.bf16.msra.mxu0 %v4684_v34  ;;  %v4176_v3 = vcombine.high %v819_v0, %v819_v0  ;;  %v4175_v5 = vcombine.low %v819_v0, %v819_v0  ;;  %v5756_v6 = vld [vmem:[%s5729_s20] ss:$20 sps:$4 sm:$0xff]   ;;  %v5777_v20 = vld [vmem:[%s5729_s20 + $0x30] ss:$20 sps:$4 sm:$0xff]   ;;  %v4772_v34 = vld [vmem:[#allocation8 + $0x48] ss:$16 sps:$4 sm:$0xff]  }
  0xbe   : > { %1711 = vmatpush2.bf16.msra.mxu1 %v4685_v35  ;;  %1659 = vmatprep.subr.bf16.mxu0 %v4686_v36  ;;  %v4741_v9 = vld [vmem:[#allocation8 + $0x484] ss:$16 sps:$4 sm:$0xff]   ;;  %v5764_v12 = vld [vmem:[%s5729_s20 + $0x2c] ss:$20 sps:$4 sm:$0xff]   ;;  %v4813_v0 = vld [vmem:[#allocation8 + $0x168] ss:$16 sps:$4 sm:$0xff]  }
  0xbf   : > { %1712 = vmatprep.subr.bf16.mxu1 %v4688_v37  ;;  %v1630_v10 = vsel %vm1628_vm0, %v4175_v5, 0  ;;  %v4739_v14 = vld [vmem:[#allocation8 + $0x480] ss:$16 sps:$4 sm:$0xff]   ;;  %v4747_v16 = vld [vmem:[#allocation8 + $0x464] ss:$16 sps:$4 sm:$0xff]  }
  0xc0   : > { %v4745_v18 = vld [vmem:[#allocation8 + $0x460] ss:$16 sps:$4 sm:$0xff]   ;;  %v4759_v22 = vld [vmem:[#allocation8 + $0x444] ss:$16 sps:$4 sm:$0xff]   ;;  %v4778_v35 = vld [vmem:[#allocation8 + $0x2c] ss:$16 sps:$4 sm:$0xff]  }
  0xc1   : > { %1660 = vmatpush2.bf16.msra.mxu0 %v4690_v38  ;;  %v4757_v24 = vld [vmem:[#allocation8 + $0x440] ss:$16 sps:$4 sm:$0xff]   ;;  %v4765_v26 = vld [vmem:[#allocation8 + $0x424] ss:$16 sps:$4 sm:$0xff]   ;;  %v4781_v36 = vld [vmem:[#allocation8 + $0x2ec] ss:$16 sps:$4 sm:$0xff]  }
  0xc2   : > { %1713 = vmatpush2.bf16.msra.mxu1 %v4691_v39  ;;  %1661 = vmatprep.subr.bf16.mxu0 %v4692_v40  ;;  %v4763_v29 = vld [vmem:[#allocation8 + $0x420] ss:$16 sps:$4 sm:$0xff]   ;;  %v4771_v31 = vld [vmem:[#allocation8 + $0x404] ss:$16 sps:$4 sm:$0xff]   ;;  %v4776_v38 = vld [vmem:[#allocation8 + $0x28] ss:$16 sps:$4 sm:$0xff]  }
  0xc3   : > { %1714 = vmatprep.subr.bf16.mxu1 %v4694_v41  ;;  %v4769_v33 = vld [vmem:[#allocation8 + $0x400] ss:$16 sps:$4 sm:$0xff]   ;;  %v4779_v39 = vld [vmem:[#allocation8 + $0x2e8] ss:$16 sps:$4 sm:$0xff]   ;;  %v4784_v40 = vld [vmem:[#allocation8 + $0xc] ss:$16 sps:$4 sm:$0xff]  }
  0xc4   : > { %v5784_v37 = vld [vmem:[%s5729_s20 + $0x10] ss:$20 sps:$4 sm:$0xff]   ;;  %v4787_v41 = vld [vmem:[#allocation8 + $0x2cc] ss:$16 sps:$4 sm:$0xff]  }
  0xc5   : > { %1662 = vmatpush2.bf16.msra.mxu0 %v4696_v42  ;;  %v4782_v42 = vld [vmem:[#allocation8 + $0x8] ss:$16 sps:$4 sm:$0xff]   ;;  %v4827_v5 = vld [vmem:[#allocation8 + $0x12c] ss:$16 sps:$4 sm:$0xff]  }
  0xc6   : > { %1715 = vmatpush2.bf16.msra.mxu1 %v4697_v43  ;;  %1663 = vmatprep.subr.bf16.mxu0 %v4698_v44  ;;  %v4785_v43 = vld [vmem:[#allocation8 + $0x2c8] ss:$16 sps:$4 sm:$0xff]   ;;  %v4791_v44 = vld [vmem:[#allocation8 + $0x1ec] ss:$16 sps:$4 sm:$0xff]  }
  0xc7   : > { %1716 = vmatprep.subr.bf16.mxu1 %v4700_v45  ;;  %v4794_v45 = vld [vmem:[#allocation8 + $0x2ac] ss:$16 sps:$4 sm:$0xff]  }
  0xc9   : > { %1664 = vmatpush2.bf16.msra.mxu0 %v4702_v46  ;;  %v5790_v46 = vld [vmem:[%s5729_s20 + $0x38] ss:$20 sps:$4 sm:$0xff]  }
  0xca   : > { %1717 = vmatpush2.bf16.msra.mxu1 %v4703_v47  ;;  %1665 = vmatprep.subr.bf16.mxu0 %v4704_v49  ;;  %v4789_v47 = vld [vmem:[#allocation8 + $0x1e8] ss:$16 sps:$4 sm:$0xff]   ;;  %v4797_v49 = vld [vmem:[#allocation8 + $0x1cc] ss:$16 sps:$4 sm:$0xff]  }
  0xcb   : > { %1718 = vmatprep.subr.bf16.mxu1 %v4706_v50  ;;  %v4800_v50 = vld [vmem:[#allocation8 + $0x28c] ss:$16 sps:$4 sm:$0xff]  }
  0xcd   : > { %1666 = vmatpush2.bf16.msra.mxu0 %v4708_v52  ;;  %v4795_v52 = vld [vmem:[#allocation8 + $0x1c8] ss:$16 sps:$4 sm:$0xff]  }
  0xce   : > { %1719 = vmatpush2.bf16.msra.mxu1 %v4709_v53  ;;  %1667 = vmatprep.subr.bf16.mxu0 %v4710_v54  ;;  %v4798_v53 = vld [vmem:[#allocation8 + $0x288] ss:$16 sps:$4 sm:$0xff]   ;;  %v4803_v54 = vld [vmem:[#allocation8 + $0x1ac] ss:$16 sps:$4 sm:$0xff]  }
  0xcf   : > { %1720 = vmatprep.subr.bf16.mxu1 %v4712_v55  ;;  %v4806_v55 = vld [vmem:[#allocation8 + $0x26c] ss:$16 sps:$4 sm:$0xff]  }
  0xd1   : > { %1668 = vmatpush2.bf16.msra.mxu0 %v4714_v56  ;;  %v4801_v56 = vld [vmem:[#allocation8 + $0x1a8] ss:$16 sps:$4 sm:$0xff]  }
  0xd2   : > { %1721 = vmatpush2.bf16.msra.mxu1 %v4715_v57  ;;  %1669 = vmatprep.subr.bf16.mxu0 %v4716_v58  ;;  %v4804_v57 = vld [vmem:[#allocation8 + $0x268] ss:$16 sps:$4 sm:$0xff]   ;;  %v4809_v58 = vld [vmem:[#allocation8 + $0x18c] ss:$16 sps:$4 sm:$0xff]  }
  0xd3   : > { %1722 = vmatprep.subr.bf16.mxu1 %v4718_v59  ;;  %v4812_v59 = vld [vmem:[#allocation8 + $0x24c] ss:$16 sps:$4 sm:$0xff]  }
  0xd5   : > { %1670 = vmatpush2.bf16.msra.mxu0 %v4720_v60  ;;  %v4807_v60 = vld [vmem:[#allocation8 + $0x188] ss:$16 sps:$4 sm:$0xff]  }
  0xd6   : > { %1723 = vmatpush2.bf16.msra.mxu1 %v4721_v61  ;;  %1671 = vmatprep.subr.bf16.mxu0 %v4722_v62  ;;  %v4810_v61 = vld [vmem:[#allocation8 + $0x248] ss:$16 sps:$4 sm:$0xff]   ;;  %v4815_v62 = vld [vmem:[#allocation8 + $0x16c] ss:$16 sps:$4 sm:$0xff]  }
  0xd7   : > { %1724 = vmatprep.subr.bf16.mxu1 %v4724_v63  ;;  %v4818_v63 = vld [vmem:[#allocation8 + $0x22c] ss:$16 sps:$4 sm:$0xff]  }
  0xd9   : > { %1672 = vmatpush2.bf16.msra.mxu0 %v4726_v1  ;;  %v4816_v1 = vld [vmem:[#allocation8 + $0x228] ss:$16 sps:$4 sm:$0xff]  }
  0xda   : > { %1725 = vmatpush2.bf16.msra.mxu1 %v4727_v2  ;;  %4179 = vmatprep.subr.msk.bf16.mxu0 %vm1628_vm0, %v4176_v3  ;;  %v4824_v2 = vld [vmem:[#allocation8 + $0x20c] ss:$16 sps:$4 sm:$0xff]   ;;  %v4819_v3 = vld [vmem:[#allocation8 + $0x148] ss:$16 sps:$4 sm:$0xff]  }
  0xdb   : > { %1800 = vmatprep.subr.bf16.mxu1 %v4737_v4  ;;  %v4822_v4 = vld [vmem:[#allocation8 + $0x208] ss:$16 sps:$4 sm:$0xff]  }
  0xdc   : > { %1674 = vmatmul.mubr.bf16.vlgmr.msra.gmra.mxu0 %v5756_v6 }
  0xdd   : > { %1727 = vmatmul.mubr.bf16.vlgmr.msra.gmra.mxu1 %v5759_v7  ;;  %1752 = vmatpush1.bf16.msra.mxu0 %v1630_v10  ;;  %v4828_v10 = vld [vmem:[#allocation8 + $0x3e8] ss:$16 sps:$4 sm:$0xff]  }
  0xde   : > { %1801 = vmatpush1.bf16.msra.mxu1 %v4735_v8  ;;  %1753 = vmatprep.subr.bf16.mxu0 %v4741_v9  ;;  %v4830_v8 = vld [vmem:[#allocation8 + $0x3ec] ss:$16 sps:$4 sm:$0xff]   ;;  %v4825_v9 = vld [vmem:[#allocation8 + $0x128] ss:$16 sps:$4 sm:$0xff]  }
  0xdf   : > { %1802 = vmatprep.subr.bf16.mxu1 %v4744_v11  ;;  %1683 = vmatprep.mubr.bf16.mxu0 %v5764_v12  ;;  %v4833_v11 = vld [vmem:[#allocation8 + $0x10c] ss:$16 sps:$4 sm:$0xff]  }
  0xe0   : > { %1736 = vmatprep.mubr.bf16.mxu1 %v5767_v13 }
  0xe1   : > { %1754 = vmatpush1.bf16.msra.mxu0 %v4739_v14  ;;  %v4836_v14 = vld [vmem:[#allocation8 + $0x3cc] ss:$16 sps:$4 sm:$0xff]  }
  0xe2   : > { %1803 = vmatpush1.bf16.msra.mxu1 %v4742_v15  ;;  %1755 = vmatprep.subr.bf16.mxu0 %v4747_v16  ;;  %v820_v15 = vld [vmem:[#allocation8 + $0x4a8] sm:$0xff] }
  0xe3   : > { %1804 = vmatprep.subr.bf16.mxu1 %v4750_v17  ;;  %v4831_v16 = vld [vmem:[#allocation8 + $0x108] ss:$16 sps:$4 sm:$0xff]  }
  0xe4   : > { %1684 = vmatmul.mubr.bf16.gmra.mxu0 %v5774_v19  ;;  %v4834_v17 = vld [vmem:[#allocation8 + $0x3c8] ss:$16 sps:$4 sm:$0xff]  }
  0xe5   : > { %1737 = vmatmul.mubr.bf16.gmra.mxu1 %v5777_v20  ;;  %1756 = vmatpush1.bf16.msra.mxu0 %v4745_v18  ;;  %v4839_v18 = vld [vmem:[#allocation8 + $0x3ac] ss:$16 sps:$4 sm:$0xff]  }
  0xe6   : > { %1805 = vmatpush1.bf16.msra.mxu1 %v4748_v21  ;;  %1757 = vmatprep.subr.bf16.mxu0 %v4759_v22  ;;  %v4178_v21 = vcombine.high %v820_v15, %v820_v15  ;;  %v4177_v22 = vcombine.low %v820_v15, %v820_v15  ;;  %v4920_v15 = vld [vmem:[#allocation7 + $0x1e0] ss:$16 sps:$4 sm:$0xff]  }
  0xe7   : > { %1806 = vmatprep.subr.bf16.mxu1 %v4762_v23  ;;  %1779 = vmatprep.mubr.bf16.mxu0 %v5474_v28  ;;  %v4837_v23 = vld [vmem:[#allocation8 + $0x3a8] ss:$16 sps:$4 sm:$0xff]  }
  0xe8   : > { %1832 = vmatprep.mubr.bf16.mxu1 %v5748_v48  ;;  %v4792_v48 = vld [vmem:[#allocation8 + $0x2a8] ss:$16 sps:$4 sm:$0xff]  }
  0xe9   : > { %1758 = vmatpush1.bf16.msra.mxu0 %v4757_v24  ;;  %v4844_v24 = vld [vmem:[#allocation8 + $0x38c] ss:$16 sps:$4 sm:$0xff]  }
  0xea   : > { %1807 = vmatpush1.bf16.msra.mxu1 %v4760_v25  ;;  %1759 = vmatprep.subr.bf16.mxu0 %v4765_v26  ;;  %v1636_v25 = vsel %vm1628_vm0, %v4177_v22, 0  ;;  %v4847_v26 = vld [vmem:[#allocation8 + $0x48c] ss:$16 sps:$4 sm:$0xff]   ;;  %v4929_v22 = vld [vmem:[#allocation7 + $0x3c0] ss:$16 sps:$4 sm:$0xff]  }
  0xeb   : > { %1808 = vmatprep.subr.bf16.mxu1 %v4768_v27  ;;  %v4842_v27 = vld [vmem:[#allocation8 + $0x388] ss:$16 sps:$4 sm:$0xff]  }
  0xed   : > { %1760 = vmatpush1.bf16.msra.mxu0 %v4763_v29  ;;  %v4845_v29 = vld [vmem:[#allocation8 + $0x488] ss:$16 sps:$4 sm:$0xff]  }
  0xee   : > { %1809 = vmatpush1.bf16.msra.mxu1 %v4766_v30  ;;  %1761 = vmatprep.subr.bf16.mxu0 %v4771_v31  ;;  %v4850_v30 = vld [vmem:[#allocation8 + $0x36c] ss:$16 sps:$4 sm:$0xff]  }
  0xef   : > { %1810 = vmatprep.subr.bf16.mxu1 %v4774_v32  ;;  %v4853_v31 = vld [vmem:[#allocation8 + $0x46c] ss:$16 sps:$4 sm:$0xff]   ;;  %v4848_v32 = vld [vmem:[#allocation8 + $0x368] ss:$16 sps:$4 sm:$0xff]  }
  0xf1   : > { %1762 = vmatpush1.bf16.msra.mxu0 %v4769_v33  ;;  %v4851_v33 = vld [vmem:[#allocation8 + $0x468] ss:$16 sps:$4 sm:$0xff]  }
  0xf2   : > { %1811 = vmatpush1.bf16.msra.mxu1 %v4772_v34  ;;  %1853 = vmatprep.subr.bf16.mxu0 %v4781_v36  ;;  %v4856_v34 = vld [vmem:[#allocation8 + $0x34c] ss:$16 sps:$4 sm:$0xff]   ;;  %v4854_v36 = vld [vmem:[#allocation8 + $0x348] ss:$16 sps:$4 sm:$0xff]  }
  0xf3   : > { %1812 = vmatprep.subr.bf16.mxu1 %v4778_v35  ;;  %v4859_v35 = vld [vmem:[#allocation8 + $0x44c] ss:$16 sps:$4 sm:$0xff]  }
  0xf4   : > { %4180 = vmatmul.mubr.msk.bf16.vlgmr.msra.gmra.mxu0 %vm1621_vm1, %v5784_v37 }
  0xf5   : > { %1854 = vmatpush1.bf16.msra.mxu0 %v4779_v39  ;;  %1789 = vmatprep.mubr.bf16.mxu0 %v5474_v28  ;;  %v4865_v39 = vld [vmem:[#allocation8 + $0x42c] ss:$16 sps:$4 sm:$0xff]  }
  0xf6   : > { %1813 = vmatpush1.bf16.msra.mxu1 %v4776_v38  ;;  %1855 = vmatprep.subr.bf16.mxu0 %v4787_v41  ;;  %v4862_v38 = vld [vmem:[#allocation8 + $0x32c] ss:$16 sps:$4 sm:$0xff]  }
  0xf7   : > { %1814 = vmatprep.subr.bf16.mxu1 %v4784_v40  ;;  %v4863_v40 = vld [vmem:[#allocation8 + $0x428] ss:$16 sps:$4 sm:$0xff]   ;;  %v4868_v41 = vld [vmem:[#allocation8 + $0x30c] ss:$16 sps:$4 sm:$0xff]  }
  0xf9   : > { %1856 = vmatpush1.bf16.msra.mxu0 %v4785_v43  ;;  %v4866_v43 = vld [vmem:[#allocation8 + $0x308] ss:$16 sps:$4 sm:$0xff]  }
  0xfa   : > { %1815 = vmatpush1.bf16.msra.mxu1 %v4782_v42  ;;  %1857 = vmatprep.subr.bf16.mxu0 %v4794_v45  ;;  %v4871_v42 = vld [vmem:[#allocation8 + $0x40c] ss:$16 sps:$4 sm:$0xff]   ;;  %v4877_v45 = vld [vmem:[#allocation7 + $0x2e4] ss:$16 sps:$4 sm:$0xff]  }
  0xfb   : > { %1816 = vmatprep.subr.bf16.mxu1 %v4791_v44  ;;  %v4869_v44 = vld [vmem:[#allocation8 + $0x408] ss:$16 sps:$4 sm:$0xff]  }
  0xfc   : > { %4181 = vmatmul.mubr.msk.bf16.gmra.mxu0 %vm1621_vm1, %v5790_v46 }
  0xfd   : > { %1858 = vmatpush1.bf16.msra.mxu0 %v4792_v48  ;;  %1885 = vmatprep.mubr.bf16.mxu0 %v5751_v51  ;;  %v4821_v51 = vld [vmem:[#allocation8 + $0x14c] ss:$16 sps:$4 sm:$0xff]   ;;  %v4875_v48 = vld [vmem:[#allocation7 + $0x2e0] ss:$16 sps:$4 sm:$0xff]  }
  0xfe   : > { %1817 = vmatpush2.bf16.msra.mxu1 %v4789_v47  ;;  %1859 = vmatprep.subr.bf16.mxu0 %v4800_v50  ;;  %v4872_v47 = vld [vmem:[#allocation7 + $0xe0] ss:$16 sps:$4 sm:$0xff]   ;;  %v4883_v50 = vld [vmem:[#allocation7 + $0x2c4] ss:$16 sps:$4 sm:$0xff]  }
  0xff   : > { %1818 = vmatprep.subr.bf16.mxu1 %v4797_v49  ;;  %v4880_v49 = vld [vmem:[#allocation7 + $0xc4] ss:$16 sps:$4 sm:$0xff]  }
 0x101   : > { %1860 = vmatpush1.bf16.msra.mxu0 %v4798_v53  ;;  %v4881_v53 = vld [vmem:[#allocation7 + $0x2c0] ss:$16 sps:$4 sm:$0xff]  }
 0x102   : > { %1819 = vmatpush2.bf16.msra.mxu1 %v4795_v52  ;;  %1861 = vmatprep.subr.bf16.mxu0 %v4806_v55  ;;  %v4878_v52 = vld [vmem:[#allocation7 + $0xc0] ss:$16 sps:$4 sm:$0xff]   ;;  %v4889_v55 = vld [vmem:[#allocation7 + $0x2a4] ss:$16 sps:$4 sm:$0xff]  }
 0x103   : > { %1820 = vmatprep.subr.bf16.mxu1 %v4803_v54  ;;  %v4886_v54 = vld [vmem:[#allocation7 + $0xa4] ss:$16 sps:$4 sm:$0xff]  }
 0x105   : > { %1862 = vmatpush1.bf16.msra.mxu0 %v4804_v57  ;;  %v4887_v57 = vld [vmem:[#allocation7 + $0x2a0] ss:$16 sps:$4 sm:$0xff]  }
 0x106   : > { %1821 = vmatpush2.bf16.msra.mxu1 %v4801_v56  ;;  %1863 = vmatprep.subr.bf16.mxu0 %v4812_v59  ;;  %v4884_v56 = vld [vmem:[#allocation7 + $0xa0] ss:$16 sps:$4 sm:$0xff]   ;;  %v5810_v59 = vld [vmem:[%s5721_s29 + $0xc] ss:$24 sps:$4 sm:$0xff]  }
 0x107   : > { %1822 = vmatprep.subr.bf16.mxu1 %v4809_v58  ;;  %v5807_v58 = vld [vmem:[%s5721_s29 + $0x4] ss:$24 sps:$4 sm:$0xff]  }
 0x109   : > { %1864 = vmatpush1.bf16.msra.mxu0 %v4810_v61  ;;  %v4901_v61 = vld [vmem:[#allocation7 + $0x264] ss:$16 sps:$4 sm:$0xff]  }
 0x10a   : > { %1823 = vmatpush2.bf16.msra.mxu1 %v4807_v60  ;;  %1865 = vmatprep.subr.bf16.mxu0 %v4818_v63  ;;  %v4893_v60 = vld [vmem:[#allocation7 + $0x280] ss:$16 sps:$4 sm:$0xff]  }
 0x10b   : > { %1824 = vmatprep.subr.bf16.mxu1 %v4815_v62  ;;  %v4896_v62 = vld [vmem:[#allocation7 + $0x60] ss:$16 sps:$4 sm:$0xff]  }
 0x10c   : > { %v4899_v63 = vld [vmem:[#allocation7 + $0x260] ss:$16 sps:$4 sm:$0xff]  }
 0x10d   : > { %1866 = vmatpush1.bf16.msra.mxu0 %v4816_v1  ;;  %v4905_v1 = vld [vmem:[#allocation7 + $0x240] ss:$16 sps:$4 sm:$0xff]  }
 0x10e   : > { %1825 = vmatpush2.bf16.msra.mxu1 %v4813_v0  ;;  %1867 = vmatprep.subr.bf16.mxu0 %v4824_v2  ;;  %v4902_v0 = vld [vmem:[#allocation7 + $0x40] ss:$16 sps:$4 sm:$0xff]   ;;  %v4913_v2 = vld [vmem:[#allocation7 + $0x224] ss:$16 sps:$4 sm:$0xff]  }
 0x10f   : > { %1826 = vmatprep.subr.bf16.mxu1 %v4821_v51  ;;  %v4910_v51 = vld [vmem:[#allocation7 + $0x24] ss:$16 sps:$4 sm:$0xff]  }
 0x111   : > { %1868 = vmatpush1.bf16.msra.mxu0 %v4822_v4  ;;  %v4911_v4 = vld [vmem:[#allocation7 + $0x220] ss:$16 sps:$4 sm:$0xff]  }
 0x112   : > { %1827 = vmatpush2.bf16.msra.mxu1 %v4819_v3  ;;  %1869 = vmatprep.subr.bf16.mxu0 %v4830_v8  ;;  %v4908_v3 = vld [vmem:[#allocation7 + $0x20] ss:$16 sps:$4 sm:$0xff]   ;;  %v4919_v8 = vld [vmem:[#allocation7 + $0x204] ss:$16 sps:$4 sm:$0xff]  }
 0x113   : > { %1828 = vmatprep.subr.bf16.mxu1 %v4827_v5  ;;  %v4916_v5 = vld [vmem:[#allocation7 + $0x4] ss:$16 sps:$4 sm:$0xff]  }
 0x115   : > { %1870 = vmatpush2.bf16.msra.mxu0 %v4828_v10  ;;  %v4917_v10 = vld [vmem:[#allocation7 + $0x200] ss:$16 sps:$4 sm:$0xff]  }
 0x116   : > { %1829 = vmatpush2.bf16.msra.mxu1 %v4825_v9  ;;  %1871 = vmatprep.subr.bf16.mxu0 %v4836_v14  ;;  %v4914_v9 = vld [vmem:[#allocation7] ss:$16 sps:$4 sm:$0xff]   ;;  %v4925_v14 = vld [vmem:[#allocation7 + $0x3e4] ss:$16 sps:$4 sm:$0xff]  }
 0x117   : > { %1830 = vmatprep.subr.bf16.mxu1 %v4833_v11  ;;  %v4922_v11 = vld [vmem:[#allocation7 + $0x1e4] ss:$16 sps:$4 sm:$0xff]  }
 0x119   : > { %1872 = vmatpush2.bf16.msra.mxu0 %v4834_v17  ;;  %v4928_v17 = vld [vmem:[#allocation7 + $0x1c4] ss:$16 sps:$4 sm:$0xff]  }
 0x11a   : > { %1831 = vmatpush2.bf16.msra.mxu1 %v4831_v16  ;;  %1873 = vmatprep.subr.bf16.mxu0 %v4839_v18  ;;  %v4923_v16 = vld [vmem:[#allocation7 + $0x3e0] ss:$16 sps:$4 sm:$0xff]   ;;  %v4931_v18 = vld [vmem:[#allocation7 + $0x3c4] ss:$16 sps:$4 sm:$0xff]  }
 0x11b   : > { %4182 = vmatprep.subr.msk.bf16.mxu1 %vm1628_vm0, %v4178_v21  ;;  %v4926_v21 = vld [vmem:[#allocation7 + $0x1c0] ss:$16 sps:$4 sm:$0xff]  }
 0x11d   : > { %1833 = vmatmul.mubr.bf16.vlgmr.msra.gmra.mxu1 %v5756_v6  ;;  %1874 = vmatpush2.bf16.msra.mxu0 %v4837_v23  ;;  %v4857_v6 = vld [vmem:[#allocation8 + $0x448] ss:$16 sps:$4 sm:$0xff]   ;;  %v4934_v23 = vld [vmem:[#allocation7 + $0x1a4] ss:$16 sps:$4 sm:$0xff]  }
 0x11e   : > { %1911 = vmatpush1.bf16.msra.mxu1 %v1636_v25  ;;  %1875 = vmatprep.subr.bf16.mxu0 %v4844_v24  ;;  %v4937_v24 = vld [vmem:[#allocation7 + $0x3a4] ss:$16 sps:$4 sm:$0xff]   ;;  %v4932_v25 = vld [vmem:[#allocation7 + $0x1a0] ss:$16 sps:$4 sm:$0xff]  }
 0x11f   : > { %1912 = vmatprep.subr.bf16.mxu1 %v4847_v26  ;;  %1842 = vmatprep.mubr.bf16.mxu1 %v5764_v12  ;;  %v4860_v12 = vld [vmem:[#allocation8 + $0x328] ss:$16 sps:$4 sm:$0xff]   ;;  %v4935_v26 = vld [vmem:[#allocation7 + $0x3a0] ss:$16 sps:$4 sm:$0xff]  }
 0x121   : > { %1876 = vmatpush2.bf16.msra.mxu0 %v4842_v27  ;;  %v4940_v27 = vld [vmem:[#allocation7 + $0x184] ss:$16 sps:$4 sm:$0xff]  }
 0x122   : > { %1913 = vmatpush1.bf16.msra.mxu1 %v4845_v29  ;;  %1877 = vmatprep.subr.bf16.mxu0 %v4850_v30  ;;  %v4943_v29 = vld [vmem:[#allocation7 + $0x384] ss:$16 sps:$4 sm:$0xff]   ;;  %v4938_v30 = vld [vmem:[#allocation7 + $0x180] ss:$16 sps:$4 sm:$0xff]  }
 0x123   : > { %1914 = vmatprep.subr.bf16.mxu1 %v4853_v31  ;;  %v4941_v31 = vld [vmem:[#allocation7 + $0x380] ss:$16 sps:$4 sm:$0xff]  }
 0x125   : > { %1843 = vmatmul.mubr.bf16.gmra.mxu1 %v5774_v19  ;;  %1878 = vmatpush2.bf16.msra.mxu0 %v4848_v32  ;;  %v4874_v19 = vld [vmem:[#allocation7 + $0xe4] ss:$16 sps:$4 sm:$0xff]  }
 0x126   : > { %1915 = vmatpush1.bf16.msra.mxu1 %v4851_v33  ;;  %1879 = vmatprep.subr.bf16.mxu0 %v4856_v34  ;;  %v4946_v32 = vld [vmem:[#allocation7 + $0x164] ss:$16 sps:$4 sm:$0xff]   ;;  %v4944_v34 = vld [vmem:[#allocation7 + $0x160] ss:$16 sps:$4 sm:$0xff]  }
 0x127   : > { %1916 = vmatprep.subr.bf16.mxu1 %v4859_v35  ;;  %1938 = vmatprep.mubr.bf16.mxu1 %v5474_v28  ;;  %v4949_v33 = vld [vmem:[#allocation7 + $0x364] ss:$16 sps:$4 sm:$0xff]   ;;  %v4947_v35 = vld [vmem:[#allocation7 + $0x360] ss:$16 sps:$4 sm:$0xff]  }
 0x129   : > { %1880 = vmatpush2.bf16.msra.mxu0 %v4854_v36  ;;  %v4952_v36 = vld [vmem:[#allocation7 + $0x144] ss:$16 sps:$4 sm:$0xff]  }
 0x12a   : > { %1917 = vmatpush1.bf16.msra.mxu1 %v4857_v6  ;;  %1881 = vmatprep.subr.bf16.mxu0 %v4862_v38  ;;  %v4955_v6 = vld [vmem:[#allocation7 + $0x344] ss:$16 sps:$4 sm:$0xff]   ;;  %v4950_v38 = vld [vmem:[#allocation7 + $0x140] ss:$16 sps:$4 sm:$0xff]  }
 0x12b   : > { %1918 = vmatprep.subr.bf16.mxu1 %v4865_v39  ;;  %v4953_v39 = vld [vmem:[#allocation7 + $0x340] ss:$16 sps:$4 sm:$0xff]  }
 0x12d   : > { %1882 = vmatpush2.bf16.msra.mxu0 %v4860_v12  ;;  %v4958_v12 = vld [vmem:[#allocation7 + $0x124] ss:$16 sps:$4 sm:$0xff]  }
 0x12e   : > { %1919 = vmatpush1.bf16.msra.mxu1 %v4863_v40  ;;  %1883 = vmatprep.subr.bf16.mxu0 %v4868_v41  ;;  %v4961_v40 = vld [vmem:[#allocation7 + $0x324] ss:$16 sps:$4 sm:$0xff]   ;;  %v4956_v41 = vld [vmem:[#allocation7 + $0x120] ss:$16 sps:$4 sm:$0xff]  }
 0x12f   : > { %1920 = vmatprep.subr.bf16.mxu1 %v4871_v42  ;;  %v4959_v42 = vld [vmem:[#allocation7 + $0x320] ss:$16 sps:$4 sm:$0xff]  }
 0x131   : > { %1884 = vmatpush2.bf16.msra.mxu0 %v4866_v43  ;;  %v4964_v43 = vld [vmem:[#allocation7 + $0x104] ss:$16 sps:$4 sm:$0xff]  }
 0x132   : > { %1921 = vmatpush1.bf16.msra.mxu1 %v4869_v44  ;;  %2979 = vmatprep.subr.bf16.mxu0 %v4874_v19  ;;  %v4967_v44 = vld [vmem:[#allocation7 + $0x304] ss:$16 sps:$4 sm:$0xff]   ;;  %v4962_v19 = vld [vmem:[#allocation7 + $0x100] ss:$16 sps:$4 sm:$0xff]  }
 0x133   : > { %3032 = vmatprep.subr.bf16.mxu1 %v4877_v45  ;;  %v4965_v45 = vld [vmem:[#allocation7 + $0x300] ss:$16 sps:$4 sm:$0xff]  }
 0x134   : > { %1886 = vmatmul.mubr.bf16.vlgmr.msra.gmra.mxu0 %v5759_v7  ;;  %v4892_v7 = vld [vmem:[#allocation7 + $0x84] ss:$16 sps:$4 sm:$0xff]  }
 0x135   : > { %4183 = vmatmul.mubr.msk.bf16.vlgmr.msra.gmra.mxu1 %vm1621_vm1, %v5784_v37  ;;  %2980 = vmatpush1.bf16.msra.mxu0 %v4872_v47  ;;  %v4895_v37 = vld [vmem:[#allocation7 + $0x284] ss:$16 sps:$4 sm:$0xff]  }
 0x136   : > { %3033 = vmatpush1.bf16.msra.mxu1 %v4875_v48  ;;  %2981 = vmatprep.subr.bf16.mxu0 %v4880_v49  ;;  %v4976_v47 = vld [vmem:[#allocation7 + $0x4e4] ss:$16 sps:$4 sm:$0xff]   ;;  %v4979_v48 = vld [vmem:[#allocation7 + $0xec] ss:$16 sps:$4 sm:$0xff]   ;;  %v5818_v49 = vld [vmem:[%s5721_s29] ss:$24 sps:$4 sm:$0xff]  }
 0x137   : > { %3034 = vmatprep.subr.bf16.mxu1 %v4883_v50  ;;  %1895 = vmatprep.mubr.bf16.mxu0 %v5767_v13  ;;  %v4890_v13 = vld [vmem:[#allocation7 + $0x80] ss:$16 sps:$4 sm:$0xff]  }
 0x138   : > { %1948 = vmatprep.mubr.bf16.mxu1 %v5474_v28  ;;  %v4898_v28 = vld [vmem:[#allocation7 + $0x64] ss:$16 sps:$4 sm:$0xff]   ;;  %v5821_v50 = vld [vmem:[%s5721_s29 + $0x8] ss:$24 sps:$4 sm:$0xff]  }
 0x139   : > { %2982 = vmatpush1.bf16.msra.mxu0 %v4878_v52  ;;  %v4974_v52 = vld [vmem:[#allocation7 + $0x4e0] ss:$16 sps:$4 sm:$0xff]  }
 0x13a   : > { %3035 = vmatpush1.bf16.msra.mxu1 %v4881_v53  ;;  %2983 = vmatprep.subr.bf16.mxu0 %v4886_v54  ;;  %v4977_v53 = vld [vmem:[#allocation7 + $0xe8] ss:$16 sps:$4 sm:$0xff]   ;;  %v4982_v54 = vld [vmem:[#allocation7 + $0x4c4] ss:$16 sps:$4 sm:$0xff]  }
 0x13b   : > { %3036 = vmatprep.subr.bf16.mxu1 %v4889_v55  ;;  %v4985_v55 = vld [vmem:[#allocation7 + $0xcc] ss:$16 sps:$4 sm:$0xff]  }
 0x13c   : > { %1896 = vmatmul.mubr.bf16.gmra.mxu0 %v5777_v20  ;;  %v4904_v20 = vld [vmem:[#allocation7 + $0x44] ss:$16 sps:$4 sm:$0xff]  }
 0x13d   : > { %4184 = vmatmul.mubr.msk.bf16.gmra.mxu1 %vm1621_vm1, %v5790_v46  ;;  %2984 = vmatpush1.bf16.msra.mxu0 %v4884_v56  ;;  %v4907_v46 = vld [vmem:[#allocation7 + $0x244] ss:$16 sps:$4 sm:$0xff]  }
 0x13e   : > { %3037 = vmatpush1.bf16.msra.mxu1 %v4887_v57  ;;  %2985 = vmatprep.subr.bf16.mxu0 %v4892_v7  ;;  %v5824_v56 = vld [vmem:[%s5721_s29 + $0x34] ss:$24 sps:$4 sm:$0xff]   ;;  %v4980_v7 = vld [vmem:[#allocation7 + $0x4c0] ss:$16 sps:$4 sm:$0xff]  }
 0x13f   : > { %3038 = vmatprep.subr.bf16.mxu1 %v4895_v37  ;;  %3011 = vmatprep.mubr.bf16.mxu0 %v5807_v58  ;;  %v5827_v57 = vld [vmem:[%s5721_s29 + $0x3c] ss:$24 sps:$4 sm:$0xff]   ;;  %v4983_v37 = vld [vmem:[#allocation7 + $0xc8] ss:$16 sps:$4 sm:$0xff]  }
 0x140   : > { %3064 = vmatprep.mubr.bf16.mxu1 %v5810_v59 }
 0x141   : > { %2986 = vmatpush1.bf16.msra.mxu0 %v4890_v13  ;;  %v4991_v13 = vld [vmem:[#allocation7 + $0x4a4] ss:$16 sps:$4 sm:$0xff]  }
 0x142   : > { %3039 = vmatpush1.bf16.msra.mxu1 %v4893_v60  ;;  %2987 = vmatprep.subr.bf16.mxu0 %v4898_v28  ;;  %v4994_v60 = vld [vmem:[#allocation7 + $0xac] ss:$16 sps:$4 sm:$0xff]   ;;  %v5833_v28 = vld [vmem:[%s5721_s29 + $0x30] ss:$24 sps:$4 sm:$0xff]  }
 0x143   : > { %3040 = vmatprep.subr.bf16.mxu1 %v4901_v61  ;;  %v4989_v61 = vld [vmem:[#allocation7 + $0x4a0] ss:$16 sps:$4 sm:$0xff]  }
 0x145   : > { %2988 = vmatpush1.bf16.msra.mxu0 %v4896_v62  ;;  %v4992_v62 = vld [vmem:[#allocation7 + $0xa8] ss:$16 sps:$4 sm:$0xff]  }
 0x146   : > { %3041 = vmatpush1.bf16.msra.mxu1 %v4899_v63  ;;  %2989 = vmatprep.subr.bf16.mxu0 %v4904_v20  ;;  %v5837_v63 = vld [vmem:[%s5721_s29 + $0x38] ss:$24 sps:$4 sm:$0xff]   ;;  %v5000_v20 = vld [vmem:[#allocation7 + $0x484] ss:$16 sps:$4 sm:$0xff]  }
 0x147   : > { %3042 = vmatprep.subr.bf16.mxu1 %v4907_v46  ;;  %v5003_v46 = vld [vmem:[#allocation7 + $0x8c] ss:$16 sps:$4 sm:$0xff]  }
 0x149   : > { %2990 = vmatpush1.bf16.msra.mxu0 %v4902_v0  ;;  %v5840_v0 = vld [vmem:[%s5721_s29 + $0x14] ss:$24 sps:$4 sm:$0xff]  }
 0x14a   : > { %3043 = vmatpush1.bf16.msra.mxu1 %v4905_v1  ;;  %2991 = vmatprep.subr.bf16.mxu0 %v4910_v51  ;;  %v4998_v1 = vld [vmem:[#allocation7 + $0x480] ss:$16 sps:$4 sm:$0xff]   ;;  %v5001_v51 = vld [vmem:[#allocation7 + $0x88] ss:$16 sps:$4 sm:$0xff]  }
 0x14b   : > { %3044 = vmatprep.subr.bf16.mxu1 %v4913_v2  ;;  %v5006_v2 = vld [vmem:[#allocation7 + $0x464] ss:$16 sps:$4 sm:$0xff]  }
 0x14d   : > { %2992 = vmatpush1.bf16.msra.mxu0 %v4908_v3  ;;  %v5009_v3 = vld [vmem:[#allocation7 + $0x6c] ss:$16 sps:$4 sm:$0xff]  }
 0x14e   : > { %3045 = vmatpush1.bf16.msra.mxu1 %v4911_v4  ;;  %2993 = vmatprep.subr.bf16.mxu0 %v4916_v5  ;;  %v5004_v4 = vld [vmem:[#allocation7 + $0x460] ss:$16 sps:$4 sm:$0xff]   ;;  %v5007_v5 = vld [vmem:[#allocation7 + $0x68] ss:$16 sps:$4 sm:$0xff]  }
 0x14f   : > { %3046 = vmatprep.subr.bf16.mxu1 %v4919_v8  ;;  %v5012_v8 = vld [vmem:[#allocation7 + $0x444] ss:$16 sps:$4 sm:$0xff]  }
 0x151   : > { %2994 = vmatpush1.bf16.msra.mxu0 %v4914_v9  ;;  %v5015_v9 = vld [vmem:[#allocation7 + $0x4c] ss:$16 sps:$4 sm:$0xff]  }
 0x152   : > { %3047 = vmatpush1.bf16.msra.mxu1 %v4917_v10  ;;  %2995 = vmatprep.subr.bf16.mxu0 %v4922_v11  ;;  %v5010_v10 = vld [vmem:[#allocation7 + $0x440] ss:$16 sps:$4 sm:$0xff]   ;;  %v5013_v11 = vld [vmem:[#allocation7 + $0x48] ss:$16 sps:$4 sm:$0xff]  }
 0x153   : > { %3048 = vmatprep.subr.bf16.mxu1 %v4925_v14  ;;  %v5018_v14 = vld [vmem:[#allocation7 + $0x424] ss:$16 sps:$4 sm:$0xff]  }
 0x155   : > { %2996 = vmatpush2.bf16.msra.mxu0 %v4920_v15  ;;  %v5021_v15 = vld [vmem:[#allocation7 + $0x2c] ss:$16 sps:$4 sm:$0xff]  }
 0x156   : > { %3049 = vmatpush2.bf16.msra.mxu1 %v4923_v16  ;;  %2997 = vmatprep.subr.bf16.mxu0 %v4928_v17  ;;  %v5016_v16 = vld [vmem:[#allocation7 + $0x420] ss:$16 sps:$4 sm:$0xff]   ;;  %v5019_v17 = vld [vmem:[#allocation7 + $0x28] ss:$16 sps:$4 sm:$0xff]  }
 0x157   : > { %3050 = vmatprep.subr.bf16.mxu1 %v4931_v18  ;;  %v5027_v18 = vld [vmem:[#allocation7 + $0xc] ss:$16 sps:$4 sm:$0xff]  }
 0x159   : > { %2998 = vmatpush2.bf16.msra.mxu0 %v4926_v21  ;;  %v5022_v21 = vld [vmem:[#allocation7 + $0x400] ss:$16 sps:$4 sm:$0xff]  }
 0x15a   : > { %3051 = vmatpush2.bf16.msra.mxu1 %v4929_v22  ;;  %2999 = vmatprep.subr.bf16.mxu0 %v4934_v23  ;;  %v5025_v22 = vld [vmem:[#allocation7 + $0x8] ss:$16 sps:$4 sm:$0xff]   ;;  %v5030_v23 = vld [vmem:[#allocation7 + $0x5e4] ss:$16 sps:$4 sm:$0xff]  }
 0x15b   : > { %3052 = vmatprep.subr.bf16.mxu1 %v4937_v24  ;;  %v5033_v24 = vld [vmem:[#allocation7 + $0x1ec] ss:$16 sps:$4 sm:$0xff]  }
 0x15d   : > { %3000 = vmatpush2.bf16.msra.mxu0 %v4932_v25  ;;  %v5028_v25 = vld [vmem:[#allocation7 + $0x5e0] ss:$16 sps:$4 sm:$0xff]  }
 0x15e   : > { %3053 = vmatpush2.bf16.msra.mxu1 %v4935_v26  ;;  %3001 = vmatprep.subr.bf16.mxu0 %v4940_v27  ;;  %v5031_v26 = vld [vmem:[#allocation7 + $0x1e8] ss:$16 sps:$4 sm:$0xff]   ;;  %v5036_v27 = vld [vmem:[#allocation7 + $0x5c4] ss:$16 sps:$4 sm:$0xff]  }
 0x15f   : > { %3054 = vmatprep.subr.bf16.mxu1 %v4943_v29  ;;  %v5039_v29 = vld [vmem:[#allocation7 + $0x1cc] ss:$16 sps:$4 sm:$0xff]  }
 0x161   : > { %3002 = vmatpush2.bf16.msra.mxu0 %v4938_v30  ;;  %v5034_v30 = vld [vmem:[#allocation7 + $0x5c0] ss:$16 sps:$4 sm:$0xff]  }
 0x162   : > { %3055 = vmatpush2.bf16.msra.mxu1 %v4941_v31  ;;  %3003 = vmatprep.subr.bf16.mxu0 %v4946_v32  ;;  %v5037_v31 = vld [vmem:[#allocation7 + $0x1c8] ss:$16 sps:$4 sm:$0xff]   ;;  %v5042_v32 = vld [vmem:[#allocation7 + $0x5a4] ss:$16 sps:$4 sm:$0xff]  }
 0x163   : > { %3056 = vmatprep.subr.bf16.mxu1 %v4949_v33  ;;  %v5045_v33 = vld [vmem:[#allocation7 + $0x1ac] ss:$16 sps:$4 sm:$0xff]  }
 0x165   : > { %3004 = vmatpush2.bf16.msra.mxu0 %v4944_v34  ;;  %v5040_v34 = vld [vmem:[#allocation7 + $0x5a0] ss:$16 sps:$4 sm:$0xff]  }
 0x166   : > { %3057 = vmatpush2.bf16.msra.mxu1 %v4947_v35  ;;  %3005 = vmatprep.subr.bf16.mxu0 %v4952_v36  ;;  %v5043_v35 = vld [vmem:[#allocation7 + $0x1a8] ss:$16 sps:$4 sm:$0xff]   ;;  %v5048_v36 = vld [vmem:[#allocation7 + $0x584] ss:$16 sps:$4 sm:$0xff]  }
 0x167   : > { %3058 = vmatprep.subr.bf16.mxu1 %v4955_v6  ;;  %v5051_v6 = vld [vmem:[#allocation7 + $0x18c] ss:$16 sps:$4 sm:$0xff]  }
 0x169   : > { %3006 = vmatpush2.bf16.msra.mxu0 %v4950_v38  ;;  %v5046_v38 = vld [vmem:[#allocation7 + $0x580] ss:$16 sps:$4 sm:$0xff]  }
 0x16a   : > { %3059 = vmatpush2.bf16.msra.mxu1 %v4953_v39  ;;  %3007 = vmatprep.subr.bf16.mxu0 %v4958_v12  ;;  %v5049_v39 = vld [vmem:[#allocation7 + $0x188] ss:$16 sps:$4 sm:$0xff]   ;;  %v5054_v12 = vld [vmem:[#allocation7 + $0x564] ss:$16 sps:$4 sm:$0xff]  }
 0x16b   : > { %3060 = vmatprep.subr.bf16.mxu1 %v4961_v40  ;;  %v5057_v40 = vld [vmem:[#allocation7 + $0x16c] ss:$16 sps:$4 sm:$0xff]  }
 0x16d   : > { %3008 = vmatpush2.bf16.msra.mxu0 %v4956_v41  ;;  %v5052_v41 = vld [vmem:[#allocation7 + $0x560] ss:$16 sps:$4 sm:$0xff]  }
 0x16e   : > { %3061 = vmatpush2.bf16.msra.mxu1 %v4959_v42  ;;  %3009 = vmatprep.subr.bf16.mxu0 %v4964_v43  ;;  %v5055_v42 = vld [vmem:[#allocation7 + $0x168] ss:$16 sps:$4 sm:$0xff]   ;;  %v5060_v43 = vld [vmem:[#allocation7 + $0x544] ss:$16 sps:$4 sm:$0xff]  }
 0x16f   : > { %3062 = vmatprep.subr.bf16.mxu1 %v4967_v44  ;;  %v5063_v44 = vld [vmem:[#allocation7 + $0x14c] ss:$16 sps:$4 sm:$0xff]  }
 0x171   : > { %3010 = vmatpush2.bf16.msra.mxu0 %v4962_v19  ;;  %v5058_v19 = vld [vmem:[#allocation7 + $0x540] ss:$16 sps:$4 sm:$0xff]  }
 0x172   : > { %3063 = vmatpush2.bf16.msra.mxu1 %v4965_v45  ;;  %3085 = vmatprep.subr.bf16.mxu0 %v4976_v47  ;;  %v5061_v45 = vld [vmem:[#allocation7 + $0x148] ss:$16 sps:$4 sm:$0xff]   ;;  %v5066_v47 = vld [vmem:[#allocation7 + $0x524] ss:$16 sps:$4 sm:$0xff]  }
 0x173   : > { %3138 = vmatprep.subr.bf16.mxu1 %v4979_v48  ;;  %v5069_v48 = vld [vmem:[#allocation7 + $0x12c] ss:$16 sps:$4 sm:$0xff]  }
 0x174   : > { %3012 = vmatmul.mubr.bf16.vlgmr.msra.gmra.mxu0 %v5818_v49 }
 0x175   : > { %3065 = vmatmul.mubr.bf16.vlgmr.msra.gmra.mxu1 %v5821_v50  ;;  %3086 = vmatpush1.bf16.msra.mxu0 %v4974_v52  ;;  %v5064_v52 = vld [vmem:[#allocation7 + $0x520] ss:$16 sps:$4 sm:$0xff]  }
 0x176   : > { %3139 = vmatpush1.bf16.msra.mxu1 %v4977_v53  ;;  %3087 = vmatprep.subr.bf16.mxu0 %v4982_v54  ;;  %v5067_v53 = vld [vmem:[#allocation7 + $0x128] ss:$16 sps:$4 sm:$0xff]   ;;  %v5072_v54 = vld [vmem:[#allocation7 + $0x504] ss:$16 sps:$4 sm:$0xff]  }
 0x177   : > { %3140 = vmatprep.subr.bf16.mxu1 %v4985_v55  ;;  %3021 = vmatprep.mubr.bf16.mxu0 %v5824_v56  ;;  %v5075_v55 = vld [vmem:[#allocation7 + $0x10c] ss:$16 sps:$4 sm:$0xff]  }
 0x178   : > { %3074 = vmatprep.mubr.bf16.mxu1 %v5827_v57 }
 0x179   : > { %3088 = vmatpush1.bf16.msra.mxu0 %v4980_v7  ;;  %v5070_v7 = vld [vmem:[#allocation7 + $0x500] ss:$16 sps:$4 sm:$0xff]  }
 0x17a   : > { %3141 = vmatpush1.bf16.msra.mxu1 %v4983_v37  ;;  %3089 = vmatprep.subr.bf16.mxu0 %v4991_v13  ;;  %v5073_v37 = vld [vmem:[#allocation7 + $0x108] ss:$16 sps:$4 sm:$0xff]   ;;  %v5081_v13 = vld [vmem:[#allocation7 + $0x2ec] ss:$16 sps:$4 sm:$0xff]  }
 0x17b   : > { %3142 = vmatprep.subr.bf16.mxu1 %v4994_v60  ;;  %v5084_v60 = vld [vmem:[#allocation7 + $0x4ec] ss:$16 sps:$4 sm:$0xff]  }
 0x17c   : > { %3022 = vmatmul.mubr.bf16.gmra.mxu0 %v5833_v28 }
 0x17d   : > { %3075 = vmatmul.mubr.bf16.gmra.mxu1 %v5837_v63  ;;  %3090 = vmatpush1.bf16.msra.mxu0 %v4989_v61  ;;  %v5847_v61 = vld [vmem:[%s5721_s29 + $0x10] ss:$24 sps:$4 sm:$0xff]  }
 0x17e   : > { %3143 = vmatpush1.bf16.msra.mxu1 %v4992_v62  ;;  %3091 = vmatprep.subr.bf16.mxu0 %v5000_v20  ;;  %v5079_v62 = vld [vmem:[#allocation7 + $0x2e8] ss:$16 sps:$4 sm:$0xff]  }
 0x17f   : > { %3144 = vmatprep.subr.bf16.mxu1 %v5003_v46  ;;  %3117 = vmatprep.mubr.bf16.mxu0 %v5840_v0  ;;  %v5082_v20 = vld [vmem:[#allocation7 + $0x4e8] ss:$16 sps:$4 sm:$0xff]   ;;  %v5087_v46 = vld [vmem:[#allocation7 + $0x2cc] ss:$16 sps:$4 sm:$0xff]  }
 0x180   : > { %3170 = vmatprep.mubr.bf16.mxu1 %v5807_v58  ;;  %v5024_v58 = vld [vmem:[#allocation7 + $0x404] ss:$16 sps:$4 sm:$0xff]  }
 0x181   : > { %3092 = vmatpush1.bf16.msra.mxu0 %v4998_v1  ;;  %v5090_v1 = vld [vmem:[#allocation7 + $0x4cc] ss:$16 sps:$4 sm:$0xff]  }
 0x182   : > { %3145 = vmatpush1.bf16.msra.mxu1 %v5001_v51  ;;  %3093 = vmatprep.subr.bf16.mxu0 %v5006_v2  ;;  %v5850_v51 = vld [vmem:[%s5721_s29 + $0x44] ss:$24 sps:$4 sm:$0xff]   ;;  %v5085_v2 = vld [vmem:[#allocation7 + $0x2c8] ss:$16 sps:$4 sm:$0xff]  }
 0x183   : > { %3146 = vmatprep.subr.bf16.mxu1 %v5009_v3  ;;  %v5088_v3 = vld [vmem:[#allocation7 + $0x4c8] ss:$16 sps:$4 sm:$0xff]  }
 0x185   : > { %3094 = vmatpush1.bf16.msra.mxu0 %v5004_v4  ;;  %v5096_v4 = vld [vmem:[#allocation7 + $0x2ac] ss:$16 sps:$4 sm:$0xff]  }
 0x186   : > { %3147 = vmatpush1.bf16.msra.mxu1 %v5007_v5  ;;  %3095 = vmatprep.subr.bf16.mxu0 %v5012_v8  ;;  %v5099_v5 = vld [vmem:[#allocation7 + $0x4ac] ss:$16 sps:$4 sm:$0xff]   ;;  %v5857_v8 = vld [vmem:[%s5721_s29 + $0x40] ss:$24 sps:$4 sm:$0xff]   ;;  %s3851_s29 = scalar_lea.sflag [#allocation4], %s5717_s23 }
 0x187   : > { %3148 = vmatprep.subr.bf16.mxu1 %v5015_v9  ;;  %v5094_v9 = vld [vmem:[#allocation7 + $0x2a8] ss:$16 sps:$4 sm:$0xff]  }
 0x189   : > { %3096 = vmatpush1.bf16.msra.mxu0 %v5010_v10  ;;  %v5097_v10 = vld [vmem:[#allocation7 + $0x4a8] ss:$16 sps:$4 sm:$0xff]  }
 0x18a   : > { %3149 = vmatpush1.bf16.msra.mxu1 %v5013_v11  ;;  %3097 = vmatprep.subr.bf16.mxu0 %v5018_v14  ;;  %v5105_v14 = vld [vmem:[#allocation7 + $0x48c] ss:$16 sps:$4 sm:$0xff]  }
 0x18b   : > { %3150 = vmatprep.subr.bf16.mxu1 %v5021_v15  ;;  %v5100_v15 = vld [vmem:[#allocation7 + $0x288] ss:$16 sps:$4 sm:$0xff]  }
 0x18d   : > { %3098 = vmatpush1.bf16.msra.mxu0 %v5016_v16 }
 0x18e   : > { %3151 = vmatpush1.bf16.msra.mxu1 %v5019_v17  ;;  %3099 = vmatprep.subr.bf16.mxu0 %v5024_v58  ;;  %v5108_v17 = vld [vmem:[#allocation7 + $0x26c] ss:$16 sps:$4 sm:$0xff]  }
 0x18f   : > { %3152 = vmatprep.subr.bf16.mxu1 %v5027_v18  ;;  %v5111_v58 = vld [vmem:[#allocation7 + $0x46c] ss:$16 sps:$4 sm:$0xff]  }
 0x191   : > { %3100 = vmatpush1.bf16.msra.mxu0 %v5022_v21  ;;  %v5106_v21 = vld [vmem:[#allocation7 + $0x268] ss:$16 sps:$4 sm:$0xff]  }
 0x192   : > { %3153 = vmatpush1.bf16.msra.mxu1 %v5025_v22  ;;  %3101 = vmatprep.subr.bf16.mxu0 %v5030_v23  ;;  %v5114_v23 = vld [vmem:[#allocation7 + $0x24c] ss:$16 sps:$4 sm:$0xff]  }
 0x193   : > { %3154 = vmatprep.subr.bf16.mxu1 %v5033_v24  ;;  %v5117_v24 = vld [vmem:[#allocation7 + $0x44c] ss:$16 sps:$4 sm:$0xff]  }
 0x195   : > { %3102 = vmatpush2.bf16.msra.mxu0 %v5028_v25 }
 0x196   : > { %3155 = vmatpush2.bf16.msra.mxu1 %v5031_v26  ;;  %3103 = vmatprep.subr.bf16.mxu0 %v5036_v27  ;;  %v5112_v26 = vld [vmem:[#allocation7 + $0x248] ss:$16 sps:$4 sm:$0xff]  }
 0x197   : > { %3156 = vmatprep.subr.bf16.mxu1 %v5039_v29  ;;  %v5123_v29 = vld [vmem:[#allocation7 + $0x42c] ss:$16 sps:$4 sm:$0xff]  }
 0x199   : > { %3104 = vmatpush2.bf16.msra.mxu0 %v5034_v30 }
 0x19a   : > { %3157 = vmatpush2.bf16.msra.mxu1 %v5037_v31  ;;  %3105 = vmatprep.subr.bf16.mxu0 %v5042_v32  ;;  %v5118_v32 = vld [vmem:[#allocation7 + $0x228] ss:$16 sps:$4 sm:$0xff]  }
 0x19b   : > { %3158 = vmatprep.subr.bf16.mxu1 %v5045_v33  ;;  %v5121_v33 = vld [vmem:[#allocation7 + $0x428] ss:$16 sps:$4 sm:$0xff]  }
 0x19c   : > { %v5859_v11 = vpop.f32.mrf.mxu0 }
 0x19d   : > { %3106 = vmatpush2.bf16.msra.mxu0 %v5040_v34  ;;  %v5867_v18 = vpop.f32.mrf.mxu1  ;;  %v5126_v34 = vld [vmem:[#allocation7 + $0x20c] ss:$16 sps:$4 sm:$0xff]  }
 0x19e   : > { %3159 = vmatpush2.bf16.msra.mxu1 %v5043_v35  ;;  %3107 = vmatprep.subr.bf16.mxu0 %v5048_v36  ;;  %v5863_v16 = vpop.f32.mrf.mxu0  ;;  %v5129_v35 = vld [vmem:[#allocation7 + $0x40c] ss:$16 sps:$4 sm:$0xff]  }
 0x19f   : > { %3160 = vmatprep.subr.bf16.mxu1 %v5051_v6  ;;  %v5871_v25 = vpop.f32.mrf.mxu1 }
 0x1a0   : > { %v5869_v22 = vpop.f32.mrf.mxu0 }
 0x1a1   : > { %3108 = vmatpush2.bf16.msra.mxu0 %v5046_v38  ;;  %v5875_v30 = vpop.f32.mrf.mxu1  ;;  %v5124_v38 = vld [vmem:[#allocation7 + $0x208] ss:$16 sps:$4 sm:$0xff]  }
 0x1a2   : > { %3161 = vmatpush2.bf16.msra.mxu1 %v5049_v39  ;;  %3109 = vmatprep.subr.bf16.mxu0 %v5054_v12  ;;  %v5873_v27 = vpop.f32.mrf.mxu0  ;;  %v5127_v39 = vld [vmem:[#allocation7 + $0x408] ss:$16 sps:$4 sm:$0xff]  }
 0x1a3   : > { %3162 = vmatprep.subr.bf16.mxu1 %v5057_v40  ;;  %v5879_v36 = vpop.f32.mrf.mxu1  ;;  %v5132_v40 = vld [vmem:[#allocation7 + $0x3ec] ss:$16 sps:$4 sm:$0xff]  }
 0x1a4   : > { %v5877_v31 = vpop.f32.mrf.mxu0 }
 0x1a5   : > { %3110 = vmatpush2.bf16.msra.mxu0 %v5052_v41  ;;  %v5883_v12 = vpop.f32.mrf.mxu1  ;;  %v5135_v41 = vld [vmem:[#allocation7 + $0x5ec] ss:$16 sps:$4 sm:$0xff]  }
 0x1a6   : > { %3163 = vmatpush2.bf16.msra.mxu1 %v5055_v42  ;;  %3111 = vmatprep.subr.bf16.mxu0 %v5060_v43  ;;  %v5881_v6 = vpop.f32.mrf.mxu0  ;;  %v5130_v43 = vld [vmem:[#allocation7 + $0x3e8] ss:$16 sps:$4 sm:$0xff]  }
 0x1a7   : > { %3164 = vmatprep.subr.bf16.mxu1 %v5063_v44  ;;  %v5133_v44 = vld [vmem:[#allocation7 + $0x5e8] ss:$16 sps:$4 sm:$0xff]  }
 0x1a8   : > { %v5885_v42 = vpop.f32.mrf.mxu0 }
 0x1a9   : > { %3112 = vmatpush2.bf16.msra.mxu0 %v5058_v19  ;;  %v5887_v19 = vpop.f32.mrf.mxu1 }
 0x1aa   : > { %3165 = vmatpush2.bf16.msra.mxu1 %v5061_v45  ;;  %3113 = vmatprep.subr.bf16.mxu0 %v5066_v47  ;;  %v5138_v45 = vld [vmem:[#allocation7 + $0x3cc] ss:$16 sps:$4 sm:$0xff]  }
 0x1ab   : > { %3166 = vmatprep.subr.bf16.mxu1 %v5069_v48  ;;  %v5141_v47 = vld [vmem:[#allocation7 + $0x5cc] ss:$16 sps:$4 sm:$0xff]   ;;  %v5889_v48 = vpop.f32.mrf.mxu0 }
 0x1ad   : > { %3114 = vmatpush2.bf16.msra.mxu0 %v5064_v52  ;;  %v5136_v52 = vld [vmem:[#allocation7 + $0x3c8] ss:$16 sps:$4 sm:$0xff]  }
 0x1ae   : > { %3167 = vmatpush2.bf16.msra.mxu1 %v5067_v53  ;;  %3115 = vmatprep.subr.bf16.mxu0 %v5072_v54  ;;  %v5139_v53 = vld [vmem:[#allocation7 + $0x5c8] ss:$16 sps:$4 sm:$0xff]   ;;  %v5891_v54 = vpop.f32.mrf.mxu1 }
 0x1af   : > { %3168 = vmatprep.subr.bf16.mxu1 %v5075_v55 }
 0x1b1   : > { %3116 = vmatpush2.bf16.msra.mxu0 %v5070_v7  ;;  %v5144_v7 = vld [vmem:[#allocation7 + $0x3ac] ss:$16 sps:$4 sm:$0xff]  }
 0x1b2   : > { %3169 = vmatpush2.bf16.msra.mxu1 %v5073_v37  ;;  %3191 = vmatprep.subr.bf16.mxu0 %v5081_v13  ;;  %v5147_v37 = vld [vmem:[#allocation7 + $0x5ac] ss:$16 sps:$4 sm:$0xff]   ;;  %v5142_v13 = vld [vmem:[#allocation7 + $0x3a8] ss:$16 sps:$4 sm:$0xff]  }
 0x1b3   : > { %3244 = vmatprep.subr.bf16.mxu1 %v5084_v60  ;;  %v5145_v60 = vld [vmem:[#allocation7 + $0x5a8] ss:$16 sps:$4 sm:$0xff]  }
 0x1b4   : > { %3118 = vmatmul.mubr.bf16.vlgmr.msra.gmra.mxu0 %v5847_v61  ;;  %v5893_v55 = vpop.f32.mrf.mxu0 }
 0x1b5   : > { %3171 = vmatmul.mubr.bf16.vlgmr.msra.gmra.mxu1 %v5818_v49  ;;  %3192 = vmatpush1.bf16.msra.mxu0 %v5079_v62  ;;  %v5102_v49 = vld [vmem:[#allocation7 + $0x28c] ss:$16 sps:$4 sm:$0xff]   ;;  %v5895_v62 = vpop.f32.mrf.mxu1 }
 0x1b6   : > { %3245 = vmatpush1.bf16.msra.mxu1 %v5082_v20  ;;  %3193 = vmatprep.subr.bf16.mxu0 %v5087_v46  ;;  %v5897_v20 = vpop.f32.mrf.mxu0  ;;  %v5150_v46 = vld [vmem:[#allocation7 + $0x38c] ss:$16 sps:$4 sm:$0xff]  }
 0x1b7   : > { %3246 = vmatprep.subr.bf16.mxu1 %v5090_v1  ;;  %3127 = vmatprep.mubr.bf16.mxu0 %v5850_v51  ;;  %v5153_v1 = vld [vmem:[#allocation7 + $0x58c] ss:$16 sps:$4 sm:$0xff]  }
 0x1b8   : > { %3180 = vmatprep.mubr.bf16.mxu1 %v5824_v56  ;;  %v5103_v56 = vld [vmem:[#allocation7 + $0x488] ss:$16 sps:$4 sm:$0xff]  }
 0x1b9   : > { %3194 = vmatpush1.bf16.msra.mxu0 %v5085_v2 }
 0x1ba   : > { %3247 = vmatpush1.bf16.msra.mxu1 %v5088_v3  ;;  %3195 = vmatprep.subr.bf16.mxu0 %v5096_v4  ;;  %v5148_v3 = vld [vmem:[#allocation7 + $0x388] ss:$16 sps:$4 sm:$0xff]  }
 0x1bb   : > { %3248 = vmatprep.subr.bf16.mxu1 %v5099_v5  ;;  %v5151_v4 = vld [vmem:[#allocation7 + $0x588] ss:$16 sps:$4 sm:$0xff]   ;;  %v5899_v5 = vpop.f32.mrf.mxu0 }
 0x1bc   : > { %3128 = vmatmul.mubr.bf16.gmra.mxu0 %v5857_v8 }
 0x1bd   : > { %3181 = vmatmul.mubr.bf16.gmra.mxu1 %v5833_v28  ;;  %3196 = vmatpush1.bf16.msra.mxu0 %v5094_v9  ;;  %v5109_v28 = vld [vmem:[#allocation7 + $0x468] ss:$16 sps:$4 sm:$0xff]  }
 0x1be   : > { %3249 = vmatpush1.bf16.msra.mxu1 %v5097_v10  ;;  %3197 = vmatprep.subr.bf16.mxu0 %v5102_v49  ;;  %v5156_v10 = vld [vmem:[#allocation7 + $0x36c] ss:$16 sps:$4 sm:$0xff]  }
 0x1bf   : > { %3250 = vmatprep.subr.bf16.mxu1 %v5105_v14  ;;  %3223 = vmatprep.mubr.bf16.mxu0 %v5810_v59  ;;  %v5115_v59 = vld [vmem:[#allocation7 + $0x448] ss:$16 sps:$4 sm:$0xff]   ;;  %v5159_v49 = vld [vmem:[#allocation7 + $0x56c] ss:$16 sps:$4 sm:$0xff]  }
 0x1c0   : > { %3276 = vmatprep.mubr.bf16.mxu1 %v5840_v0  ;;  %v5120_v0 = vld [vmem:[#allocation7 + $0x22c] ss:$16 sps:$4 sm:$0xff]  }
 0x1c1   : > { %3198 = vmatpush1.bf16.msra.mxu0 %v5100_v15  ;;  %v5154_v15 = vld [vmem:[#allocation7 + $0x368] ss:$16 sps:$4 sm:$0xff]  }
 0x1c2   : > { %3251 = vmatpush1.bf16.msra.mxu1 %v5103_v56  ;;  %3199 = vmatprep.subr.bf16.mxu0 %v5108_v17  ;;  %v5157_v56 = vld [vmem:[#allocation7 + $0x568] ss:$16 sps:$4 sm:$0xff]   ;;  %v5905_v17 = vpop.f32.mrf.mxu0 }
 0x1c3   : > { %3252 = vmatprep.subr.bf16.mxu1 %v5111_v58  ;;  %v5162_v58 = vld [vmem:[#allocation7 + $0x34c] ss:$16 sps:$4 sm:$0xff]  }
 0x1c5   : > { %3200 = vmatpush1.bf16.msra.mxu0 %v5106_v21  ;;  %v5165_v21 = vld [vmem:[#allocation7 + $0x54c] ss:$16 sps:$4 sm:$0xff]  }
 0x1c6   : > { %3253 = vmatpush1.bf16.msra.mxu1 %v5109_v28  ;;  %3201 = vmatprep.subr.bf16.mxu0 %v5114_v23  ;;  %v5160_v23 = vld [vmem:[#allocation7 + $0x348] ss:$16 sps:$4 sm:$0xff]  }
 0x1c7   : > { %3254 = vmatprep.subr.bf16.mxu1 %v5117_v24  ;;  %v5163_v24 = vld [vmem:[#allocation7 + $0x548] ss:$16 sps:$4 sm:$0xff]  }
 0x1c9   : > { %3202 = vmatpush1.bf16.msra.mxu0 %v5112_v26  ;;  %v5907_v26 = vpop.f32.mrf.mxu0 }
 0x1ca   : > { %3255 = vmatpush1.bf16.msra.mxu1 %v5115_v59  ;;  %3203 = vmatprep.subr.bf16.mxu0 %v5120_v0  ;;  %v5168_v0 = vld [vmem:[#allocation7 + $0x32c] ss:$16 sps:$4 sm:$0xff]  }
 0x1cb   : > { %3256 = vmatprep.subr.bf16.mxu1 %v5123_v29  ;;  %v5171_v29 = vld [vmem:[#allocation7 + $0x52c] ss:$16 sps:$4 sm:$0xff]  }
 0x1cd   : > { %3204 = vmatpush1.bf16.msra.mxu0 %v5118_v32  ;;  %v5166_v32 = vld [vmem:[#allocation7 + $0x328] ss:$16 sps:$4 sm:$0xff]  }
 0x1ce   : > { %3257 = vmatpush1.bf16.msra.mxu1 %v5121_v33  ;;  %3205 = vmatprep.subr.bf16.mxu0 %v5126_v34  ;;  %v5169_v33 = vld [vmem:[#allocation7 + $0x528] ss:$16 sps:$4 sm:$0xff]   ;;  %v5909_v34 = vpop.f32.mrf.mxu0 }
 0x1cf   : > { %3258 = vmatprep.subr.bf16.mxu1 %v5129_v35 }
 0x1d1   : > { %3206 = vmatpush1.bf16.msra.mxu0 %v5124_v38  ;;  %v5174_v38 = vld [vmem:[#allocation7 + $0x30c] ss:$16 sps:$4 sm:$0xff]  }
 0x1d2   : > { %3259 = vmatpush1.bf16.msra.mxu1 %v5127_v39  ;;  %3207 = vmatprep.subr.bf16.mxu0 %v5132_v40  ;;  %v5177_v39 = vld [vmem:[#allocation7 + $0x50c] ss:$16 sps:$4 sm:$0xff]   ;;  %v5172_v40 = vld [vmem:[#allocation7 + $0x308] ss:$16 sps:$4 sm:$0xff]  }
 0x1d3   : > { %3260 = vmatprep.subr.bf16.mxu1 %v5135_v41  ;;  %v5175_v41 = vld [vmem:[#allocation7 + $0x508] ss:$16 sps:$4 sm:$0xff]  }
 0x1d5   : > { %3208 = vmatpush2.bf16.msra.mxu0 %v5130_v43  ;;  %v5911_v43 = vpop.f32.mrf.mxu0 }
 0x1d6   : > { %3261 = vmatpush2.bf16.msra.mxu1 %v5133_v44  ;;  %3209 = vmatprep.subr.bf16.mxu0 %v5138_v45  ;;  %v5178_v45 = vld [vmem:[#allocation10 + $0x78] sm:$0xff]  }
 0x1d7   : > { %3262 = vmatprep.subr.bf16.mxu1 %v5141_v47  ;;  %v5913_v47 = vpop.f32.mrf.mxu0 }
 0x1d9   : > { %3210 = vmatpush2.bf16.msra.mxu0 %v5136_v52 }
 0x1da   : > { %3263 = vmatpush2.bf16.msra.mxu1 %v5139_v53  ;;  %3211 = vmatprep.subr.bf16.mxu0 %v5144_v7  ;;  %v5179_v53 = vld [vmem:[#allocation10 + $0x38] sm:$0xff]   ;;  %v5180_v7 = vld [vmem:[#allocation10 + $0x70] sm:$0xff]  }
 0x1db   : > { %3264 = vmatprep.subr.bf16.mxu1 %v5147_v37 }
 0x1dd   : > { %v1834_v2 = vpop.f32.mrf.mxu1  ;;  %3212 = vmatpush2.bf16.msra.mxu0 %v5142_v13 }
 0x1de   : > { %3265 = vmatpush2.bf16.msra.mxu1 %v5145_v60  ;;  %3213 = vmatprep.subr.bf16.mxu0 %v5150_v46 }
 0x1df   : > { %v5901_v9 = vpop.f32.mrf.mxu1  ;;  %3266 = vmatprep.subr.bf16.mxu1 %v5153_v1 }
 0x1e1   : > { %v5903_v14 = vpop.f32.mrf.mxu1  ;;  %3214 = vmatpush2.bf16.msra.mxu0 %v5148_v3  ;;  %v5181_v3 = vld [vmem:[#allocation10 + $0x30] sm:$0xff]  }
 0x1e2   : > { %3267 = vmatpush2.bf16.msra.mxu1 %v5151_v4  ;;  %3215 = vmatprep.subr.bf16.mxu0 %v5156_v10 }
 0x1e3   : > { %3268 = vmatprep.subr.bf16.mxu1 %v5159_v49  ;;  %v1840_v28 = vpop.f32.mrf.mxu1  ;;  %v5182_v49 = vld [vmem:[#allocation10 + $0x68] sm:$0xff]  }
 0x1e5   : > { %3216 = vmatpush2.bf16.msra.mxu0 %v5154_v15  ;;  %v1844_v59 = vpop.f32.mrf.mxu1 }
 0x1e6   : > { %3269 = vmatpush2.bf16.msra.mxu1 %v5157_v56  ;;  %3217 = vmatprep.subr.bf16.mxu0 %v5162_v58 }
 0x1e7   : > { %3270 = vmatprep.subr.bf16.mxu1 %v5165_v21  ;;  %v1846_v35 = vpop.f32.mrf.mxu1 }
 0x1e9   : > { %3218 = vmatpush2.bf16.msra.mxu0 %v5160_v23  ;;  %v1848_v44 = vpop.f32.mrf.mxu1  ;;  %v5184_v23 = vld [vmem:[#allocation10 + $0x60] sm:$0xff]  }
 0x1ea   : > { %3271 = vmatpush2.bf16.msra.mxu1 %v5163_v24  ;;  %3219 = vmatprep.subr.bf16.mxu0 %v5168_v0 }
 0x1eb   : > { %3272 = vmatprep.subr.bf16.mxu1 %v5171_v29  ;;  %v1850_v52 = vpop.f32.mrf.mxu1 }
 0x1ed   : > { %3220 = vmatpush2.bf16.msra.mxu0 %v5166_v32 }
 0x1ee   : > { %3273 = vmatpush2.bf16.msra.mxu1 %v5169_v33  ;;  %3221 = vmatprep.subr.bf16.mxu0 %v5174_v38  ;;  %v5185_v33 = vld [vmem:[#allocation10 + $0x20] sm:$0xff]  }
 0x1ef   : > { %3274 = vmatprep.subr.bf16.mxu1 %v5177_v39 }
 0x1f1   : > { %3222 = vmatpush2.bf16.msra.mxu0 %v5172_v40 }
 0x1f2   : > { %3275 = vmatpush2.bf16.msra.mxu1 %v5175_v41  ;;  %4437 = vmatprep.subr.bf16.mxu0 %v5178_v45 }
 0x1f4   : > { %v1887_v37 = vpop.f32.mrf.mxu0  ;;  %3224 = vmatmul.mubr.bf16.vlgmr.msra.gmra.mxu0 %v5821_v50 }
 0x1f5   : > { %v1940_v13 = vpop.f32.mrf.mxu1  ;;  %3277 = vmatmul.mubr.bf16.vlgmr.msra.gmra.mxu1 %v5847_v61  ;;  %v1888_v60 = vadd.f32 %v1887_v37, %v1834_v2  ;;  %3233 = vmatprep.mubr.bf16.mxu0 %v5827_v57 }
 0x1f6   : > { %3286 = vmatprep.mubr.bf16.mxu1 %v5850_v51  ;;  %v1889_v46 = vpop.f32.mrf.mxu0  ;;  %4438 = vmatpush3.bf16.msra.mxu0 %v5179_v53  ;;  %v5183_v51 = vld [vmem:[#allocation10 + $0x28] sm:$0xff]  }
 0x1f7   : > { %v1942_v1 = vpop.f32.mrf.mxu1  ;;  %v5919_v4 = vadd.f32 %v1940_v13, %v1888_v60  ;;  %v1890_v10 = vadd.f32 %v1889_v46, %v5901_v9  ;;  %4439 = vmatprep.subr.bf16.mxu0 %v5180_v7  ;;  %v5187_v7 = vld [vmem:[#allocation10 + $0x18] sm:$0xff]   ;;  %v5188_v13 = vld [vmem:[#allocation10 + $0x50] sm:$0xff]   ;;  %v5190_v46 = vld [vmem:[#allocation10 + $0x48] sm:$0xff]  }
 0x1f8   : > { %v1891_v15 = vpop.f32.mrf.mxu0 }
 0x1f9   : > { %v1944_v56 = vpop.f32.mrf.mxu1  ;;  %v5922_v50 = vadd.f32 %v1942_v1, %v1890_v10  ;;  %v1892_v61 = vadd.f32 %v1891_v15, %v5903_v14  ;;  %v5191_v1 = vld [vmem:[#allocation10 + $0x8] sm:$0xff]   ;;  %v5195_v10 = vld [vmem:[#allocation10 + $0xb8] sm:$0xff]   ;;  %v5193_v15 = vld [vmem:[#allocation10] sm:$0xff]  }
 0x1fa   : > { %v1893_v2 = vpop.f32.mrf.mxu0  ;;  %4440 = vmatpush3.bf16.msra.mxu0 %v5181_v3  ;;  %v5194_v3 = vld [vmem:[#allocation10 + $0xf8] sm:$0xff]  }
 0x1fb   : > { %v1946_v57 = vpop.f32.mrf.mxu1  ;;  %v5925_v58 = vadd.f32 %v1944_v56, %v1892_v61  ;;  %v1894_v21 = vadd.f32 %v1893_v2, %v1840_v28  ;;  %4441 = vmatprep.subr.bf16.mxu0 %v5182_v49  ;;  %v5186_v28 = vld [vmem:[#allocation10 + $0x58] sm:$0xff]   ;;  %v5196_v49 = vld [vmem:[#allocation10 + $0xf0] sm:$0xff]   ;;  %4465 = vmatprep.subr.bf16.mxu1 %v5194_v3  ;;  %v5198_v56 = vld [vmem:[#allocation10 + $0xe8] sm:$0xff]  }
 0x1fc   : > { %v1897_v24 = vpop.f32.mrf.mxu0  ;;  %3234 = vmatmul.mubr.bf16.gmra.mxu0 %v5837_v63  ;;  %4466 = vmatpush3.bf16.msra.mxu1 %v5195_v10  ;;  %v5199_v61 = vld [vmem:[#allocation10 + $0xa8] sm:$0xff]   ;;  %v5200_v2 = vld [vmem:[#allocation10 + $0xe0] sm:$0xff]  }
 0x1fd   : > { %3287 = vmatmul.mubr.bf16.gmra.mxu1 %v5857_v8  ;;  %v1950_v9 = vpop.f32.mrf.mxu1  ;;  %v5929_v0 = vadd.f32 %v1946_v57, %v1894_v21  ;;  %v1898_v29 = vadd.f32 %v1897_v24, %v1844_v59  ;;  %4467 = vmatprep.subr.bf16.mxu1 %v5196_v49  ;;  %v5201_v57 = vld [vmem:[#allocation10 + $0xa0] sm:$0xff]   ;;  %v5203_v21 = vld [vmem:[#allocation10 + $0x98] sm:$0xff]   ;;  %v5205_v24 = vld [vmem:[#allocation10 + $0x90] sm:$0xff]   ;;  %v1735_v49 = vadd.f32 %v5879_v36, %v5873_v27 }
 0x1fe   : > { %v1899_v32 = vpop.f32.mrf.mxu0  ;;  %4442 = vmatpush3.bf16.msra.mxu0 %v5183_v51  ;;  %v5202_v51 = vld [vmem:[#allocation10 + $0xd8] sm:$0xff]   ;;  %v1741_v27 = vadd.f32 %v5887_v19, %v5881_v6 }
 0x1ff   : > { %v1952_v14 = vpop.f32.mrf.mxu1  ;;  %v1900_v38 = vadd.f32 %v1899_v32, %v1846_v35  ;;  %v5931_v39 = vadd.f32 %v1950_v9, %v1898_v29  ;;  %4443 = vmatprep.subr.bf16.mxu0 %v5184_v23  ;;  %v5189_v35 = vld [vmem:[#allocation10 + $0x10] sm:$0xff]   ;;  %v5206_v9 = vld [vmem:[#allocation10 + $0xc8] sm:$0xff]   ;;  %v5208_v32 = vld [vmem:[#allocation10 + $0xc0] sm:$0xff]  }
 0x200   : > { %v1901_v40 = vpop.f32.mrf.mxu0  ;;  %v5204_v23 = vld [vmem:[#allocation10 + $0xd0] sm:$0xff]   ;;  %v5207_v29 = vld [vmem:[#allocation10 + $0x88] sm:$0xff]  }
 0x201   : > { %v1954_v41 = vpop.f32.mrf.mxu1  ;;  %v1902_v45 = vadd.f32 %v1901_v40, %v1848_v44  ;;  %v5933_v53 = vadd.f32 %v1952_v14, %v1900_v38  ;;  %v5192_v44 = vld [vmem:[#allocation10 + $0x40] sm:$0xff]  }
 0x202   : > { %v1903_v63 = vpop.f32.mrf.mxu0  ;;  %4444 = vmatpush3.bf16.msra.mxu0 %v5185_v33  ;;  %v5209_v14 = vld [vmem:[#allocation10 + $0x80] sm:$0xff]  }
 0x203   : > { %v1956_v8 = vpop.f32.mrf.mxu1  ;;  %v1904_v37 = vadd.f32 %v1903_v63, %v1850_v52  ;;  %v5935_v59 = vadd.f32 %v1954_v41, %v1902_v45  ;;  %4445 = vmatprep.subr.bf16.mxu0 %v5186_v28  ;;  %v5197_v52 = vld [vmem:[#allocation10 + $0xb0] sm:$0xff]  }
 0x204   : > { %4468 = vmatpush3.bf16.msra.mxu1 %v5197_v52 }
 0x205   : > { %v5937_v60 = vadd.f32 %v1956_v8, %v1904_v37  ;;  %4469 = vmatprep.subr.bf16.mxu1 %v5198_v56  ;;  %v3299_v37 = vlaneseq }
 0x206   : > { %4446 = vmatpush3.bf16.msra.mxu0 %v5187_v7 }
 0x207   : > { %4447 = vmatprep.subr.bf16.mxu0 %v5188_v13  ;;  %v1731_v13 = vadd.f32 %v5871_v25, %v5863_v16  ;;  %v5946_v10 = vshrl.u32 %v3299_v37, 7 }
 0x208   : > { %4470 = vmatpush3.bf16.msra.mxu1 %v5199_v61 }
 0x209   : > { %4471 = vmatprep.subr.bf16.mxu1 %v5200_v2  ;;  %v1739_v2 = vadd.f32 %v5883_v12, %v5877_v31  ;;  %v1794_v12 = vadd.f32 %v5909_v34, %v1741_v27 }
 0x20a   : > { %4448 = vmatpush3.bf16.msra.mxu0 %v5189_v35 }
 0x20b   : > { %4449 = vmatprep.subr.bf16.mxu0 %v5190_v46  ;;  %v1729_v46 = vadd.f32 %v5867_v18, %v5859_v11  ;;  %v1788_v11 = vadd.f32 %v5905_v17, %v1735_v49  ;;  %v1745_v17 = vadd.f32 %v5895_v62, %v5889_v48  ;;  %v1792_v31 = vadd.f32 %v5907_v26, %v1739_v2 }
 0x20c   : > { %4472 = vmatpush3.bf16.msra.mxu1 %v5201_v57 }
 0x20d   : > { %4473 = vmatprep.subr.bf16.mxu1 %v5202_v51  ;;  %v1798_v26 = vadd.f32 %v5913_v47, %v1745_v17 }
 0x20e   : > { %4450 = vmatpush3.bf16.msra.mxu0 %v5191_v1  ;;  %v1733_v1 = vadd.f32 %v5875_v30, %v5869_v22  ;;  %v3301_v30 = vsub.s32 0, %v5946_v10 }
 0x20f   : > { %4451 = vmatprep.subr.bf16.mxu0 %v5192_v44  ;;  %v1784_v44 = vadd.f32 %v5897_v20, %v1731_v13  ;;  %v3305_v20 = vsub.s32 1, %v5946_v10 }
 0x210   : > { %4474 = vmatpush3.bf16.msra.mxu1 %v5203_v21  ;;  %v1786_v52 = vadd.f32 %v5899_v5, %v1733_v1  ;;  %v1743_v5 = vadd.f32 %v5891_v54, %v5885_v42 }
 0x211   : > { %4475 = vmatprep.subr.bf16.mxu1 %v5204_v23 }
 0x212   : > { %4452 = vmatpush3.bf16.msra.mxu0 %v5193_v15  ;;  %v1782_v15 = vadd.f32 %v5893_v55, %v1729_v46  ;;  %v5962_v55 = vld [vmem:[%s6046_s4] sm:$0xf]  ;;  %v1796_v23 = vadd.f32 %v5911_v43, %v1743_v5 }
 0x214   : > { %4476 = vmatpush3.bf16.msra.mxu1 %v5205_v24  ;;  %v3302_v24 = vrot.slane %v5962_v55, %v3301_v30 }
 0x215   : > { %4477 = vmatprep.subr.bf16.mxu1 %v5206_v9 }
 0x218   : > { %4478 = vmatpush3.bf16.msra.mxu1 %v5207_v29  ;;  %v3306_v29 = vrot.slane %v5962_v55, %v3305_v20 }
 0x219   : > { %4479 = vmatprep.subr.bf16.mxu1 %v5208_v32 }
 0x21c   : > { %4480 = vmatpush3.bf16.msra.mxu1 %v5209_v14 }
 0x234   : > { %v3013_v33 = vpop.f32.mrf.mxu0 }
 0x235   : > { %v3066_v41 = vpop.f32.mrf.mxu1  ;;  %v3014_v18 = vadd.f32 %v3013_v33, %v1782_v15 }
 0x236   : > { %v3015_v38 = vpop.f32.mrf.mxu0 }
 0x237   : > { %v3068_v63 = vpop.f32.mrf.mxu1  ;;  %v3016_v16 = vadd.f32 %v3015_v38, %v1784_v44  ;;  %v3067_v6 = vadd.f32 %v3066_v41, %v3014_v18 }
 0x238   : > { %v3017_v28 = vpop.f32.mrf.mxu0 }
 0x239   : > { %v3070_v7 = vpop.f32.mrf.mxu1  ;;  %v3018_v61 = vadd.f32 %v3017_v28, %v1786_v52  ;;  %v3069_v57 = vadd.f32 %v3068_v63, %v3016_v16 }
 0x23a   : > { %v3019_v40 = vpop.f32.mrf.mxu0 }
 0x23b   : > { %v3072_v3 = vpop.f32.mrf.mxu1  ;;  %v3020_v36 = vadd.f32 %v3019_v40, %v1788_v11  ;;  %v3071_v19 = vadd.f32 %v3070_v7, %v3018_v61 }
 0x23c   : > { %v3023_v45 = vpop.f32.mrf.mxu0 }
 0x23d   : > { %v3076_v25 = vpop.f32.mrf.mxu1  ;;  %v3073_v54 = vadd.f32 %v3072_v3, %v3020_v36  ;;  %v3024_v14 = vadd.f32 %v3023_v45, %v1792_v31 }
 0x23e   : > { %v3025_v8 = vpop.f32.mrf.mxu0 }
 0x23f   : > { %v3078_v51 = vpop.f32.mrf.mxu1  ;;  %v3026_v32 = vadd.f32 %v3025_v8, %v1794_v12  ;;  %v3077_v46 = vadd.f32 %v3076_v25, %v3024_v14  ;;  %v3313_v14 = vsub.s32 3, %v5946_v10 }
 0x240   : > { %v3027_v35 = vpop.f32.mrf.mxu0 }
 0x241   : > { %v3080_v33 = vpop.f32.mrf.mxu1  ;;  %v3028_v34 = vadd.f32 %v3027_v35, %v1796_v23  ;;  %v3079_v63 = vadd.f32 %v3078_v51, %v3026_v32 }
 0x242   : > { %v3029_v56 = vpop.f32.mrf.mxu0 }
 0x243   : > { %v3030_v7 = vadd.f32 %v3029_v56, %v1798_v26  ;;  %v3082_v1 = vpop.f32.mrf.mxu1  ;;  %v3081_v8 = vadd.f32 %v3080_v33, %v3028_v34 }
 0x245   : > { %v3083_v16 = vadd.f32 %v3082_v1, %v3030_v7  ;;  %v3314_v7 = vrot.slane %v5962_v55, %v3313_v14  ;;  %v5216_v14 = vld [vmem:[#allocation11 + $0x8] sm:$0xff]  }
 0x274   : > { %v3119_v22 = vpop.f32.mrf.mxu0 }
 0x275   : > { %v3120_v48 = vadd.f32 %v3119_v22, %v3067_v6 }
 0x276   : > { %v3121_v21 = vpop.f32.mrf.mxu0 }
 0x277   : > { %v3122_v9 = vadd.f32 %v3121_v21, %v3069_v57  ;;  %v3319_v37 = vadd.f32 %v3302_v24, %v3120_v48  ;;  %v3172_v21 = vpop.f32.mrf.mxu1 }
 0x278   : > { %v3123_v42 = vpop.f32.mrf.mxu0 }
 0x279   : > { %v3124_v62 = vadd.f32 %v3123_v42, %v3071_v19  ;;  %v3320_v41 = vadd.f32 %v3306_v29, %v3122_v9  ;;  %v3335_v47 = vmax.f32 %v3319_v37, 0.0  ;;  %v3174_v31 = vpop.f32.mrf.mxu1 }
 0x27a   : > { %v3125_v38 = vpop.f32.mrf.mxu0  ;;  %v3175_v48 = vadd.f32 %v3174_v31, %v5922_v50 }
 0x27b   : > { %v3323_v28 = vadd.f32 %v3302_v24, %v3124_v62  ;;  %v3126_v40 = vadd.f32 %v3125_v38, %v3073_v54  ;;  %v3336_v15 = vmax.f32 %v3320_v41, 0.0  ;;  %v3176_v12 = vpop.f32.mrf.mxu1 }
 0x27c   : > { %v3129_v43 = vpop.f32.mrf.mxu0  ;;  %v3177_v26 = vadd.f32 %v3176_v12, %v5925_v58 }
 0x27d   : > { %v3324_v13 = vadd.f32 %v3306_v29, %v3126_v40  ;;  %v3339_v3 = vmax.f32 %v3323_v28, 0.0  ;;  %v3130_v35 = vadd.f32 %v3129_v43, %v3077_v46  ;;  %v3178_v6 = vpop.f32.mrf.mxu1 }
 0x27e   : > { %v3131_v44 = vpop.f32.mrf.mxu0 }
 0x27f   : > { %v3340_v49 = vmax.f32 %v3324_v13, 0.0  ;;  %v3132_v45 = vadd.f32 %v3131_v44, %v3079_v63  ;;  %v3351_v22 = vpack.c.bf16 %v3339_v3, %v3335_v47  ;;  %v3327_v25 = vadd.f32 %v3302_v24, %v3130_v35  ;;  %v3182_v19 = vpop.f32.mrf.mxu1 }
 0x280   : > { %v3133_v52 = vpop.f32.mrf.mxu0 }
 0x281   : > { %v3134_v11 = vadd.f32 %v3133_v52, %v3081_v8  ;;  %v3352_v61 = vpack.c.bf16 %v3340_v49, %v3336_v15  ;;  %v3328_v30 = vadd.f32 %v3306_v29, %v3132_v45  ;;  %v3343_v17 = vmax.f32 %v3327_v25, 0.0  ;;  %v3184_v23 = vpop.f32.mrf.mxu1 }
 0x282   : > { %v3135_v18 = vpop.f32.mrf.mxu0  ;;  %v3185_v58 = vadd.f32 %v3184_v23, %v5933_v53 }
 0x283   : > { %v3331_v56 = vadd.f32 %v3302_v24, %v3134_v11  ;;  %v3136_v20 = vadd.f32 %v3135_v18, %v3083_v16  ;;  %3654 = vmatprep.mubr.bf16.mxu0 %v3352_v61  ;;  %v3344_v27 = vmax.f32 %v3328_v30, 0.0  ;;  %v3186_v9 = vpop.f32.mrf.mxu1  ;;  %v3173_v24 = vadd.f32 %v3172_v21, %v5919_v4 }
 0x284   : > { %3655 = vmatmul.mubr.bf16.vlgmr.msra.gmra.mxu0 %v3351_v22  ;;  %v3179_v4 = vadd.f32 %v3178_v6, %v5929_v0  ;;  %v3187_v18 = vadd.f32 %v3186_v9, %v5935_v59 }
 0x285   : > { %v3332_v2 = vadd.f32 %v3306_v29, %v3136_v20  ;;  %v3347_v36 = vmax.f32 %v3331_v56, 0.0  ;;  %v3188_v42 = vpop.f32.mrf.mxu1  ;;  %v3309_v29 = vsub.s32 2, %v5946_v10  ;;  %v3183_v10 = vadd.f32 %v3182_v19, %v5931_v39 }
 0x286   : > { %v3189_v39 = vadd.f32 %v3188_v42, %v5937_v60 }
 0x287   : > { %v3348_v5 = vmax.f32 %v3332_v2, 0.0  ;;  %v3355_v51 = vpack.c.bf16 %v3347_v36, %v3343_v17  ;;  %v3310_v28 = vrot.slane %v5962_v55, %v3309_v29  ;;  %v5211_v29 = vld [vmem:[#allocation11 + $0x30] sm:$0xff]  }
 0x289   : > { %v3356_v57 = vpack.c.bf16 %v3348_v5, %v3344_v27 }
 0x28b   : > { %3662 = vmatprep.mubr.bf16.mxu0 %v3356_v57 }
 0x28c   : > { %3663 = vmatmul.mubr.bf16.gmra.mxu0 %v3355_v51 }
 0x2b4   : > { %v3225_v54 = vpop.f32.mrf.mxu0 }
 0x2b5   : > { %v3278_v32 = vpop.f32.mrf.mxu1  ;;  %v3226_v62 = vadd.f32 %v3225_v54, %v3173_v24  ;;  %v5210_v24 = vld [vmem:[#allocation11 + $0x38] sm:$0xff]   ;;  %v5212_v54 = vld [vmem:[#allocation11 + $0x28] sm:$0xff]  }
 0x2b6   : > { %v3227_v33 = vpop.f32.mrf.mxu0  ;;  %4503 = vmatprep.subr.bf16.mxu0 %v5210_v24 }
 0x2b7   : > { %v3280_v38 = vpop.f32.mrf.mxu1  ;;  %v3279_v34 = vadd.f32 %v3278_v32, %v3226_v62  ;;  %v3228_v40 = vadd.f32 %v3227_v33, %v3175_v48  ;;  %4504 = vmatpush3.bf16.msra.mxu0 %v5210_v24  ;;  %v5213_v32 = vld [vmem:[#allocation11 + $0x20] sm:$0xff]   ;;  %v5214_v48 = vld [vmem:[#allocation11 + $0x18] sm:$0xff]   ;;  %v5215_v62 = vld [vmem:[#allocation11 + $0x10] sm:$0xff]  }
 0x2b8   : > { %v3229_v41 = vpop.f32.mrf.mxu0  ;;  %4505 = vmatprep.subr.bf16.mxu0 %v5211_v29  ;;  %v5217_v33 = vld [vmem:[#allocation11] sm:$0xff]  }
 0x2b9   : > { %v3282_v43 = vpop.f32.mrf.mxu1  ;;  %v3281_v63 = vadd.f32 %v3280_v38, %v3228_v40  ;;  %v3230_v37 = vadd.f32 %v3229_v41, %v3177_v26  ;;  %v3321_v46 = vadd.f32 %v3310_v28, %v3279_v34 }
 0x2ba   : > { %v3231_v50 = vpop.f32.mrf.mxu0 }
 0x2bb   : > { %v3284_v13 = vpop.f32.mrf.mxu1  ;;  %v3283_v1 = vadd.f32 %v3282_v43, %v3230_v37  ;;  %v3232_v44 = vadd.f32 %v3231_v50, %v3179_v4  ;;  %v3322_v49 = vadd.f32 %v3314_v7, %v3281_v63  ;;  %v3337_v47 = vmax.f32 %v3321_v46, 0.0  ;;  %4506 = vmatpush3.bf16.msra.mxu0 %v5211_v29  ;;  %v4389_v63 = vld [vmem:[%s6048_s6] ss:$0 sm:$0xff] }
 0x2bc   : > { %v3235_v8 = vpop.f32.mrf.mxu0  ;;  %4507 = vmatprep.subr.bf16.mxu0 %v5212_v54 }
 0x2bd   : > { %v3288_v3 = vpop.f32.mrf.mxu1  ;;  %v3325_v45 = vadd.f32 %v3310_v28, %v3283_v1  ;;  %v3285_v15 = vadd.f32 %v3284_v13, %v3232_v44  ;;  %v3236_v52 = vadd.f32 %v3235_v8, %v3183_v10  ;;  %v3338_v53 = vmax.f32 %v3322_v49, 0.0 }
 0x2be   : > { %v3237_v0 = vpop.f32.mrf.mxu0 }
 0x2bf   : > { %v3290_v16 = vpop.f32.mrf.mxu1  ;;  %v3341_v55 = vmax.f32 %v3325_v45, 0.0  ;;  %v3326_v35 = vadd.f32 %v3314_v7, %v3285_v15  ;;  %v3238_v11 = vadd.f32 %v3237_v0, %v3185_v58  ;;  %v3289_v61 = vadd.f32 %v3288_v3, %v3236_v52  ;;  %4508 = vmatpush3.bf16.msra.mxu0 %v5212_v54 }
 0x2c0   : > { %v3239_v22 = vpop.f32.mrf.mxu0  ;;  %4509 = vmatprep.subr.bf16.mxu0 %v5213_v32 }
 0x2c1   : > { %v3292_v30 = vpop.f32.mrf.mxu1  ;;  %v3353_v56 = vpack.c.bf16 %v3341_v55, %v3337_v47  ;;  %v3342_v20 = vmax.f32 %v3326_v35, 0.0  ;;  %v3291_v25 = vadd.f32 %v3290_v16, %v3238_v11  ;;  %v3240_v2 = vadd.f32 %v3239_v22, %v3187_v18 }
 0x2c2   : > { %v3241_v27 = vpop.f32.mrf.mxu0  ;;  %v3329_v17 = vadd.f32 %v3310_v28, %v3289_v61 }
 0x2c3   : > { %v3242_v36 = vadd.f32 %v3241_v27, %v3189_v39  ;;  %v3354_v5 = vpack.c.bf16 %v3342_v20, %v3338_v53  ;;  %v3293_v57 = vadd.f32 %v3292_v30, %v3240_v2  ;;  %v3294_v51 = vpop.f32.mrf.mxu1  ;;  %v3330_v21 = vadd.f32 %v3314_v7, %v3291_v25  ;;  %4510 = vmatpush3.bf16.msra.mxu0 %v5213_v32  ;;  %v4422_v2 = vld [vmem:[%s6050_s8] ss:$0 sm:$0xff] }
 0x2c4   : > { %v3345_v12 = vmax.f32 %v3329_v17, 0.0  ;;  %4511 = vmatprep.subr.bf16.mxu0 %v5214_v48 }
 0x2c5   : > { %v3295_v31 = vadd.f32 %v3294_v51, %v3242_v36  ;;  %3703 = vmatprep.mubr.bf16.mxu1 %v3354_v5  ;;  %v3333_v59 = vadd.f32 %v3310_v28, %v3293_v57  ;;  %v3346_v19 = vmax.f32 %v3330_v21, 0.0 }
 0x2c6   : > { %3704 = vmatmul.mubr.bf16.vlgmr.msra.gmra.mxu1 %v3353_v56 }
 0x2c7   : > { %v3334_v60 = vadd.f32 %v3314_v7, %v3295_v31  ;;  %v3349_v6 = vmax.f32 %v3333_v59, 0.0  ;;  %4512 = vmatpush3.bf16.msra.mxu0 %v5214_v48 }
 0x2c8   : > { %4513 = vmatprep.subr.bf16.mxu0 %v5215_v62 }
 0x2c9   : > { %v3350_v23 = vmax.f32 %v3334_v60, 0.0  ;;  %v3357_v9 = vpack.c.bf16 %v3349_v6, %v3345_v12 }
 0x2cb   : > { %v3358_v42 = vpack.c.bf16 %v3350_v23, %v3346_v19  ;;  %4514 = vmatpush3.bf16.msra.mxu0 %v5215_v62 }
 0x2cc   : > { %4515 = vmatprep.subr.bf16.mxu0 %v5216_v14 }
 0x2cd   : > { %3711 = vmatprep.mubr.bf16.mxu1 %v3358_v42 }
 0x2ce   : > { %3712 = vmatmul.mubr.bf16.gmra.mxu1 %v3357_v9 }
 0x2cf   : > { %4516 = vmatpush3.bf16.msra.mxu0 %v5216_v14 }
 0x2d0   : > { %4517 = vmatprep.subr.bf16.mxu0 %v5217_v33 }
 0x2d3   : > { %4518 = vmatpush3.bf16.msra.mxu0 %v5217_v33 }
 0x344   : > { %v4453_v38 = vpop.f32.mrf.mxu0 }
 0x346   : > { %v4454_v26 = vpop.f32.mrf.mxu0 }
 0x347   : > { %v4455_v4 = vadd.f32 %v4454_v26, %v4453_v38 }
 0x348   : > { %v4456_v34 = vpop.f32.mrf.mxu0 }
 0x349   : > { %v3657_v46 = vadd.f32 %v4455_v4, %v4389_v63 }
 0x34a   : > { %v4457_v28 = vpop.f32.mrf.mxu0 }
 0x34b   : > { %v4458_v37 = vadd.f32 %v4457_v28, %v4456_v34 }
 0x34c   : > { %v4459_v40 = vpop.f32.mrf.mxu0 }
 0x34d   : > { %v3660_v44 = vadd.f32 %v4458_v37, %v4389_v63 }
 0x34e   : > { %v4460_v41 = vpop.f32.mrf.mxu0 }
 0x34f   : > { %v4461_v45 = vadd.f32 %v4460_v41, %v4459_v40 }
 0x350   : > { %v4462_v13 = vpop.f32.mrf.mxu0 }
 0x351   : > { %v3665_v11 = vadd.f32 %v4461_v45, %v4389_v63 }
 0x352   : > { %v4463_v3 = vpop.f32.mrf.mxu0 }
 0x353   : > { %v4464_v0 = vadd.f32 %v4463_v3, %v4462_v13 }
 0x355   : > { %v3668_v61 = vadd.f32 %v4464_v0, %v4389_v63 }
 0x386   : > { %v4481_v43 = vpop.f32.mrf.mxu1 }
 0x388   : > { %v4482_v7 = vpop.f32.mrf.mxu1 }
 0x389   : > { %v4483_v50 = vadd.f32 %v4482_v7, %v4481_v43 }
 0x38a   : > { %v4484_v10 = vpop.f32.mrf.mxu1 }
 0x38b   : > { %v3706_v58 = vadd.f32 %v4483_v50, %v3657_v46 }
 0x38c   : > { %v4485_v1 = vpop.f32.mrf.mxu1 }
 0x38d   : > { %v4486_v8 = vadd.f32 %v4485_v1, %v4484_v10  ;;  %v3720_v16 = vmax.f32 %v3706_v58, 0.0 }
 0x38e   : > { %v4487_v49 = vpop.f32.mrf.mxu1 }
 0x38f   : > { %v3709_v15 = vadd.f32 %v4486_v8, %v3660_v44 }
 0x390   : > { %v4488_v52 = vpop.f32.mrf.mxu1 }
 0x391   : > { %v3721_v47 = vmax.f32 %v3709_v15, 0.0  ;;  %v4489_v55 = vadd.f32 %v4488_v52, %v4487_v49 }
 0x392   : > { %v4490_v35 = vpop.f32.mrf.mxu1 }
 0x393   : > { %v3724_v18 = vpack.c.bf16 %v3721_v47, %v3720_v16  ;;  %v3714_v22 = vadd.f32 %v4489_v55, %v3665_v11 }
 0x394   : > { %v4491_v39 = vpop.f32.mrf.mxu1 }
 0x395   : > { %v4492_v30 = vadd.f32 %v4491_v39, %v4490_v35  ;;  %4519 = vmatprep.mubr.bf16.mxu0 %v3724_v18  ;;  %v3722_v56 = vmax.f32 %v3714_v22, 0.0 }
 0x397   : > { %v3717_v53 = vadd.f32 %v4492_v30, %v3668_v61 }
 0x399   : > { %v3723_v20 = vmax.f32 %v3717_v53, 0.0 }
 0x39b   : > { %v3725_v25 = vpack.c.bf16 %v3723_v20, %v3722_v56 }
 0x39d   : > { %4520 = vmatmul.mubr.bf16.vlgmr.msra.gmra.mxu0 %v3725_v25 }
 0x45d   : > { %v4521_v27 = vpop.f32.mrf.mxu0 }
 0x45e   : > { %v3840_v36 = vadd.f32 %v4521_v27, %v4422_v2 }
 0x45f   : > { %v3831_v5 = vpop.f32.mrf.mxu0 }
 0x460   : > { %3848 = vst [vmem:[%s450_s7 + $0x10] sm:$0xff] %v3840_v36  ;;  %v3832_v17 = vadd.f32 %v4422_v2, %v3831_v5 }
 0x461   : > { %v4522_v57 = vpop.f32.mrf.mxu0 }
 0x462   : > { %3846 = vst [vmem:[%s450_s7] sm:$0xff] %v3832_v17  ;;  %v3843_v51 = vadd.f32 %v4522_v57, %v4422_v2 }
 0x463   : > { %v3834_v21 = vpop.f32.mrf.mxu0 }
 0x464   : > { %3849 = vst [vmem:[%s450_s7 + $0x18] sm:$0xff] %v3843_v51  ;;  %v3835_v31 = vadd.f32 %v4422_v2, %v3834_v21 }
 0x466   : > { %3847 = vst [vmem:[%s450_s7 + $0x8] sm:$0xff] %v3835_v31 }
 0x467   : > { %5391 = shalt.err (!%p5388_p4)
}
 0x468   : > { %s5392_s20 = scalar_lea.hbm %s5999_s2, 512  ;;  %s5396_s14 = scalar_lea.hbm %s6051_s9, 1024 }
 0x469   : > { %p5393_p8 = scmp.ne.s32.totalorder %s5999_s2, %s5392_s20  ;;  %p5397_p9 = scmp.lt.s32.totalorder %s5999_s2, %s6051_s9 }
 0x46a   : > { %p5398_p13 = scmp.lt.s32.totalorder %s5396_s14, %s5392_s20 }
 0x46b   : > { %p5394_p11 = pnand %p5393_p8, %p6083_p5 }
 0x46c   : > { %p5399_p6 = por %p5398_p13, %p5397_p9 }
 0x46d   : > { %p5395_p12 = pneg %p5394_p11 }
 0x46f   : > { %p5400_p0 = pnand %p5399_p6, %p5395_p12 }
 0x471   : > { %5403 = shalt.err (!%p5400_p0)
}
 0x472   : > { %s5476_s0 = smov 128   ;;  %s5477_s5 = smov 8  }
 0x473   : > { %4549 = dma.vmem_to_hbm [thread:$0]  (%p6083_p5), %s5994_s27, 512, %s5999_s2, %s3851_s29, %s5476_s0, %s5476_s0, %s5477_s5  }
 0x474 PF: > { %s3879_s7 = sand.u32 1, %s5446_s30   ;;  %p6084_p3 = scmp.ne.s32.totalorder %s6063_s16, 0 }
 0x475   : > { %p6085_p7 = scmp.ge.s32.totalorder %s5458_s12, 2  ;;  %s3880_s11 = scalar_lea.sflag [#allocation4], %s3879_s7 }
 0x477   : > { %p4572_p2 = pnand %p6085_p7, %p6084_p3 }
 0x479   : > { %p4573_p10 = pneg %p4572_p2 }
 0x47b   : > { %5441 = dma.done.wait (%p4573_p10), %s3880_s11, 512  }
 0x47c   : > { %5443 = vsyncadd (%p4573_p10), %s3880_s11, 4294966784  ;;  %s6086_s18 = sld [smem:[#allocation20_spill]]  ;;  %p27_p1 = scmp.ge.s32.totalorder %s5616_s24, 4  }
 0x47d   : > { %s6087_s11 = sld [smem:[#allocation21_spill]]  ;;  %s6088_s30 = smov %s5450_s10 }
 0x47e   : > { %s6090_s12 = smov %s5616_s24  ;;  %29 = sbr.rel (!%p27_p1) target bundleno = 15 (0xf), region = 130 }
 0x482   : > { %s6089_s10 = smov %s6086_s18 }
 0x483   :  { %3885 = vsyncpa [#allocation3], 1 }
 0x484   :  { %3887 = vsyncpa [#allocation3 + $0x1], 1 }
 0x485   :  { %3888 = vsyncpa [#allocation6], 1 }
 0x486   :  { %3890 = vsyncpa [#allocation6 + $0x1], 1 }
 0x487   :  { %3891 = vsyncpa [#allocation9], 1 }
 0x488   :  { %3892 = vsyncpa [#allocation12], 1 }
 0x489   :  { %3893 = vsyncpa [#allocation4], 1 }
 0x48a   :  { %3895 = vsyncpa [#allocation4 + $0x1], 1 }

// kernel: tpu_custom_call.1
= control target key start
LH: loop header
LB: loop body
LE: loop exit
PB: predicated region body
PF: predicated region fallthrough
CT: control target
= control target key end

     0   :  { %s6042_s0 = inlined_call_operand.hbm [shape: bf16[64,768], index: 0, kind: input, shape index: {}]   ;;  %s6043_s1 = inlined_call_operand.hbm [shape: bf16[64,600], index: 1, kind: input, shape index: {}]   ;;  %s6044_s2 = inlined_call_operand.hbm [shape: bf16[768,512], index: 2, kind: input, shape index: {}]   ;;  %s6045_s3 = inlined_call_operand.hbm [shape: bf16[600,512], index: 3, kind: input, shape index: {}]   ;;  %s6046_s4 = inlined_call_operand.vmem [shape: f32[1,512], index: 4, kind: input, shape index: {}]   ;;  %s6047_s5 = inlined_call_operand.hbm [shape: bf16[512,128], index: 5, kind: input, shape index: {}]   ;;  %s6048_s6 = inlined_call_operand.vmem [shape: f32[1,128], index: 6, kind: input, shape index: {}]   ;;  %s6049_s7 = inlined_call_operand.hbm [shape: bf16[128,128], index: 7, kind: input, shape index: {}]   ;;  %s6050_s8 = inlined_call_operand.vmem [shape: f32[1,128], index: 8, kind: input, shape index: {}]   ;;  %s6051_s9 = inlined_call_operand.hbm [shape: f32[64,128], index: 9, kind: output, shape index: {}]  }
   0x1   :  { %6056 = sst [smem:[#allocation22_spill]] %s6042_s0 }
   0x2   :  { %6057 = sst [smem:[#allocation23_spill]] %s6044_s2 }
   0x3   :  { %6058 = sst [smem:[#allocation24_spill]] %s6045_s3 }
   0x4   :  { %6059 = sst [smem:[#allocation25_spill]] %s6047_s5 }
   0x5   :  { %6060 = sst [smem:[#allocation26_spill]] %s6049_s7 }
   0x6   :  { %14 = vsyncpa [#allocation3], 0 }
   0x7   :  { %16 = vsyncpa [#allocation3 + $0x1], 0 }
   0x8   :  { %17 = vsyncpa [#allocation6], 0 }
   0x9   :  { %19 = vsyncpa [#allocation6 + $0x1], 0 }
   0xa   :  { %20 = vsyncpa [#allocation9], 0 }
   0xb   :  { %21 = vsyncpa [#allocation12], 0 }
   0xc   :  { %22 = vsyncpa [#allocation4], 0 }
   0xd   :  { %24 = vsyncpa [#allocation4 + $0x1], 0  ;;  %s5528_s30 = smov 0   ;;  %s5530_s10 = smov 0  }
   0xe   :  { %s5532_s11 = smov 0   ;;  %s5534_s12 = smov 0  }
   0xf LB: > { %6061 = sst [smem:[#allocation20_spill]] %s5454_s11  ;;  %s5549_s13 = sadd.s32 4294967295, %s5458_s12   ;;  %s5458_s12 = sphi %s5534_s12, %s6090_s12   ;;  %s5454_s11 = sphi %s5532_s11, %s6087_s11   ;;  %s5450_s10 = sphi %s5530_s10, %s6089_s10   ;;  %s5446_s30 = sphi %s5528_s30, %s6088_s30  }
  0x10   : > { %s3998_s14 = sadd.s32 4294967294, %s5458_s12   ;;  %p50_p0 = scmp.ne.s32.totalorder %s5450_s10, %s5446_s30 }
  0x11   : > { %p6052_p1 = scmp.eq.s32.totalorder %s5549_s13, 0  ;;  %p253_p3 = scmp.eq.s32.totalorder %s3998_s14, 1 }
  0x12   : > { %p3999_p5 = scmp.ge.s32.totalorder %s5458_s12, 1  ;;  %p260_p7 = scmp.lt.s32.totalorder %s5458_s12, 3 }
  0x13   : > { %p5558_p4 = por %p6052_p1, %p50_p0  ;;  %p5563_p6 = por %p253_p3, %p50_p0 }
  0x14   : > { %p5568_p8 = pnand %p3999_p5, %p260_p7  ;;  %s5460_s18 = smov [#allocation7]  }
  0x15   : > { %s6062_s15 = scalar_select %p5558_p4, 1, 0 }
  0x16   : > { %s6063_s16 = scalar_select %p5563_p6, 1, 0 }
  0x17   : > { %s272_s19 = sshll.u32 %s5460_s18, 4  ;;  %p4551_p9 = pneg %p5568_p8  ;;  %s273_s19 = int_to_ptr.vmem [resolvable:$true] %s272_s19 }
  0x18   : > { %s5461_s21 = smov [#allocation8]   ;;  %s5462_s23 = smov [#allocation10]  }
  0x19   : > { %p5577_p11 = pnand %p4551_p9, %p6052_p1  ;;  %s285_s22 = sshll.u32 %s5461_s21, 4  ;;  %s286_s22 = int_to_ptr.vmem [resolvable:$true] %s285_s22 }
  0x1a   : > { %s301_s24 = sshll.u32 %s5462_s23, 4  ;;  %s5229_s25 = scalar_lea.vmem %s273_s19, 24576  ;;  %s302_s24 = int_to_ptr.vmem [resolvable:$true] %s301_s24 }
  0x1b   : > { %p5220_p12 = pneg %p5577_p11  ;;  %p5230_p13 = scmp.ne.s32.totalorder %s273_s19, %s5229_s25 }
  0x1c   : > { %p5237_p5 = scmp.lt.s32.totalorder %s273_s19, %s273_s19  ;;  %p5238_p7 = scmp.lt.s32.totalorder %s5229_s25, %s5229_s25 }
  0x1d   : > { %p5232_p0 = pnand %p5230_p13, %p5220_p12 }
  0x1e   : > { %p5239_p9 = por %p5238_p7, %p5237_p5 }
  0x1f   : > { %p5233_p3 = pneg %p5232_p0 }
  0x21   : > { %p5240_p10 = pnand %p5239_p9, %p5233_p3 }
  0x23   : > { %5243 = shalt.err (!%p5240_p10)
}
  0x24   : > { %s5463_s26 = smov 256   ;;  %s5464_s27 = smov 16  }
  0x25   : > { %s6066_s2 = sld [smem:[#allocation23_spill]]  ;;  %s5255_s14 = scalar_lea.vmem %s286_s22, 19200 }
  0x26   : > { %p5256_p1 = scmp.ne.s32.totalorder %s286_s22, %s5255_s14  ;;  %p5263_p2 = scmp.lt.s32.totalorder %s286_s22, %s286_s22 }
  0x27   : > { %p5264_p6 = scmp.lt.s32.totalorder %s5255_s14, %s5255_s14 }
  0x28   : > { %p5258_p13 = pnand %p5256_p1, %p5220_p12 }
  0x29   : > { %p5265_p5 = por %p5264_p6, %p5263_p2 }
  0x2a   : > { %p5259_p0 = pneg %p5258_p13 }
  0x2b   : > { %4554 = dma.hbm_to_vmem [thread:$0]  (!%p5577_p11), %s6066_s2, 24576, %s273_s19, [#allocation6], %s5463_s26, %s5463_s26, %s5464_s27  }
  0x2c   : > { %p5266_p3 = pnand %p5265_p5, %p5259_p0 }
  0x2e   : > { %5269 = shalt.err (!%p5266_p3)
}
  0x2f   : > { %s6067_s3 = sld [smem:[#allocation24_spill]]  ;;  %s5281_s19 = scalar_lea.vmem %s302_s24, 4096 }
  0x30   : > { %p5282_p10 = scmp.ne.s32.totalorder %s302_s24, %s5281_s19  ;;  %p5289_p9 = scmp.lt.s32.totalorder %s302_s24, %s302_s24 }
  0x31   : > { %p5290_p13 = scmp.lt.s32.totalorder %s5281_s19, %s5281_s19 }
  0x32   : > { %p5284_p7 = pnand %p5282_p10, %p5220_p12 }
  0x33   : > { %p5291_p4 = por %p5290_p13, %p5289_p9 }
  0x34   : > { %p5285_p1 = pneg %p5284_p7 }
  0x35   : > { %4557 = dma.hbm_to_vmem [thread:$0]  (!%p5577_p11), %s6067_s3, 19200, %s286_s22, [#allocation9], %s5463_s26, %s5463_s26, %s5464_s27  }
  0x36   : > { %p5292_p2 = pnand %p5291_p4, %p5285_p1 }
  0x38   : > { %5295 = shalt.err (!%p5292_p2)
}
  0x39   : > { %s5465_s23 = smov 64   ;;  %s5466_s25 = smov 4  }
  0x3a   : > { %s6068_s5 = sld [smem:[#allocation25_spill]]  ;;  %s5467_s22 = smov [#allocation11]  }
  0x3b   : > { %s317_s26 = sshll.u32 %s5467_s22, 4  ;;  %s318_s26 = int_to_ptr.vmem [resolvable:$true] %s317_s26 }
  0x3c   : > { %s5307_s27 = scalar_lea.vmem %s318_s26, 1024  ;;  %p5315_p4 = scmp.lt.s32.totalorder %s318_s26, %s318_s26 }
  0x3d   : > { %p5308_p6 = scmp.ne.s32.totalorder %s318_s26, %s5307_s27  ;;  %p5316_p3 = scmp.lt.s32.totalorder %s5307_s27, %s5307_s27 }
  0x3f   : > { %p5310_p0 = pnand %p5308_p6, %p5220_p12  ;;  %p5317_p10 = por %p5316_p3, %p5315_p4 }
  0x40   : > { %4560 = dma.hbm_to_vmem [thread:$0]  (!%p5577_p11), %s6068_s5, 4096, %s302_s24, [#allocation9], %s5465_s23, %s5465_s23, %s5466_s25  }
  0x41   : > { %p5311_p5 = pneg %p5310_p0 }
  0x43   : > { %p5318_p7 = pnand %p5317_p10, %p5311_p5 }
  0x45   : > { %5321 = shalt.err (!%p5318_p7)
}
  0x46   : > { %s6069_s7 = sld [smem:[#allocation26_spill]]  ;;  %s5616_s24 = sadd.s32 1, %s5458_s12  }
  0x47   : > { %s37_s21 = sadd.s32 1, %s5454_s11  ;;  %s34_s20 = ssub.s32 %s5458_s12, %s5616_s24 }
  0x48   : > { %p44_p12 = scmp.ne.s32.totalorder %s5454_s11, %s5450_s10  ;;  %p35_p1 = scmp.eq.s32.totalorder %s34_s20, 0 }
  0x49   : > { %p45_p9 = scmp.eq.s32.totalorder %s5458_s12, 0  ;;  %p6070_p13 = scmp.eq.s32.totalorder %s5549_s13, 1 }
  0x4a   : > { %p4579_p6 = scmp.lt.s32.totalorder %s5458_s12, 2  ;;  %s5635_s29 = sand.u32 1, %s5454_s11  }
  0x4b   : > { %p5626_p2 = por %p6070_p13, %p44_p12  ;;  %p46_p0 = por %p45_p9, %p44_p12 }
  0x4c   : > { %4563 = dma.hbm_to_vmem [thread:$0]  (!%p5577_p11), %s6069_s7, 1024, %s318_s26, [#allocation12], %s5465_s23, %s5465_s23, %s5466_s25  }
  0x4d   : > { %s6071_s19 = scalar_select %p5626_p2, 1, 0 }
  0x4e   : > { %s5632_s28 = scalar_select %p35_p1, %s5454_s11, %s37_s21  }
  0x4f   : > { %s4523_s23 = smul.u32 96, %s5635_s29  ;;  %p5639_p11 = pnand %p4579_p6, %p46_p0 }
  0x50   : > { %6072 = sst [smem:[#allocation21_spill]] %s5632_s28  ;;  %s4524_s25 = smul.u32 1536, %s5458_s12 }
  0x51   : > { %s6074_s0 = sld [smem:[#allocation22_spill]]  ;;  %s338_s18 = scalar_lea.vmem [#allocation2], %s4523_s23 }
  0x52   : > { %s346_s21 = sshll.u32 %s338_s18, 4  ;;  %s335_s2 = scalar_lea.sflag [#allocation3], %s5635_s29  ;;  %s5648_s21 = int_to_ptr.vmem [resolvable:$true] %s346_s21 }
  0x53   : > { %p5324_p4 = pneg %p5639_p11 }
  0x57   : > { %s5646_s14 = scalar_lea.hbm %s6074_s0, %s4524_s25  ;;  %s5327_s27 = scalar_lea.hbm %s6074_s0, 3072 }
  0x58   : > { %s5322_s3 = scalar_lea.hbm %s5646_s14, 1536  ;;  %p5328_p7 = scmp.lt.s32.totalorder %s5646_s14, %s6074_s0 }
  0x59   : > { %p5323_p5 = scmp.ne.s32.totalorder %s5646_s14, %s5322_s3  ;;  %p5329_p12 = scmp.lt.s32.totalorder %s5327_s27, %s5322_s3 }
  0x5b   : > { %p5325_p3 = pnand %p5324_p4, %p5323_p5  ;;  %p5330_p1 = por %p5329_p12, %p5328_p7 }
  0x5d   : > { %p5326_p10 = pneg %p5325_p3 }
  0x5f   : > { %p5331_p9 = pnand %p5330_p1, %p5326_p10 }
  0x61   : > { %5334 = shalt.err (!%p5331_p9)
}
  0x62   : > { %s5335_s23 = scalar_lea.vmem %s5648_s21, 1536  ;;  %s5468_s18 = smov [#allocation2]  }
  0x63   : > { %p5336_p13 = scmp.ne.s32.totalorder %s5648_s21, %s5335_s23  ;;  %s5340_s26 = sshll.u32 %s5468_s18, 4  ;;  %s5341_s26 = int_to_ptr.vmem [resolvable:$false] %s5340_s26 }
  0x64   : > { %s5342_s25 = scalar_lea.vmem %s5341_s26, 3072  ;;  %p5343_p5 = scmp.lt.s32.totalorder %s5648_s21, %s5341_s26 }
  0x65   : > { %p5338_p6 = pnand %p5336_p13, %p5324_p4  ;;  %p5344_p3 = scmp.lt.s32.totalorder %s5342_s25, %s5335_s23 }
  0x67   : > { %p5339_p0 = pneg %p5338_p6  ;;  %p5345_p2 = por %p5344_p3, %p5343_p5 }
  0x69   : > { %p5346_p7 = pnand %p5345_p2, %p5339_p0 }
  0x6b   : > { %5349 = shalt.err (!%p5346_p7)
}
  0x6c   : > { %s5469_s3 = smov 384   ;;  %s5470_s5 = smov 24  }
  0x6d   : > { %4567 = dma.hbm_to_vmem [thread:$0]  (!%p5639_p11), %s5646_s14, 1536, %s5648_s21, %s335_s2, %s5469_s3, %s5469_s3, %s5470_s5  }
  0x6e   : > { %s4525_s7 = smul.u32 80, %s5635_s29  ;;  %s6075_s0 = sand.u32 1, %s5458_s12  }
  0x6f   : > { %s4526_s27 = smul.u32 1280, %s5458_s12  ;;  %s5689_s28 = scalar_lea.sflag [#allocation6], %s6075_s0 }
  0x70   : > { %s360_s25 = scalar_lea.vmem [#allocation5], %s4525_s7  ;;  %s5355_s14 = scalar_lea.hbm %s6043_s1, 2560 }
  0x71   : > { %s5683_s26 = scalar_lea.hbm %s6043_s1, %s4526_s27  ;;  %s368_s20 = sshll.u32 %s360_s25, 4  ;;  %s5685_s20 = int_to_ptr.vmem [resolvable:$true] %s368_s20 }
  0x72   : > { %s5350_s11 = scalar_lea.hbm %s5683_s26, 1280  ;;  %p5356_p1 = scmp.lt.s32.totalorder %s5683_s26, %s6043_s1 }
  0x73   : > { %p5351_p2 = scmp.ne.s32.totalorder %s5683_s26, %s5350_s11  ;;  %p5357_p9 = scmp.lt.s32.totalorder %s5355_s14, %s5350_s11 }
  0x75   : > { %p5353_p10 = pnand %p5351_p2, %p5324_p4  ;;  %p5358_p13 = por %p5357_p9, %p5356_p1 }
  0x77   : > { %p5354_p12 = pneg %p5353_p10 }
  0x79   : > { %p5359_p6 = pnand %p5358_p13, %p5354_p12 }
  0x7b   : > { %5362 = shalt.err (!%p5359_p6)
}
  0x7c   : > { %s5363_s0 = scalar_lea.vmem %s5685_s20, 1280  ;;  %s5471_s5 = smov [#allocation5]  }
  0x7d   : > { %p5364_p0 = scmp.ne.s32.totalorder %s5685_s20, %s5363_s0  ;;  %s5368_s7 = sshll.u32 %s5471_s5, 4  ;;  %s5369_s7 = int_to_ptr.vmem [resolvable:$false] %s5368_s7 }
  0x7e   : > { %s5370_s27 = scalar_lea.vmem %s5369_s7, 2560  ;;  %p5371_p7 = scmp.lt.s32.totalorder %s5685_s20, %s5369_s7 }
  0x7f   : > { %p5366_p5 = pnand %p5364_p0, %p5324_p4  ;;  %p5372_p2 = scmp.lt.s32.totalorder %s5370_s27, %s5363_s0 }
  0x81   : > { %p5367_p3 = pneg %p5366_p5  ;;  %p5373_p10 = por %p5372_p2, %p5371_p7 }
  0x83   : > { %p5374_p1 = pnand %p5373_p10, %p5367_p3 }
  0x85   : > { %5377 = shalt.err (!%p5374_p1)
}
  0x86   : > { %s5472_s11 = smov 320   ;;  %s5473_s18 = smov 20  }
  0x87   : > { %4570 = dma.hbm_to_vmem [thread:$0]  (!%p5639_p11), %s5683_s26, 1280, %s5685_s20, %s5689_s28, %s5472_s11, %s5472_s11, %s5473_s18  }
  0x88   : > { %380 = sbr.rel (%p5568_p8) target bundleno = 1140 (0x474), region = 56  ;;  %s5717_s23 = sand.u32 (!%p5568_p8), 1, %s5450_s10  }
  0x89   : > { %s4527_s25 = smul.u32 (!%p5568_p8), 96, %s5717_s23  ;;  %s383_s2 = scalar_lea.sflag (!%p5568_p8), [#allocation3], %s5717_s23 }
  0x8a   : > { %p6076_p4 = scmp.ne.s32.totalorder (!%p5568_p8), %s6062_s15, 0 }
  0x8b   : > { %s5721_s29 = scalar_lea.vmem (!%p5568_p8), [#allocation2], %s4527_s25 }
  0x8d   : > { %5421 = dma.done.wait (%p6076_p4), %s383_s2, 1536  }
  0x8e   : > { %5423 = vsyncadd (%p6076_p4), %s383_s2, 4294965760  ;;  %s391_s17 = sand.u32 1, %s5549_s13   ;;  %s4528_s28 = smul.u32 80, %s5717_s23 }
  0x8f   : > { %s392_s22 = scalar_lea.sflag [#allocation6], %s391_s17 }
  0x90   : > { %s5729_s20 = scalar_lea.vmem [#allocation5], %s4528_s28 }
  0x91   : > { %5425 = dma.done.wait (%p6076_p4), %s392_s22, 1280  }
  0x92   : > { %5427 = vsyncadd (%p6076_p4), %s392_s22, 4294966016  ;;  %p6077_p8 = scmp.eq.s32.totalorder %s5549_s13, 0 }
  0x94   : > { %5429 = dma.done.wait (%p6077_p8), [#allocation6], 24576   ;;  %p6078_p11 = pmov %p6077_p8 }
  0x95   : > { %p6079_p12 = pmov %p6077_p8 }
  0x96   : > { %5431 = vsyncadd (%p6078_p11), [#allocation6], 4294942720 }
  0x97   : > { %5433 = dma.done.wait (%p6079_p12), [#allocation9], 23296   ;;  %p6080_p9 = pmov %p6077_p8 }
  0x98   : > { %p6081_p13 = pmov %p6077_p8 }
  0x99   : > { %5435 = vsyncadd (%p6080_p9), [#allocation9], 4294944000 }
  0x9a   : > { %5437 = dma.done.wait (%p6081_p13), [#allocation12], 1024   ;;  %p6082_p6 = pmov %p6077_p8 }
  0x9b   : > { %v4632_v0 = vld [vmem:[#allocation8 + $0xe4] ss:$16 sps:$4 sm:$0xff]   ;;  %v4636_v2 = vld [vmem:[#allocation8 + $0xe0] ss:$16 sps:$4 sm:$0xff]   ;;  %vm1628_vm0 = vcmask 1043456   ;;  %vm1621_vm1 = vcmask 719872  }
  0x9c   : > { %5439 = vsyncadd (%p6082_p6), [#allocation12], 4294966272  ;;  %v4634_v1 = vld [vmem:[#allocation8 + $0x2e4] ss:$16 sps:$4 sm:$0xff]   ;;  %1641 = vmatprep.subr.bf16.mxu0 %v4632_v0  ;;  %v4637_v3 = vld [vmem:[#allocation8 + $0x2e0] ss:$16 sps:$4 sm:$0xff]  }
  0x9d   : > { %1694 = vmatprep.subr.bf16.mxu1 %v4634_v1  ;;  %v4638_v4 = vld [vmem:[#allocation8 + $0xc4] ss:$16 sps:$4 sm:$0xff]   ;;  %1642 = vmatpush1.bf16.msra.mxu0 %v4636_v2  ;;  %v4642_v6 = vld [vmem:[#allocation8 + $0xc0] ss:$16 sps:$4 sm:$0xff]   ;;  %s4016_s3 = sshll.u32 %s5717_s23, 5  ;;  %s4436_s11 = sshll.u32 %s5549_s13, 9 }
  0x9e   : > { %1695 = vmatpush1.bf16.msra.mxu1 %v4637_v3  ;;  %v4640_v5 = vld [vmem:[#allocation8 + $0x2c4] ss:$16 sps:$4 sm:$0xff]   ;;  %1643 = vmatprep.subr.bf16.mxu0 %v4638_v4  ;;  %v4643_v7 = vld [vmem:[#allocation8 + $0x2c0] ss:$16 sps:$4 sm:$0xff]   ;;  %v4737_v4 = vld [vmem:[#allocation8 + $0xec] ss:$16 sps:$4 sm:$0xff]   ;;  %s5999_s2 = scalar_lea.hbm %s6051_s9, %s4436_s11 }
  0x9f   : > { %1696 = vmatprep.subr.bf16.mxu1 %v4640_v5  ;;  %v4644_v8 = vld [vmem:[#allocation8 + $0xa4] ss:$16 sps:$4 sm:$0xff]   ;;  %v4648_v10 = vld [vmem:[#allocation8 + $0xa0] ss:$16 sps:$4 sm:$0xff]   ;;  %s450_s7 = scalar_lea.vmem [#allocation13], %s4016_s3  ;;  %p6083_p5 = scmp.ne.s32.totalorder %s6071_s19, 0 }
  0xa0   : > { %v4646_v9 = vld [vmem:[#allocation8 + $0x2a4] ss:$16 sps:$4 sm:$0xff]   ;;  %v4649_v11 = vld [vmem:[#allocation8 + $0x2a0] ss:$16 sps:$4 sm:$0xff]   ;;  %s3864_s27 = sshll.u32 %s450_s7, 4  ;;  %s5475_s13 = smov [#allocation13]   ;;  %s5994_s27 = int_to_ptr.vmem [resolvable:$true] %s3864_s27 }
  0xa1   : > { %1644 = vmatpush1.bf16.msra.mxu0 %v4642_v6  ;;  %v4650_v12 = vld [vmem:[#allocation8 + $0x84] ss:$16 sps:$4 sm:$0xff]   ;;  %v4654_v14 = vld [vmem:[#allocation8 + $0x80] ss:$16 sps:$4 sm:$0xff]   ;;  %s5378_s17 = scalar_lea.vmem %s5994_s27, 512  ;;  %s5382_s28 = sshll.u32 %s5475_s13, 4  ;;  %s5383_s28 = int_to_ptr.vmem [resolvable:$false] %s5382_s28 }
  0xa2   : > { %1697 = vmatpush1.bf16.msra.mxu1 %v4643_v7  ;;  %1645 = vmatprep.subr.bf16.mxu0 %v4644_v8  ;;  %v4652_v13 = vld [vmem:[#allocation8 + $0x284] ss:$16 sps:$4 sm:$0xff]   ;;  %v4655_v15 = vld [vmem:[#allocation8 + $0x280] ss:$16 sps:$4 sm:$0xff]   ;;  %v5759_v7 = vld [vmem:[%s5729_s20 + $0x8] ss:$20 sps:$4 sm:$0xff]   ;;  %p5379_p0 = scmp.ne.s32.totalorder %s5994_s27, %s5378_s17  ;;  %p5385_p2 = scmp.lt.s32.totalorder %s5994_s27, %s5383_s28 }
  0xa3   : > { %1698 = vmatprep.subr.bf16.mxu1 %v4646_v9  ;;  %v4656_v16 = vld [vmem:[#allocation8 + $0x64] ss:$16 sps:$4 sm:$0xff]   ;;  %v4660_v18 = vld [vmem:[#allocation8 + $0x60] ss:$16 sps:$4 sm:$0xff]   ;;  %v4735_v8 = vld [vmem:[#allocation8 + $0xe8] ss:$16 sps:$4 sm:$0xff]  }
  0xa4   : > { %v4658_v17 = vld [vmem:[#allocation8 + $0x264] ss:$16 sps:$4 sm:$0xff]   ;;  %v4661_v19 = vld [vmem:[#allocation8 + $0x260] ss:$16 sps:$4 sm:$0xff]   ;;  %p5380_p3 = pnand %p5379_p0, %p6083_p5  ;;  %s5384_s22 = scalar_lea.vmem %s5383_s28, 1024 }
  0xa5   : > { %1646 = vmatpush1.bf16.msra.mxu0 %v4648_v10  ;;  %v4662_v20 = vld [vmem:[#allocation8 + $0x44] ss:$16 sps:$4 sm:$0xff]   ;;  %v4666_v22 = vld [vmem:[#allocation8 + $0x40] ss:$16 sps:$4 sm:$0xff]   ;;  %p5386_p10 = scmp.lt.s32.totalorder %s5384_s22, %s5378_s17 }
  0xa6   : > { %1699 = vmatpush1.bf16.msra.mxu1 %v4649_v11  ;;  %1647 = vmatprep.subr.bf16.mxu0 %v4650_v12  ;;  %v4664_v21 = vld [vmem:[#allocation8 + $0x244] ss:$16 sps:$4 sm:$0xff]   ;;  %v4667_v23 = vld [vmem:[#allocation8 + $0x240] ss:$16 sps:$4 sm:$0xff]   ;;  %v4744_v11 = vld [vmem:[#allocation8 + $0xcc] ss:$16 sps:$4 sm:$0xff]   ;;  %p5381_p7 = pneg %p5380_p3 }
  0xa7   : > { %1700 = vmatprep.subr.bf16.mxu1 %v4652_v13  ;;  %v4668_v24 = vld [vmem:[#allocation8 + $0x24] ss:$16 sps:$4 sm:$0xff]   ;;  %v4672_v26 = vld [vmem:[#allocation8 + $0x20] ss:$16 sps:$4 sm:$0xff]   ;;  %p5387_p1 = por %p5386_p10, %p5385_p2 }
  0xa8   : > { %v4670_v25 = vld [vmem:[#allocation8 + $0x224] ss:$16 sps:$4 sm:$0xff]   ;;  %v4673_v27 = vld [vmem:[#allocation8 + $0x220] ss:$16 sps:$4 sm:$0xff]  }
  0xa9   : > { %1648 = vmatpush1.bf16.msra.mxu0 %v4654_v14  ;;  %v4674_v28 = vld [vmem:[#allocation8 + $0x4] ss:$16 sps:$4 sm:$0xff]   ;;  %v4678_v30 = vld [vmem:[#allocation8] ss:$16 sps:$4 sm:$0xff]   ;;  %p5388_p4 = pnand %p5387_p1, %p5381_p7 }
  0xaa   : > { %1701 = vmatpush1.bf16.msra.mxu1 %v4655_v15  ;;  %1649 = vmatprep.subr.bf16.mxu0 %v4656_v16  ;;  %v4676_v29 = vld [vmem:[#allocation8 + $0x204] ss:$16 sps:$4 sm:$0xff]   ;;  %v4679_v31 = vld [vmem:[#allocation8 + $0x200] ss:$16 sps:$4 sm:$0xff]   ;;  %v4742_v15 = vld [vmem:[#allocation8 + $0xc8] ss:$16 sps:$4 sm:$0xff]  }
  0xab   : > { %1702 = vmatprep.subr.bf16.mxu1 %v4658_v17  ;;  %v4680_v32 = vld [vmem:[#allocation8 + $0x1e4] ss:$16 sps:$4 sm:$0xff]   ;;  %v4684_v34 = vld [vmem:[#allocation8 + $0x1e0] ss:$16 sps:$4 sm:$0xff]   ;;  %v4750_v17 = vld [vmem:[#allocation8 + $0xac] ss:$16 sps:$4 sm:$0xff]  }
  0xac   : > { %v4682_v33 = vld [vmem:[#allocation8 + $0x3e4] ss:$16 sps:$4 sm:$0xff]   ;;  %v4685_v35 = vld [vmem:[#allocation8 + $0x3e0] ss:$16 sps:$4 sm:$0xff]  }
  0xad   : > { %1650 = vmatpush1.bf16.msra.mxu0 %v4660_v18  ;;  %v4686_v36 = vld [vmem:[#allocation8 + $0x1c4] ss:$16 sps:$4 sm:$0xff]   ;;  %v4690_v38 = vld [vmem:[#allocation8 + $0x1c0] ss:$16 sps:$4 sm:$0xff]  }
  0xae   : > { %1703 = vmatpush1.bf16.msra.mxu1 %v4661_v19  ;;  %1651 = vmatprep.subr.bf16.mxu0 %v4662_v20  ;;  %v4688_v37 = vld [vmem:[#allocation8 + $0x3c4] ss:$16 sps:$4 sm:$0xff]   ;;  %v4691_v39 = vld [vmem:[#allocation8 + $0x3c0] ss:$16 sps:$4 sm:$0xff]   ;;  %v5774_v19 = vld [vmem:[%s5729_s20 + $0x28] ss:$20 sps:$4 sm:$0xff]  }
  0xaf   : > { %1704 = vmatprep.subr.bf16.mxu1 %v4664_v21  ;;  %v4692_v40 = vld [vmem:[#allocation8 + $0x1a4] ss:$16 sps:$4 sm:$0xff]   ;;  %v4696_v42 = vld [vmem:[#allocation8 + $0x1a0] ss:$16 sps:$4 sm:$0xff]   ;;  %v4748_v21 = vld [vmem:[#allocation8 + $0xa8] ss:$16 sps:$4 sm:$0xff]  }
  0xb0   : > { %v4694_v41 = vld [vmem:[#allocation8 + $0x3a4] ss:$16 sps:$4 sm:$0xff]   ;;  %v4697_v43 = vld [vmem:[#allocation8 + $0x3a0] ss:$16 sps:$4 sm:$0xff]  }
  0xb1   : > { %1652 = vmatpush1.bf16.msra.mxu0 %v4666_v22  ;;  %v4698_v44 = vld [vmem:[#allocation8 + $0x184] ss:$16 sps:$4 sm:$0xff]   ;;  %v4702_v46 = vld [vmem:[#allocation8 + $0x180] ss:$16 sps:$4 sm:$0xff]  }
  0xb2   : > { %1705 = vmatpush1.bf16.msra.mxu1 %v4667_v23  ;;  %1653 = vmatprep.subr.bf16.mxu0 %v4668_v24  ;;  %v4700_v45 = vld [vmem:[#allocation8 + $0x384] ss:$16 sps:$4 sm:$0xff]   ;;  %v4703_v47 = vld [vmem:[#allocation8 + $0x380] ss:$16 sps:$4 sm:$0xff]   ;;  %v4762_v23 = vld [vmem:[#allocation8 + $0x8c] ss:$16 sps:$4 sm:$0xff]  }
  0xb3   : > { %1706 = vmatprep.subr.bf16.mxu1 %v4670_v25  ;;  %v5748_v48 = vld [vmem:[%s5729_s20 + $0x4] ss:$20 sps:$4 sm:$0xff]   ;;  %v5751_v51 = vld [vmem:[%s5729_s20 + $0xc] ss:$20 sps:$4 sm:$0xff]   ;;  %v5767_v13 = vld [vmem:[%s5729_s20 + $0x34] ss:$20 sps:$4 sm:$0xff]  }
  0xb4   : > { %v4704_v49 = vld [vmem:[#allocation8 + $0x164] ss:$16 sps:$4 sm:$0xff]   ;;  %1673 = vmatprep.mubr.bf16.mxu0 %v5748_v48  ;;  %v4708_v52 = vld [vmem:[#allocation8 + $0x160] ss:$16 sps:$4 sm:$0xff]   ;;  %1726 = vmatprep.mubr.bf16.mxu1 %v5751_v51  ;;  %v4760_v25 = vld [vmem:[#allocation8 + $0x88] ss:$16 sps:$4 sm:$0xff]  }
  0xb5   : > { %1654 = vmatpush1.bf16.msra.mxu0 %v4672_v26  ;;  %v4706_v50 = vld [vmem:[#allocation8 + $0x364] ss:$16 sps:$4 sm:$0xff]   ;;  %v4709_v53 = vld [vmem:[#allocation8 + $0x360] ss:$16 sps:$4 sm:$0xff]  }
  0xb6   : > { %1707 = vmatpush1.bf16.msra.mxu1 %v4673_v27  ;;  %1655 = vmatprep.subr.bf16.mxu0 %v4674_v28  ;;  %v4710_v54 = vld [vmem:[#allocation8 + $0x144] ss:$16 sps:$4 sm:$0xff]   ;;  %v4714_v56 = vld [vmem:[#allocation8 + $0x140] ss:$16 sps:$4 sm:$0xff]   ;;  %v4768_v27 = vld [vmem:[#allocation8 + $0x6c] ss:$16 sps:$4 sm:$0xff]  }
  0xb7   : > { %1708 = vmatprep.subr.bf16.mxu1 %v4676_v29  ;;  %v4712_v55 = vld [vmem:[#allocation8 + $0x344] ss:$16 sps:$4 sm:$0xff]   ;;  %v4715_v57 = vld [vmem:[#allocation8 + $0x340] ss:$16 sps:$4 sm:$0xff]   ;;  %v5474_v28 = vmov 0  }
  0xb8   : > { %v4716_v58 = vld [vmem:[#allocation8 + $0x124] ss:$16 sps:$4 sm:$0xff]   ;;  %v4720_v60 = vld [vmem:[#allocation8 + $0x120] ss:$16 sps:$4 sm:$0xff]  }
  0xb9   : > { %1656 = vmatpush1.bf16.msra.mxu0 %v4678_v30  ;;  %v4718_v59 = vld [vmem:[#allocation8 + $0x324] ss:$16 sps:$4 sm:$0xff]   ;;  %v4721_v61 = vld [vmem:[#allocation8 + $0x320] ss:$16 sps:$4 sm:$0xff]   ;;  %v4766_v30 = vld [vmem:[#allocation8 + $0x68] ss:$16 sps:$4 sm:$0xff]  }
  0xba   : > { %1709 = vmatpush1.bf16.msra.mxu1 %v4679_v31  ;;  %1657 = vmatprep.subr.bf16.mxu0 %v4680_v32  ;;  %v4722_v62 = vld [vmem:[#allocation8 + $0x104] ss:$16 sps:$4 sm:$0xff]   ;;  %v4726_v1 = vld [vmem:[#allocation8 + $0x100] ss:$16 sps:$4 sm:$0xff]   ;;  %v4774_v32 = vld [vmem:[#allocation8 + $0x4c] ss:$16 sps:$4 sm:$0xff]  }
  0xbb   : > { %1710 = vmatprep.subr.bf16.mxu1 %v4682_v33  ;;  %v4724_v63 = vld [vmem:[#allocation8 + $0x304] ss:$16 sps:$4 sm:$0xff]   ;;  %v4727_v2 = vld [vmem:[#allocation8 + $0x300] ss:$16 sps:$4 sm:$0xff]  }
  0xbc   : > { %v819_v0 = vld [vmem:[#allocation8 + $0x4a0] sm:$0xff] }
  0xbd   : > { %1658 = vmatpush2.bf16.msra.mxu0 %v4684_v34  ;;  %v4176_v3 = vcombine.high %v819_v0, %v819_v0  ;;  %v4175_v5 = vcombine.low %v819_v0, %v819_v0  ;;  %v5756_v6 = vld [vmem:[%s5729_s20] ss:$20 sps:$4 sm:$0xff]   ;;  %v5777_v20 = vld [vmem:[%s5729_s20 + $0x30] ss:$20 sps:$4 sm:$0xff]   ;;  %v4772_v34 = vld [vmem:[#allocation8 + $0x48] ss:$16 sps:$4 sm:$0xff]  }
  0xbe   : > { %1711 = vmatpush2.bf16.msra.mxu1 %v4685_v35  ;;  %1659 = vmatprep.subr.bf16.mxu0 %v4686_v36  ;;  %v4741_v9 = vld [vmem:[#allocation8 + $0x484] ss:$16 sps:$4 sm:$0xff]   ;;  %v5764_v12 = vld [vmem:[%s5729_s20 + $0x2c] ss:$20 sps:$4 sm:$0xff]   ;;  %v4813_v0 = vld [vmem:[#allocation8 + $0x168] ss:$16 sps:$4 sm:$0xff]  }
  0xbf   : > { %1712 = vmatprep.subr.bf16.mxu1 %v4688_v37  ;;  %v1630_v10 = vsel %vm1628_vm0, %v4175_v5, 0  ;;  %v4739_v14 = vld [vmem:[#allocation8 + $0x480] ss:$16 sps:$4 sm:$0xff]   ;;  %v4747_v16 = vld [vmem:[#allocation8 + $0x464] ss:$16 sps:$4 sm:$0xff]  }
  0xc0   : > { %v4745_v18 = vld [vmem:[#allocation8 + $0x460] ss:$16 sps:$4 sm:$0xff]   ;;  %v4759_v22 = vld [vmem:[#allocation8 + $0x444] ss:$16 sps:$4 sm:$0xff]   ;;  %v4778_v35 = vld [vmem:[#allocation8 + $0x2c] ss:$16 sps:$4 sm:$0xff]  }
  0xc1   : > { %1660 = vmatpush2.bf16.msra.mxu0 %v4690_v38  ;;  %v4757_v24 = vld [vmem:[#allocation8 + $0x440] ss:$16 sps:$4 sm:$0xff]   ;;  %v4765_v26 = vld [vmem:[#allocation8 + $0x424] ss:$16 sps:$4 sm:$0xff]   ;;  %v4781_v36 = vld [vmem:[#allocation8 + $0x2ec] ss:$16 sps:$4 sm:$0xff]  }
  0xc2   : > { %1713 = vmatpush2.bf16.msra.mxu1 %v4691_v39  ;;  %1661 = vmatprep.subr.bf16.mxu0 %v4692_v40  ;;  %v4763_v29 = vld [vmem:[#allocation8 + $0x420] ss:$16 sps:$4 sm:$0xff]   ;;  %v4771_v31 = vld [vmem:[#allocation8 + $0x404] ss:$16 sps:$4 sm:$0xff]   ;;  %v4776_v38 = vld [vmem:[#allocation8 + $0x28] ss:$16 sps:$4 sm:$0xff]  }
  0xc3   : > { %1714 = vmatprep.subr.bf16.mxu1 %v4694_v41  ;;  %v4769_v33 = vld [vmem:[#allocation8 + $0x400] ss:$16 sps:$4 sm:$0xff]   ;;  %v4779_v39 = vld [vmem:[#allocation8 + $0x2e8] ss:$16 sps:$4 sm:$0xff]   ;;  %v4784_v40 = vld [vmem:[#allocation8 + $0xc] ss:$16 sps:$4 sm:$0xff]  }
  0xc4   : > { %v5784_v37 = vld [vmem:[%s5729_s20 + $0x10] ss:$20 sps:$4 sm:$0xff]   ;;  %v4787_v41 = vld [vmem:[#allocation8 + $0x2cc] ss:$16 sps:$4 sm:$0xff]  }
  0xc5   : > { %1662 = vmatpush2.bf16.msra.mxu0 %v4696_v42  ;;  %v4782_v42 = vld [vmem:[#allocation8 + $0x8] ss:$16 sps:$4 sm:$0xff]   ;;  %v4827_v5 = vld [vmem:[#allocation8 + $0x12c] ss:$16 sps:$4 sm:$0xff]  }
  0xc6   : > { %1715 = vmatpush2.bf16.msra.mxu1 %v4697_v43  ;;  %1663 = vmatprep.subr.bf16.mxu0 %v4698_v44  ;;  %v4785_v43 = vld [vmem:[#allocation8 + $0x2c8] ss:$16 sps:$4 sm:$0xff]   ;;  %v4791_v44 = vld [vmem:[#allocation8 + $0x1ec] ss:$16 sps:$4 sm:$0xff]  }
  0xc7   : > { %1716 = vmatprep.subr.bf16.mxu1 %v4700_v45  ;;  %v4794_v45 = vld [vmem:[#allocation8 + $0x2ac] ss:$16 sps:$4 sm:$0xff]  }
  0xc9   : > { %1664 = vmatpush2.bf16.msra.mxu0 %v4702_v46  ;;  %v5790_v46 = vld [vmem:[%s5729_s20 + $0x38] ss:$20 sps:$4 sm:$0xff]  }
  0xca   : > { %1717 = vmatpush2.bf16.msra.mxu1 %v4703_v47  ;;  %1665 = vmatprep.subr.bf16.mxu0 %v4704_v49  ;;  %v4789_v47 = vld [vmem:[#allocation8 + $0x1e8] ss:$16 sps:$4 sm:$0xff]   ;;  %v4797_v49 = vld [vmem:[#allocation8 + $0x1cc] ss:$16 sps:$4 sm:$0xff]  }
  0xcb   : > { %1718 = vmatprep.subr.bf16.mxu1 %v4706_v50  ;;  %v4800_v50 = vld [vmem:[#allocation8 + $0x28c] ss:$16 sps:$4 sm:$0xff]  }
  0xcd   : > { %1666 = vmatpush2.bf16.msra.mxu0 %v4708_v52  ;;  %v4795_v52 = vld [vmem:[#allocation8 + $0x1c8] ss:$16 sps:$4 sm:$0xff]  }
  0xce   : > { %1719 = vmatpush2.bf16.msra.mxu1 %v4709_v53  ;;  %1667 = vmatprep.subr.bf16.mxu0 %v4710_v54  ;;  %v4798_v53 = vld [vmem:[#allocation8 + $0x288] ss:$16 sps:$4 sm:$0xff]   ;;  %v4803_v54 = vld [vmem:[#allocation8 + $0x1ac] ss:$16 sps:$4 sm:$0xff]  }
  0xcf   : > { %1720 = vmatprep.subr.bf16.mxu1 %v4712_v55  ;;  %v4806_v55 = vld [vmem:[#allocation8 + $0x26c] ss:$16 sps:$4 sm:$0xff]  }
  0xd1   : > { %1668 = vmatpush2.bf16.msra.mxu0 %v4714_v56  ;;  %v4801_v56 = vld [vmem:[#allocation8 + $0x1a8] ss:$16 sps:$4 sm:$0xff]  }
  0xd2   : > { %1721 = vmatpush2.bf16.msra.mxu1 %v4715_v57  ;;  %1669 = vmatprep.subr.bf16.mxu0 %v4716_v58  ;;  %v4804_v57 = vld [vmem:[#allocation8 + $0x268] ss:$16 sps:$4 sm:$0xff]   ;;  %v4809_v58 = vld [vmem:[#allocation8 + $0x18c] ss:$16 sps:$4 sm:$0xff]  }
  0xd3   : > { %1722 = vmatprep.subr.bf16.mxu1 %v4718_v59  ;;  %v4812_v59 = vld [vmem:[#allocation8 + $0x24c] ss:$16 sps:$4 sm:$0xff]  }
  0xd5   : > { %1670 = vmatpush2.bf16.msra.mxu0 %v4720_v60  ;;  %v4807_v60 = vld [vmem:[#allocation8 + $0x188] ss:$16 sps:$4 sm:$0xff]  }
  0xd6   : > { %1723 = vmatpush2.bf16.msra.mxu1 %v4721_v61  ;;  %1671 = vmatprep.subr.bf16.mxu0 %v4722_v62  ;;  %v4810_v61 = vld [vmem:[#allocation8 + $0x248] ss:$16 sps:$4 sm:$0xff]   ;;  %v4815_v62 = vld [vmem:[#allocation8 + $0x16c] ss:$16 sps:$4 sm:$0xff]  }
  0xd7   : > { %1724 = vmatprep.subr.bf16.mxu1 %v4724_v63  ;;  %v4818_v63 = vld [vmem:[#allocation8 + $0x22c] ss:$16 sps:$4 sm:$0xff]  }
  0xd9   : > { %1672 = vmatpush2.bf16.msra.mxu0 %v4726_v1  ;;  %v4816_v1 = vld [vmem:[#allocation8 + $0x228] ss:$16 sps:$4 sm:$0xff]  }
  0xda   : > { %1725 = vmatpush2.bf16.msra.mxu1 %v4727_v2  ;;  %4179 = vmatprep.subr.msk.bf16.mxu0 %vm1628_vm0, %v4176_v3  ;;  %v4824_v2 = vld [vmem:[#allocation8 + $0x20c] ss:$16 sps:$4 sm:$0xff]   ;;  %v4819_v3 = vld [vmem:[#allocation8 + $0x148] ss:$16 sps:$4 sm:$0xff]  }
  0xdb   : > { %1800 = vmatprep.subr.bf16.mxu1 %v4737_v4  ;;  %v4822_v4 = vld [vmem:[#allocation8 + $0x208] ss:$16 sps:$4 sm:$0xff]  }
  0xdc   : > { %1674 = vmatmul.mubr.bf16.vlgmr.msra.gmra.mxu0 %v5756_v6 }
  0xdd   : > { %1727 = vmatmul.mubr.bf16.vlgmr.msra.gmra.mxu1 %v5759_v7  ;;  %1752 = vmatpush1.bf16.msra.mxu0 %v1630_v10  ;;  %v4828_v10 = vld [vmem:[#allocation8 + $0x3e8] ss:$16 sps:$4 sm:$0xff]  }
  0xde   : > { %1801 = vmatpush1.bf16.msra.mxu1 %v4735_v8  ;;  %1753 = vmatprep.subr.bf16.mxu0 %v4741_v9  ;;  %v4830_v8 = vld [vmem:[#allocation8 + $0x3ec] ss:$16 sps:$4 sm:$0xff]   ;;  %v4825_v9 = vld [vmem:[#allocation8 + $0x128] ss:$16 sps:$4 sm:$0xff]  }
  0xdf   : > { %1802 = vmatprep.subr.bf16.mxu1 %v4744_v11  ;;  %1683 = vmatprep.mubr.bf16.mxu0 %v5764_v12  ;;  %v4833_v11 = vld [vmem:[#allocation8 + $0x10c] ss:$16 sps:$4 sm:$0xff]  }
  0xe0   : > { %1736 = vmatprep.mubr.bf16.mxu1 %v5767_v13 }
  0xe1   : > { %1754 = vmatpush1.bf16.msra.mxu0 %v4739_v14  ;;  %v4836_v14 = vld [vmem:[#allocation8 + $0x3cc] ss:$16 sps:$4 sm:$0xff]  }
  0xe2   : > { %1803 = vmatpush1.bf16.msra.mxu1 %v4742_v15  ;;  %1755 = vmatprep.subr.bf16.mxu0 %v4747_v16  ;;  %v820_v15 = vld [vmem:[#allocation8 + $0x4a8] sm:$0xff] }
  0xe3   : > { %1804 = vmatprep.subr.bf16.mxu1 %v4750_v17  ;;  %v4831_v16 = vld [vmem:[#allocation8 + $0x108] ss:$16 sps:$4 sm:$0xff]  }
  0xe4   : > { %1684 = vmatmul.mubr.bf16.gmra.mxu0 %v5774_v19  ;;  %v4834_v17 = vld [vmem:[#allocation8 + $0x3c8] ss:$16 sps:$4 sm:$0xff]  }
  0xe5   : > { %1737 = vmatmul.mubr.bf16.gmra.mxu1 %v5777_v20  ;;  %1756 = vmatpush1.bf16.msra.mxu0 %v4745_v18  ;;  %v4839_v18 = vld [vmem:[#allocation8 + $0x3ac] ss:$16 sps:$4 sm:$0xff]  }
  0xe6   : > { %1805 = vmatpush1.bf16.msra.mxu1 %v4748_v21  ;;  %1757 = vmatprep.subr.bf16.mxu0 %v4759_v22  ;;  %v4178_v21 = vcombine.high %v820_v15, %v820_v15  ;;  %v4177_v22 = vcombine.low %v820_v15, %v820_v15  ;;  %v4920_v15 = vld [vmem:[#allocation7 + $0x1e0] ss:$16 sps:$4 sm:$0xff]  }
  0xe7   : > { %1806 = vmatprep.subr.bf16.mxu1 %v4762_v23  ;;  %1779 = vmatprep.mubr.bf16.mxu0 %v5474_v28  ;;  %v4837_v23 = vld [vmem:[#allocation8 + $0x3a8] ss:$16 sps:$4 sm:$0xff]  }
  0xe8   : > { %1832 = vmatprep.mubr.bf16.mxu1 %v5748_v48  ;;  %v4792_v48 = vld [vmem:[#allocation8 + $0x2a8] ss:$16 sps:$4 sm:$0xff]  }
  0xe9   : > { %1758 = vmatpush1.bf16.msra.mxu0 %v4757_v24  ;;  %v4844_v24 = vld [vmem:[#allocation8 + $0x38c] ss:$16 sps:$4 sm:$0xff]  }
  0xea   : > { %1807 = vmatpush1.bf16.msra.mxu1 %v4760_v25  ;;  %1759 = vmatprep.subr.bf16.mxu0 %v4765_v26  ;;  %v1636_v25 = vsel %vm1628_vm0, %v4177_v22, 0  ;;  %v4847_v26 = vld [vmem:[#allocation8 + $0x48c] ss:$16 sps:$4 sm:$0xff]   ;;  %v4929_v22 = vld [vmem:[#allocation7 + $0x3c0] ss:$16 sps:$4 sm:$0xff]  }
  0xeb   : > { %1808 = vmatprep.subr.bf16.mxu1 %v4768_v27  ;;  %v4842_v27 = vld [vmem:[#allocation8 + $0x388] ss:$16 sps:$4 sm:$0xff]  }
  0xed   : > { %1760 = vmatpush1.bf16.msra.mxu0 %v4763_v29  ;;  %v4845_v29 = vld [vmem:[#allocation8 + $0x488] ss:$16 sps:$4 sm:$0xff]  }
  0xee   : > { %1809 = vmatpush1.bf16.msra.mxu1 %v4766_v30  ;;  %1761 = vmatprep.subr.bf16.mxu0 %v4771_v31  ;;  %v4850_v30 = vld [vmem:[#allocation8 + $0x36c] ss:$16 sps:$4 sm:$0xff]  }
  0xef   : > { %1810 = vmatprep.subr.bf16.mxu1 %v4774_v32  ;;  %v4853_v31 = vld [vmem:[#allocation8 + $0x46c] ss:$16 sps:$4 sm:$0xff]   ;;  %v4848_v32 = vld [vmem:[#allocation8 + $0x368] ss:$16 sps:$4 sm:$0xff]  }
  0xf1   : > { %1762 = vmatpush1.bf16.msra.mxu0 %v4769_v33  ;;  %v4851_v33 = vld [vmem:[#allocation8 + $0x468] ss:$16 sps:$4 sm:$0xff]  }
  0xf2   : > { %1811 = vmatpush1.bf16.msra.mxu1 %v4772_v34  ;;  %1853 = vmatprep.subr.bf16.mxu0 %v4781_v36  ;;  %v4856_v34 = vld [vmem:[#allocation8 + $0x34c] ss:$16 sps:$4 sm:$0xff]   ;;  %v4854_v36 = vld [vmem:[#allocation8 + $0x348] ss:$16 sps:$4 sm:$0xff]  }
  0xf3   : > { %1812 = vmatprep.subr.bf16.mxu1 %v4778_v35  ;;  %v4859_v35 = vld [vmem:[#allocation8 + $0x44c] ss:$16 sps:$4 sm:$0xff]  }
  0xf4   : > { %4180 = vmatmul.mubr.msk.bf16.vlgmr.msra.gmra.mxu0 %vm1621_vm1, %v5784_v37 }
  0xf5   : > { %1854 = vmatpush1.bf16.msra.mxu0 %v4779_v39  ;;  %1789 = vmatprep.mubr.bf16.mxu0 %v5474_v28  ;;  %v4865_v39 = vld [vmem:[#allocation8 + $0x42c] ss:$16 sps:$4 sm:$0xff]  }
  0xf6   : > { %1813 = vmatpush1.bf16.msra.mxu1 %v4776_v38  ;;  %1855 = vmatprep.subr.bf16.mxu0 %v4787_v41  ;;  %v4862_v38 = vld [vmem:[#allocation8 + $0x32c] ss:$16 sps:$4 sm:$0xff]  }
  0xf7   : > { %1814 = vmatprep.subr.bf16.mxu1 %v4784_v40  ;;  %v4863_v40 = vld [vmem:[#allocation8 + $0x428] ss:$16 sps:$4 sm:$0xff]   ;;  %v4868_v41 = vld [vmem:[#allocation8 + $0x30c] ss:$16 sps:$4 sm:$0xff]  }
  0xf9   : > { %1856 = vmatpush1.bf16.msra.mxu0 %v4785_v43  ;;  %v4866_v43 = vld [vmem:[#allocation8 + $0x308] ss:$16 sps:$4 sm:$0xff]  }
  0xfa   : > { %1815 = vmatpush1.bf16.msra.mxu1 %v4782_v42  ;;  %1857 = vmatprep.subr.bf16.mxu0 %v4794_v45  ;;  %v4871_v42 = vld [vmem:[#allocation8 + $0x40c] ss:$16 sps:$4 sm:$0xff]   ;;  %v4877_v45 = vld [vmem:[#allocation7 + $0x2e4] ss:$16 sps:$4 sm:$0xff]  }
  0xfb   : > { %1816 = vmatprep.subr.bf16.mxu1 %v4791_v44  ;;  %v4869_v44 = vld [vmem:[#allocation8 + $0x408] ss:$16 sps:$4 sm:$0xff]  }
  0xfc   : > { %4181 = vmatmul.mubr.msk.bf16.gmra.mxu0 %vm1621_vm1, %v5790_v46 }
  0xfd   : > { %1858 = vmatpush1.bf16.msra.mxu0 %v4792_v48  ;;  %1885 = vmatprep.mubr.bf16.mxu0 %v5751_v51  ;;  %v4821_v51 = vld [vmem:[#allocation8 + $0x14c] ss:$16 sps:$4 sm:$0xff]   ;;  %v4875_v48 = vld [vmem:[#allocation7 + $0x2e0] ss:$16 sps:$4 sm:$0xff]  }
  0xfe   : > { %1817 = vmatpush2.bf16.msra.mxu1 %v4789_v47  ;;  %1859 = vmatprep.subr.bf16.mxu0 %v4800_v50  ;;  %v4872_v47 = vld [vmem:[#allocation7 + $0xe0] ss:$16 sps:$4 sm:$0xff]   ;;  %v4883_v50 = vld [vmem:[#allocation7 + $0x2c4] ss:$16 sps:$4 sm:$0xff]  }
  0xff   : > { %1818 = vmatprep.subr.bf16.mxu1 %v4797_v49  ;;  %v4880_v49 = vld [vmem:[#allocation7 + $0xc4] ss:$16 sps:$4 sm:$0xff]  }
 0x101   : > { %1860 = vmatpush1.bf16.msra.mxu0 %v4798_v53  ;;  %v4881_v53 = vld [vmem:[#allocation7 + $0x2c0] ss:$16 sps:$4 sm:$0xff]  }
 0x102   : > { %1819 = vmatpush2.bf16.msra.mxu1 %v4795_v52  ;;  %1861 = vmatprep.subr.bf16.mxu0 %v4806_v55  ;;  %v4878_v52 = vld [vmem:[#allocation7 + $0xc0] ss:$16 sps:$4 sm:$0xff]   ;;  %v4889_v55 = vld [vmem:[#allocation7 + $0x2a4] ss:$16 sps:$4 sm:$0xff]  }
 0x103   : > { %1820 = vmatprep.subr.bf16.mxu1 %v4803_v54  ;;  %v4886_v54 = vld [vmem:[#allocation7 + $0xa4] ss:$16 sps:$4 sm:$0xff]  }
 0x105   : > { %1862 = vmatpush1.bf16.msra.mxu0 %v4804_v57  ;;  %v4887_v57 = vld [vmem:[#allocation7 + $0x2a0] ss:$16 sps:$4 sm:$0xff]  }
 0x106   : > { %1821 = vmatpush2.bf16.msra.mxu1 %v4801_v56  ;;  %1863 = vmatprep.subr.bf16.mxu0 %v4812_v59  ;;  %v4884_v56 = vld [vmem:[#allocation7 + $0xa0] ss:$16 sps:$4 sm:$0xff]   ;;  %v5810_v59 = vld [vmem:[%s5721_s29 + $0xc] ss:$24 sps:$4 sm:$0xff]  }
 0x107   : > { %1822 = vmatprep.subr.bf16.mxu1 %v4809_v58  ;;  %v5807_v58 = vld [vmem:[%s5721_s29 + $0x4] ss:$24 sps:$4 sm:$0xff]  }
 0x109   : > { %1864 = vmatpush1.bf16.msra.mxu0 %v4810_v61  ;;  %v4901_v61 = vld [vmem:[#allocation7 + $0x264] ss:$16 sps:$4 sm:$0xff]  }
 0x10a   : > { %1823 = vmatpush2.bf16.msra.mxu1 %v4807_v60  ;;  %1865 = vmatprep.subr.bf16.mxu0 %v4818_v63  ;;  %v4893_v60 = vld [vmem:[#allocation7 + $0x280] ss:$16 sps:$4 sm:$0xff]  }
 0x10b   : > { %1824 = vmatprep.subr.bf16.mxu1 %v4815_v62  ;;  %v4896_v62 = vld [vmem:[#allocation7 + $0x60] ss:$16 sps:$4 sm:$0xff]  }
 0x10c   : > { %v4899_v63 = vld [vmem:[#allocation7 + $0x260] ss:$16 sps:$4 sm:$0xff]  }
 0x10d   : > { %1866 = vmatpush1.bf16.msra.mxu0 %v4816_v1  ;;  %v4905_v1 = vld [vmem:[#allocation7 + $0x240] ss:$16 sps:$4 sm:$0xff]  }
 0x10e   : > { %1825 = vmatpush2.bf16.msra.mxu1 %v4813_v0  ;;  %1867 = vmatprep.subr.bf16.mxu0 %v4824_v2  ;;  %v4902_v0 = vld [vmem:[#allocation7 + $0x40] ss:$16 sps:$4 sm:$0xff]   ;;  %v4913_v2 = vld [vmem:[#allocation7 + $0x224] ss:$16 sps:$4 sm:$0xff]  }
 0x10f   : > { %1826 = vmatprep.subr.bf16.mxu1 %v4821_v51  ;;  %v4910_v51 = vld [vmem:[#allocation7 + $0x24] ss:$16 sps:$4 sm:$0xff]  }
 0x111   : > { %1868 = vmatpush1.bf16.msra.mxu0 %v4822_v4  ;;  %v4911_v4 = vld [vmem:[#allocation7 + $0x220] ss:$16 sps:$4 sm:$0xff]  }
 0x112   : > { %1827 = vmatpush2.bf16.msra.mxu1 %v4819_v3  ;;  %1869 = vmatprep.subr.bf16.mxu0 %v4830_v8  ;;  %v4908_v3 = vld [vmem:[#allocation7 + $0x20] ss:$16 sps:$4 sm:$0xff]   ;;  %v4919_v8 = vld [vmem:[#allocation7 + $0x204] ss:$16 sps:$4 sm:$0xff]  }
 0x113   : > { %1828 = vmatprep.subr.bf16.mxu1 %v4827_v5  ;;  %v4916_v5 = vld [vmem:[#allocation7 + $0x4] ss:$16 sps:$4 sm:$0xff]  }
 0x115   : > { %1870 = vmatpush2.bf16.msra.mxu0 %v4828_v10  ;;  %v4917_v10 = vld [vmem:[#allocation7 + $0x200] ss:$16 sps:$4 sm:$0xff]  }
 0x116   : > { %1829 = vmatpush2.bf16.msra.mxu1 %v4825_v9  ;;  %1871 = vmatprep.subr.bf16.mxu0 %v4836_v14  ;;  %v4914_v9 = vld [vmem:[#allocation7] ss:$16 sps:$4 sm:$0xff]   ;;  %v4925_v14 = vld [vmem:[#allocation7 + $0x3e4] ss:$16 sps:$4 sm:$0xff]  }
 0x117   : > { %1830 = vmatprep.subr.bf16.mxu1 %v4833_v11  ;;  %v4922_v11 = vld [vmem:[#allocation7 + $0x1e4] ss:$16 sps:$4 sm:$0xff]  }
 0x119   : > { %1872 = vmatpush2.bf16.msra.mxu0 %v4834_v17  ;;  %v4928_v17 = vld [vmem:[#allocation7 + $0x1c4] ss:$16 sps:$4 sm:$0xff]  }
 0x11a   : > { %1831 = vmatpush2.bf16.msra.mxu1 %v4831_v16  ;;  %1873 = vmatprep.subr.bf16.mxu0 %v4839_v18  ;;  %v4923_v16 = vld [vmem:[#allocation7 + $0x3e0] ss:$16 sps:$4 sm:$0xff]   ;;  %v4931_v18 = vld [vmem:[#allocation7 + $0x3c4] ss:$16 sps:$4 sm:$0xff]  }
 0x11b   : > { %4182 = vmatprep.subr.msk.bf16.mxu1 %vm1628_vm0, %v4178_v21  ;;  %v4926_v21 = vld [vmem:[#allocation7 + $0x1c0] ss:$16 sps:$4 sm:$0xff]  }
 0x11d   : > { %1833 = vmatmul.mubr.bf16.vlgmr.msra.gmra.mxu1 %v5756_v6  ;;  %1874 = vmatpush2.bf16.msra.mxu0 %v4837_v23  ;;  %v4857_v6 = vld [vmem:[#allocation8 + $0x448] ss:$16 sps:$4 sm:$0xff]   ;;  %v4934_v23 = vld [vmem:[#allocation7 + $0x1a4] ss:$16 sps:$4 sm:$0xff]  }
 0x11e   : > { %1911 = vmatpush1.bf16.msra.mxu1 %v1636_v25  ;;  %1875 = vmatprep.subr.bf16.mxu0 %v4844_v24  ;;  %v4937_v24 = vld [vmem:[#allocation7 + $0x3a4] ss:$16 sps:$4 sm:$0xff]   ;;  %v4932_v25 = vld [vmem:[#allocation7 + $0x1a0] ss:$16 sps:$4 sm:$0xff]  }
 0x11f   : > { %1912 = vmatprep.subr.bf16.mxu1 %v4847_v26  ;;  %1842 = vmatprep.mubr.bf16.mxu1 %v5764_v12  ;;  %v4860_v12 = vld [vmem:[#allocation8 + $0x328] ss:$16 sps:$4 sm:$0xff]   ;;  %v4935_v26 = vld [vmem:[#allocation7 + $0x3a0] ss:$16 sps:$4 sm:$0xff]  }
 0x121   : > { %1876 = vmatpush2.bf16.msra.mxu0 %v4842_v27  ;;  %v4940_v27 = vld [vmem:[#allocation7 + $0x184] ss:$16 sps:$4 sm:$0xff]  }
 0x122   : > { %1913 = vmatpush1.bf16.msra.mxu1 %v4845_v29  ;;  %1877 = vmatprep.subr.bf16.mxu0 %v4850_v30  ;;  %v4943_v29 = vld [vmem:[#allocation7 + $0x384] ss:$16 sps:$4 sm:$0xff]   ;;  %v4938_v30 = vld [vmem:[#allocation7 + $0x180] ss:$16 sps:$4 sm:$0xff]  }
 0x123   : > { %1914 = vmatprep.subr.bf16.mxu1 %v4853_v31  ;;  %v4941_v31 = vld [vmem:[#allocation7 + $0x380] ss:$16 sps:$4 sm:$0xff]  }
 0x125   : > { %1843 = vmatmul.mubr.bf16.gmra.mxu1 %v5774_v19  ;;  %1878 = vmatpush2.bf16.msra.mxu0 %v4848_v32  ;;  %v4874_v19 = vld [vmem:[#allocation7 + $0xe4] ss:$16 sps:$4 sm:$0xff]  }
 0x126   : > { %1915 = vmatpush1.bf16.msra.mxu1 %v4851_v33  ;;  %1879 = vmatprep.subr.bf16.mxu0 %v4856_v34  ;;  %v4946_v32 = vld [vmem:[#allocation7 + $0x164] ss:$16 sps:$4 sm:$0xff]   ;;  %v4944_v34 = vld [vmem:[#allocation7 + $0x160] ss:$16 sps:$4 sm:$0xff]  }
 0x127   : > { %1916 = vmatprep.subr.bf16.mxu1 %v4859_v35  ;;  %1938 = vmatprep.mubr.bf16.mxu1 %v5474_v28  ;;  %v4949_v33 = vld [vmem:[#allocation7 + $0x364] ss:$16 sps:$4 sm:$0xff]   ;;  %v4947_v35 = vld [vmem:[#allocation7 + $0x360] ss:$16 sps:$4 sm:$0xff]  }
 0x129   : > { %1880 = vmatpush2.bf16.msra.mxu0 %v4854_v36  ;;  %v4952_v36 = vld [vmem:[#allocation7 + $0x144] ss:$16 sps:$4 sm:$0xff]  }
 0x12a   : > { %1917 = vmatpush1.bf16.msra.mxu1 %v4857_v6  ;;  %1881 = vmatprep.subr.bf16.mxu0 %v4862_v38  ;;  %v4955_v6 = vld [vmem:[#allocation7 + $0x344] ss:$16 sps:$4 sm:$0xff]   ;;  %v4950_v38 = vld [vmem:[#allocation7 + $0x140] ss:$16 sps:$4 sm:$0xff]  }
 0x12b   : > { %1918 = vmatprep.subr.bf16.mxu1 %v4865_v39  ;;  %v4953_v39 = vld [vmem:[#allocation7 + $0x340] ss:$16 sps:$4 sm:$0xff]  }
 0x12d   : > { %1882 = vmatpush2.bf16.msra.mxu0 %v4860_v12  ;;  %v4958_v12 = vld [vmem:[#allocation7 + $0x124] ss:$16 sps:$4 sm:$0xff]  }
 0x12e   : > { %1919 = vmatpush1.bf16.msra.mxu1 %v4863_v40  ;;  %1883 = vmatprep.subr.bf16.mxu0 %v4868_v41  ;;  %v4961_v40 = vld [vmem:[#allocation7 + $0x324] ss:$16 sps:$4 sm:$0xff]   ;;  %v4956_v41 = vld [vmem:[#allocation7 + $0x120] ss:$16 sps:$4 sm:$0xff]  }
 0x12f   : > { %1920 = vmatprep.subr.bf16.mxu1 %v4871_v42  ;;  %v4959_v42 = vld [vmem:[#allocation7 + $0x320] ss:$16 sps:$4 sm:$0xff]  }
 0x131   : > { %1884 = vmatpush2.bf16.msra.mxu0 %v4866_v43  ;;  %v4964_v43 = vld [vmem:[#allocation7 + $0x104] ss:$16 sps:$4 sm:$0xff]  }
 0x132   : > { %1921 = vmatpush1.bf16.msra.mxu1 %v4869_v44  ;;  %2979 = vmatprep.subr.bf16.mxu0 %v4874_v19  ;;  %v4967_v44 = vld [vmem:[#allocation7 + $0x304] ss:$16 sps:$4 sm:$0xff]   ;;  %v4962_v19 = vld [vmem:[#allocation7 + $0x100] ss:$16 sps:$4 sm:$0xff]  }
 0x133   : > { %3032 = vmatprep.subr.bf16.mxu1 %v4877_v45  ;;  %v4965_v45 = vld [vmem:[#allocation7 + $0x300] ss:$16 sps:$4 sm:$0xff]  }
 0x134   : > { %1886 = vmatmul.mubr.bf16.vlgmr.msra.gmra.mxu0 %v5759_v7  ;;  %v4892_v7 = vld [vmem:[#allocation7 + $0x84] ss:$16 sps:$4 sm:$0xff]  }
 0x135   : > { %4183 = vmatmul.mubr.msk.bf16.vlgmr.msra.gmra.mxu1 %vm1621_vm1, %v5784_v37  ;;  %2980 = vmatpush1.bf16.msra.mxu0 %v4872_v47  ;;  %v4895_v37 = vld [vmem:[#allocation7 + $0x284] ss:$16 sps:$4 sm:$0xff]  }
 0x136   : > { %3033 = vmatpush1.bf16.msra.mxu1 %v4875_v48  ;;  %2981 = vmatprep.subr.bf16.mxu0 %v4880_v49  ;;  %v4976_v47 = vld [vmem:[#allocation7 + $0x4e4] ss:$16 sps:$4 sm:$0xff]   ;;  %v4979_v48 = vld [vmem:[#allocation7 + $0xec] ss:$16 sps:$4 sm:$0xff]   ;;  %v5818_v49 = vld [vmem:[%s5721_s29] ss:$24 sps:$4 sm:$0xff]  }
 0x137   : > { %3034 = vmatprep.subr.bf16.mxu1 %v4883_v50  ;;  %1895 = vmatprep.mubr.bf16.mxu0 %v5767_v13  ;;  %v4890_v13 = vld [vmem:[#allocation7 + $0x80] ss:$16 sps:$4 sm:$0xff]  }
 0x138   : > { %1948 = vmatprep.mubr.bf16.mxu1 %v5474_v28  ;;  %v4898_v28 = vld [vmem:[#allocation7 + $0x64] ss:$16 sps:$4 sm:$0xff]   ;;  %v5821_v50 = vld [vmem:[%s5721_s29 + $0x8] ss:$24 sps:$4 sm:$0xff]  }
 0x139   : > { %2982 = vmatpush1.bf16.msra.mxu0 %v4878_v52  ;;  %v4974_v52 = vld [vmem:[#allocation7 + $0x4e0] ss:$16 sps:$4 sm:$0xff]  }
 0x13a   : > { %3035 = vmatpush1.bf16.msra.mxu1 %v4881_v53  ;;  %2983 = vmatprep.subr.bf16.mxu0 %v4886_v54  ;;  %v4977_v53 = vld [vmem:[#allocation7 + $0xe8] ss:$16 sps:$4 sm:$0xff]   ;;  %v4982_v54 = vld [vmem:[#allocation7 + $0x4c4] ss:$16 sps:$4 sm:$0xff]  }
 0x13b   : > { %3036 = vmatprep.subr.bf16.mxu1 %v4889_v55  ;;  %v4985_v55 = vld [vmem:[#allocation7 + $0xcc] ss:$16 sps:$4 sm:$0xff]  }
 0x13c   : > { %1896 = vmatmul.mubr.bf16.gmra.mxu0 %v5777_v20  ;;  %v4904_v20 = vld [vmem:[#allocation7 + $0x44] ss:$16 sps:$4 sm:$0xff]  }
 0x13d   : > { %4184 = vmatmul.mubr.msk.bf16.gmra.mxu1 %vm1621_vm1, %v5790_v46  ;;  %2984 = vmatpush1.bf16.msra.mxu0 %v4884_v56  ;;  %v4907_v46 = vld [vmem:[#allocation7 + $0x244] ss:$16 sps:$4 sm:$0xff]  }
 0x13e   : > { %3037 = vmatpush1.bf16.msra.mxu1 %v4887_v57  ;;  %2985 = vmatprep.subr.bf16.mxu0 %v4892_v7  ;;  %v5824_v56 = vld [vmem:[%s5721_s29 + $0x34] ss:$24 sps:$4 sm:$0xff]   ;;  %v4980_v7 = vld [vmem:[#allocation7 + $0x4c0] ss:$16 sps:$4 sm:$0xff]  }
 0x13f   : > { %3038 = vmatprep.subr.bf16.mxu1 %v4895_v37  ;;  %3011 = vmatprep.mubr.bf16.mxu0 %v5807_v58  ;;  %v5827_v57 = vld [vmem:[%s5721_s29 + $0x3c] ss:$24 sps:$4 sm:$0xff]   ;;  %v4983_v37 = vld [vmem:[#allocation7 + $0xc8] ss:$16 sps:$4 sm:$0xff]  }
 0x140   : > { %3064 = vmatprep.mubr.bf16.mxu1 %v5810_v59 }
 0x141   : > { %2986 = vmatpush1.bf16.msra.mxu0 %v4890_v13  ;;  %v4991_v13 = vld [vmem:[#allocation7 + $0x4a4] ss:$16 sps:$4 sm:$0xff]  }
 0x142   : > { %3039 = vmatpush1.bf16.msra.mxu1 %v4893_v60  ;;  %2987 = vmatprep.subr.bf16.mxu0 %v4898_v28  ;;  %v4994_v60 = vld [vmem:[#allocation7 + $0xac] ss:$16 sps:$4 sm:$0xff]   ;;  %v5833_v28 = vld [vmem:[%s5721_s29 + $0x30] ss:$24 sps:$4 sm:$0xff]  }
 0x143   : > { %3040 = vmatprep.subr.bf16.mxu1 %v4901_v61  ;;  %v4989_v61 = vld [vmem:[#allocation7 + $0x4a0] ss:$16 sps:$4 sm:$0xff]  }
 0x145   : > { %2988 = vmatpush1.bf16.msra.mxu0 %v4896_v62  ;;  %v4992_v62 = vld [vmem:[#allocation7 + $0xa8] ss:$16 sps:$4 sm:$0xff]  }
 0x146   : > { %3041 = vmatpush1.bf16.msra.mxu1 %v4899_v63  ;;  %2989 = vmatprep.subr.bf16.mxu0 %v4904_v20  ;;  %v5837_v63 = vld [vmem:[%s5721_s29 + $0x38] ss:$24 sps:$4 sm:$0xff]   ;;  %v5000_v20 = vld [vmem:[#allocation7 + $0x484] ss:$16 sps:$4 sm:$0xff]  }
 0x147   : > { %3042 = vmatprep.subr.bf16.mxu1 %v4907_v46  ;;  %v5003_v46 = vld [vmem:[#allocation7 + $0x8c] ss:$16 sps:$4 sm:$0xff]  }
 0x149   : > { %2990 = vmatpush1.bf16.msra.mxu0 %v4902_v0  ;;  %v5840_v0 = vld [vmem:[%s5721_s29 + $0x14] ss:$24 sps:$4 sm:$0xff]  }
 0x14a   : > { %3043 = vmatpush1.bf16.msra.mxu1 %v4905_v1  ;;  %2991 = vmatprep.subr.bf16.mxu0 %v4910_v51  ;;  %v4998_v1 = vld [vmem:[#allocation7 + $0x480] ss:$16 sps:$4 sm:$0xff]   ;;  %v5001_v51 = vld [vmem:[#allocation7 + $0x88] ss:$16 sps:$4 sm:$0xff]  }
 0x14b   : > { %3044 = vmatprep.subr.bf16.mxu1 %v4913_v2  ;;  %v5006_v2 = vld [vmem:[#allocation7 + $0x464] ss:$16 sps:$4 sm:$0xff]  }
 0x14d   : > { %2992 = vmatpush1.bf16.msra.mxu0 %v4908_v3  ;;  %v5009_v3 = vld [vmem:[#allocation7 + $0x6c] ss:$16 sps:$4 sm:$0xff]  }
 0x14e   : > { %3045 = vmatpush1.bf16.msra.mxu1 %v4911_v4  ;;  %2993 = vmatprep.subr.bf16.mxu0 %v4916_v5  ;;  %v5004_v4 = vld [vmem:[#allocation7 + $0x460] ss:$16 sps:$4 sm:$0xff]   ;;  %v5007_v5 = vld [vmem:[#allocation7 + $0x68] ss:$16 sps:$4 sm:$0xff]  }
 0x14f   : > { %3046 = vmatprep.subr.bf16.mxu1 %v4919_v8  ;;  %v5012_v8 = vld [vmem:[#allocation7 + $0x444] ss:$16 sps:$4 sm:$0xff]  }
 0x151   : > { %2994 = vmatpush1.bf16.msra.mxu0 %v4914_v9  ;;  %v5015_v9 = vld [vmem:[#allocation7 + $0x4c] ss:$16 sps:$4 sm:$0xff]  }
 0x152   : > { %3047 = vmatpush1.bf16.msra.mxu1 %v4917_v10  ;;  %2995 = vmatprep.subr.bf16.mxu0 %v4922_v11  ;;  %v5010_v10 = vld [vmem:[#allocation7 + $0x440] ss:$16 sps:$4 sm:$0xff]   ;;  %v5013_v11 = vld [vmem:[#allocation7 + $0x48] ss:$16 sps:$4 sm:$0xff]  }
 0x153   : > { %3048 = vmatprep.subr.bf16.mxu1 %v4925_v14  ;;  %v5018_v14 = vld [vmem:[#allocation7 + $0x424] ss:$16 sps:$4 sm:$0xff]  }
 0x155   : > { %2996 = vmatpush2.bf16.msra.mxu0 %v4920_v15  ;;  %v5021_v15 = vld [vmem:[#allocation7 + $0x2c] ss:$16 sps:$4 sm:$0xff]  }
 0x156   : > { %3049 = vmatpush2.bf16.msra.mxu1 %v4923_v16  ;;  %2997 = vmatprep.subr.bf16.mxu0 %v4928_v17  ;;  %v5016_v16 = vld [vmem:[#allocation7 + $0x420] ss:$16 sps:$4 sm:$0xff]   ;;  %v5019_v17 = vld [vmem:[#allocation7 + $0x28] ss:$16 sps:$4 sm:$0xff]  }
 0x157   : > { %3050 = vmatprep.subr.bf16.mxu1 %v4931_v18  ;;  %v5027_v18 = vld [vmem:[#allocation7 + $0xc] ss:$16 sps:$4 sm:$0xff]  }
 0x159   : > { %2998 = vmatpush2.bf16.msra.mxu0 %v4926_v21  ;;  %v5022_v21 = vld [vmem:[#allocation7 + $0x400] ss:$16 sps:$4 sm:$0xff]  }
 0x15a   : > { %3051 = vmatpush2.bf16.msra.mxu1 %v4929_v22  ;;  %2999 = vmatprep.subr.bf16.mxu0 %v4934_v23  ;;  %v5025_v22 = vld [vmem:[#allocation7 + $0x8] ss:$16 sps:$4 sm:$0xff]   ;;  %v5030_v23 = vld [vmem:[#allocation7 + $0x5e4] ss:$16 sps:$4 sm:$0xff]  }
 0x15b   : > { %3052 = vmatprep.subr.bf16.mxu1 %v4937_v24  ;;  %v5033_v24 = vld [vmem:[#allocation7 + $0x1ec] ss:$16 sps:$4 sm:$0xff]  }
 0x15d   : > { %3000 = vmatpush2.bf16.msra.mxu0 %v4932_v25  ;;  %v5028_v25 = vld [vmem:[#allocation7 + $0x5e0] ss:$16 sps:$4 sm:$0xff]  }
 0x15e   : > { %3053 = vmatpush2.bf16.msra.mxu1 %v4935_v26  ;;  %3001 = vmatprep.subr.bf16.mxu0 %v4940_v27  ;;  %v5031_v26 = vld [vmem:[#allocation7 + $0x1e8] ss:$16 sps:$4 sm:$0xff]   ;;  %v5036_v27 = vld [vmem:[#allocation7 + $0x5c4] ss:$16 sps:$4 sm:$0xff]  }
 0x15f   : > { %3054 = vmatprep.subr.bf16.mxu1 %v4943_v29  ;;  %v5039_v29 = vld [vmem:[#allocation7 + $0x1cc] ss:$16 sps:$4 sm:$0xff]  }
 0x161   : > { %3002 = vmatpush2.bf16.msra.mxu0 %v4938_v30  ;;  %v5034_v30 = vld [vmem:[#allocation7 + $0x5c0] ss:$16 sps:$4 sm:$0xff]  }
 0x162   : > { %3055 = vmatpush2.bf16.msra.mxu1 %v4941_v31  ;;  %3003 = vmatprep.subr.bf16.mxu0 %v4946_v32  ;;  %v5037_v31 = vld [vmem:[#allocation7 + $0x1c8] ss:$16 sps:$4 sm:$0xff]   ;;  %v5042_v32 = vld [vmem:[#allocation7 + $0x5a4] ss:$16 sps:$4 sm:$0xff]  }
 0x163   : > { %3056 = vmatprep.subr.bf16.mxu1 %v4949_v33  ;;  %v5045_v33 = vld [vmem:[#allocation7 + $0x1ac] ss:$16 sps:$4 sm:$0xff]  }
 0x165   : > { %3004 = vmatpush2.bf16.msra.mxu0 %v4944_v34  ;;  %v5040_v34 = vld [vmem:[#allocation7 + $0x5a0] ss:$16 sps:$4 sm:$0xff]  }
 0x166   : > { %3057 = vmatpush2.bf16.msra.mxu1 %v4947_v35  ;;  %3005 = vmatprep.subr.bf16.mxu0 %v4952_v36  ;;  %v5043_v35 = vld [vmem:[#allocation7 + $0x1a8] ss:$16 sps:$4 sm:$0xff]   ;;  %v5048_v36 = vld [vmem:[#allocation7 + $0x584] ss:$16 sps:$4 sm:$0xff]  }
 0x167   : > { %3058 = vmatprep.subr.bf16.mxu1 %v4955_v6  ;;  %v5051_v6 = vld [vmem:[#allocation7 + $0x18c] ss:$16 sps:$4 sm:$0xff]  }
 0x169   : > { %3006 = vmatpush2.bf16.msra.mxu0 %v4950_v38  ;;  %v5046_v38 = vld [vmem:[#allocation7 + $0x580] ss:$16 sps:$4 sm:$0xff]  }
 0x16a   : > { %3059 = vmatpush2.bf16.msra.mxu1 %v4953_v39  ;;  %3007 = vmatprep.subr.bf16.mxu0 %v4958_v12  ;;  %v5049_v39 = vld [vmem:[#allocation7 + $0x188] ss:$16 sps:$4 sm:$0xff]   ;;  %v5054_v12 = vld [vmem:[#allocation7 + $0x564] ss:$16 sps:$4 sm:$0xff]  }
 0x16b   : > { %3060 = vmatprep.subr.bf16.mxu1 %v4961_v40  ;;  %v5057_v40 = vld [vmem:[#allocation7 + $0x16c] ss:$16 sps:$4 sm:$0xff]  }
 0x16d   : > { %3008 = vmatpush2.bf16.msra.mxu0 %v4956_v41  ;;  %v5052_v41 = vld [vmem:[#allocation7 + $0x560] ss:$16 sps:$4 sm:$0xff]  }
 0x16e   : > { %3061 = vmatpush2.bf16.msra.mxu1 %v4959_v42  ;;  %3009 = vmatprep.subr.bf16.mxu0 %v4964_v43  ;;  %v5055_v42 = vld [vmem:[#allocation7 + $0x168] ss:$16 sps:$4 sm:$0xff]   ;;  %v5060_v43 = vld [vmem:[#allocation7 + $0x544] ss:$16 sps:$4 sm:$0xff]  }
 0x16f   : > { %3062 = vmatprep.subr.bf16.mxu1 %v4967_v44  ;;  %v5063_v44 = vld [vmem:[#allocation7 + $0x14c] ss:$16 sps:$4 sm:$0xff]  }
 0x171   : > { %3010 = vmatpush2.bf16.msra.mxu0 %v4962_v19  ;;  %v5058_v19 = vld [vmem:[#allocation7 + $0x540] ss:$16 sps:$4 sm:$0xff]  }
 0x172   : > { %3063 = vmatpush2.bf16.msra.mxu1 %v4965_v45  ;;  %3085 = vmatprep.subr.bf16.mxu0 %v4976_v47  ;;  %v5061_v45 = vld [vmem:[#allocation7 + $0x148] ss:$16 sps:$4 sm:$0xff]   ;;  %v5066_v47 = vld [vmem:[#allocation7 + $0x524] ss:$16 sps:$4 sm:$0xff]  }
 0x173   : > { %3138 = vmatprep.subr.bf16.mxu1 %v4979_v48  ;;  %v5069_v48 = vld [vmem:[#allocation7 + $0x12c] ss:$16 sps:$4 sm:$0xff]  }
 0x174   : > { %3012 = vmatmul.mubr.bf16.vlgmr.msra.gmra.mxu0 %v5818_v49 }
 0x175   : > { %3065 = vmatmul.mubr.bf16.vlgmr.msra.gmra.mxu1 %v5821_v50  ;;  %3086 = vmatpush1.bf16.msra.mxu0 %v4974_v52  ;;  %v5064_v52 = vld [vmem:[#allocation7 + $0x520] ss:$16 sps:$4 sm:$0xff]  }
 0x176   : > { %3139 = vmatpush1.bf16.msra.mxu1 %v4977_v53  ;;  %3087 = vmatprep.subr.bf16.mxu0 %v4982_v54  ;;  %v5067_v53 = vld [vmem:[#allocation7 + $0x128] ss:$16 sps:$4 sm:$0xff]   ;;  %v5072_v54 = vld [vmem:[#allocation7 + $0x504] ss:$16 sps:$4 sm:$0xff]  }
 0x177   : > { %3140 = vmatprep.subr.bf16.mxu1 %v4985_v55  ;;  %3021 = vmatprep.mubr.bf16.mxu0 %v5824_v56  ;;  %v5075_v55 = vld [vmem:[#allocation7 + $0x10c] ss:$16 sps:$4 sm:$0xff]  }
 0x178   : > { %3074 = vmatprep.mubr.bf16.mxu1 %v5827_v57 }
 0x179   : > { %3088 = vmatpush1.bf16.msra.mxu0 %v4980_v7  ;;  %v5070_v7 = vld [vmem:[#allocation7 + $0x500] ss:$16 sps:$4 sm:$0xff]  }
 0x17a   : > { %3141 = vmatpush1.bf16.msra.mxu1 %v4983_v37  ;;  %3089 = vmatprep.subr.bf16.mxu0 %v4991_v13  ;;  %v5073_v37 = vld [vmem:[#allocation7 + $0x108] ss:$16 sps:$4 sm:$0xff]   ;;  %v5081_v13 = vld [vmem:[#allocation7 + $0x2ec] ss:$16 sps:$4 sm:$0xff]  }
 0x17b   : > { %3142 = vmatprep.subr.bf16.mxu1 %v4994_v60  ;;  %v5084_v60 = vld [vmem:[#allocation7 + $0x4ec] ss:$16 sps:$4 sm:$0xff]  }
 0x17c   : > { %3022 = vmatmul.mubr.bf16.gmra.mxu0 %v5833_v28 }
 0x17d   : > { %3075 = vmatmul.mubr.bf16.gmra.mxu1 %v5837_v63  ;;  %3090 = vmatpush1.bf16.msra.mxu0 %v4989_v61  ;;  %v5847_v61 = vld [vmem:[%s5721_s29 + $0x10] ss:$24 sps:$4 sm:$0xff]  }
 0x17e   : > { %3143 = vmatpush1.bf16.msra.mxu1 %v4992_v62  ;;  %3091 = vmatprep.subr.bf16.mxu0 %v5000_v20  ;;  %v5079_v62 = vld [vmem:[#allocation7 + $0x2e8] ss:$16 sps:$4 sm:$0xff]  }
 0x17f   : > { %3144 = vmatprep.subr.bf16.mxu1 %v5003_v46  ;;  %3117 = vmatprep.mubr.bf16.mxu0 %v5840_v0  ;;  %v5082_v20 = vld [vmem:[#allocation7 + $0x4e8] ss:$16 sps:$4 sm:$0xff]   ;;  %v5087_v46 = vld [vmem:[#allocation7 + $0x2cc] ss:$16 sps:$4 sm:$0xff]  }
 0x180   : > { %3170 = vmatprep.mubr.bf16.mxu1 %v5807_v58  ;;  %v5024_v58 = vld [vmem:[#allocation7 + $0x404] ss:$16 sps:$4 sm:$0xff]  }
 0x181   : > { %3092 = vmatpush1.bf16.msra.mxu0 %v4998_v1  ;;  %v5090_v1 = vld [vmem:[#allocation7 + $0x4cc] ss:$16 sps:$4 sm:$0xff]  }
 0x182   : > { %3145 = vmatpush1.bf16.msra.mxu1 %v5001_v51  ;;  %3093 = vmatprep.subr.bf16.mxu0 %v5006_v2  ;;  %v5850_v51 = vld [vmem:[%s5721_s29 + $0x44] ss:$24 sps:$4 sm:$0xff]   ;;  %v5085_v2 = vld [vmem:[#allocation7 + $0x2c8] ss:$16 sps:$4 sm:$0xff]  }
 0x183   : > { %3146 = vmatprep.subr.bf16.mxu1 %v5009_v3  ;;  %v5088_v3 = vld [vmem:[#allocation7 + $0x4c8] ss:$16 sps:$4 sm:$0xff]  }
 0x185   : > { %3094 = vmatpush1.bf16.msra.mxu0 %v5004_v4  ;;  %v5096_v4 = vld [vmem:[#allocation7 + $0x2ac] ss:$16 sps:$4 sm:$0xff]  }
 0x186   : > { %3147 = vmatpush1.bf16.msra.mxu1 %v5007_v5  ;;  %3095 = vmatprep.subr.bf16.mxu0 %v5012_v8  ;;  %v5099_v5 = vld [vmem:[#allocation7 + $0x4ac] ss:$16 sps:$4 sm:$0xff]   ;;  %v5857_v8 = vld [vmem:[%s5721_s29 + $0x40] ss:$24 sps:$4 sm:$0xff]   ;;  %s3851_s29 = scalar_lea.sflag [#allocation4], %s5717_s23 }
 0x187   : > { %3148 = vmatprep.subr.bf16.mxu1 %v5015_v9  ;;  %v5094_v9 = vld [vmem:[#allocation7 + $0x2a8] ss:$16 sps:$4 sm:$0xff]  }
 0x189   : > { %3096 = vmatpush1.bf16.msra.mxu0 %v5010_v10  ;;  %v5097_v10 = vld [vmem:[#allocation7 + $0x4a8] ss:$16 sps:$4 sm:$0xff]  }
 0x18a   : > { %3149 = vmatpush1.bf16.msra.mxu1 %v5013_v11  ;;  %3097 = vmatprep.subr.bf16.mxu0 %v5018_v14  ;;  %v5105_v14 = vld [vmem:[#allocation7 + $0x48c] ss:$16 sps:$4 sm:$0xff]  }
 0x18b   : > { %3150 = vmatprep.subr.bf16.mxu1 %v5021_v15  ;;  %v5100_v15 = vld [vmem:[#allocation7 + $0x288] ss:$16 sps:$4 sm:$0xff]  }
 0x18d   : > { %3098 = vmatpush1.bf16.msra.mxu0 %v5016_v16 }
 0x18e   : > { %3151 = vmatpush1.bf16.msra.mxu1 %v5019_v17  ;;  %3099 = vmatprep.subr.bf16.mxu0 %v5024_v58  ;;  %v5108_v17 = vld [vmem:[#allocation7 + $0x26c] ss:$16 sps:$4 sm:$0xff]  }
 0x18f   : > { %3152 = vmatprep.subr.bf16.mxu1 %v5027_v18  ;;  %v5111_v58 = vld [vmem:[#allocation7 + $0x46c] ss:$16 sps:$4 sm:$0xff]  }
 0x191   : > { %3100 = vmatpush1.bf16.msra.mxu0 %v5022_v21  ;;  %v5106_v21 = vld [vmem:[#allocation7 + $0x268] ss:$16 sps:$4 sm:$0xff]  }
 0x192   : > { %3153 = vmatpush1.bf16.msra.mxu1 %v5025_v22  ;;  %3101 = vmatprep.subr.bf16.mxu0 %v5030_v23  ;;  %v5114_v23 = vld [vmem:[#allocation7 + $0x24c] ss:$16 sps:$4 sm:$0xff]  }
 0x193   : > { %3154 = vmatprep.subr.bf16.mxu1 %v5033_v24  ;;  %v5117_v24 = vld [vmem:[#allocation7 + $0x44c] ss:$16 sps:$4 sm:$0xff]  }
 0x195   : > { %3102 = vmatpush2.bf16.msra.mxu0 %v5028_v25 }
 0x196   : > { %3155 = vmatpush2.bf16.msra.mxu1 %v5031_v26  ;;  %3103 = vmatprep.subr.bf16.mxu0 %v5036_v27  ;;  %v5112_v26 = vld [vmem:[#allocation7 + $0x248] ss:$16 sps:$4 sm:$0xff]  }
 0x197   : > { %3156 = vmatprep.subr.bf16.mxu1 %v5039_v29  ;;  %v5123_v29 = vld [vmem:[#allocation7 + $0x42c] ss:$16 sps:$4 sm:$0xff]  }
 0x199   : > { %3104 = vmatpush2.bf16.msra.mxu0 %v5034_v30 }
 0x19a   : > { %3157 = vmatpush2.bf16.msra.mxu1 %v5037_v31  ;;  %3105 = vmatprep.subr.bf16.mxu0 %v5042_v32  ;;  %v5118_v32 = vld [vmem:[#allocation7 + $0x228] ss:$16 sps:$4 sm:$0xff]  }
 0x19b   : > { %3158 = vmatprep.subr.bf16.mxu1 %v5045_v33  ;;  %v5121_v33 = vld [vmem:[#allocation7 + $0x428] ss:$16 sps:$4 sm:$0xff]  }
 0x19c   : > { %v5859_v11 = vpop.f32.mrf.mxu0 }
 0x19d   : > { %3106 = vmatpush2.bf16.msra.mxu0 %v5040_v34  ;;  %v5867_v18 = vpop.f32.mrf.mxu1  ;;  %v5126_v34 = vld [vmem:[#allocation7 + $0x20c] ss:$16 sps:$4 sm:$0xff]  }
 0x19e   : > { %3159 = vmatpush2.bf16.msra.mxu1 %v5043_v35  ;;  %3107 = vmatprep.subr.bf16.mxu0 %v5048_v36  ;;  %v5863_v16 = vpop.f32.mrf.mxu0  ;;  %v5129_v35 = vld [vmem:[#allocation7 + $0x40c] ss:$16 sps:$4 sm:$0xff]  }
 0x19f   : > { %3160 = vmatprep.subr.bf16.mxu1 %v5051_v6  ;;  %v5871_v25 = vpop.f32.mrf.mxu1 }
 0x1a0   : > { %v5869_v22 = vpop.f32.mrf.mxu0 }
 0x1a1   : > { %3108 = vmatpush2.bf16.msra.mxu0 %v5046_v38  ;;  %v5875_v30 = vpop.f32.mrf.mxu1  ;;  %v5124_v38 = vld [vmem:[#allocation7 + $0x208] ss:$16 sps:$4 sm:$0xff]  }
 0x1a2   : > { %3161 = vmatpush2.bf16.msra.mxu1 %v5049_v39  ;;  %3109 = vmatprep.subr.bf16.mxu0 %v5054_v12  ;;  %v5873_v27 = vpop.f32.mrf.mxu0  ;;  %v5127_v39 = vld [vmem:[#allocation7 + $0x408] ss:$16 sps:$4 sm:$0xff]  }
 0x1a3   : > { %3162 = vmatprep.subr.bf16.mxu1 %v5057_v40  ;;  %v5879_v36 = vpop.f32.mrf.mxu1  ;;  %v5132_v40 = vld [vmem:[#allocation7 + $0x3ec] ss:$16 sps:$4 sm:$0xff]  }
 0x1a4   : > { %v5877_v31 = vpop.f32.mrf.mxu0 }
 0x1a5   : > { %3110 = vmatpush2.bf16.msra.mxu0 %v5052_v41  ;;  %v5883_v12 = vpop.f32.mrf.mxu1  ;;  %v5135_v41 = vld [vmem:[#allocation7 + $0x5ec] ss:$16 sps:$4 sm:$0xff]  }
 0x1a6   : > { %3163 = vmatpush2.bf16.msra.mxu1 %v5055_v42  ;;  %3111 = vmatprep.subr.bf16.mxu0 %v5060_v43  ;;  %v5881_v6 = vpop.f32.mrf.mxu0  ;;  %v5130_v43 = vld [vmem:[#allocation7 + $0x3e8] ss:$16 sps:$4 sm:$0xff]  }
 0x1a7   : > { %3164 = vmatprep.subr.bf16.mxu1 %v5063_v44  ;;  %v5133_v44 = vld [vmem:[#allocation7 + $0x5e8] ss:$16 sps:$4 sm:$0xff]  }
 0x1a8   : > { %v5885_v42 = vpop.f32.mrf.mxu0 }
 0x1a9   : > { %3112 = vmatpush2.bf16.msra.mxu0 %v5058_v19  ;;  %v5887_v19 = vpop.f32.mrf.mxu1 }
 0x1aa   : > { %3165 = vmatpush2.bf16.msra.mxu1 %v5061_v45  ;;  %3113 = vmatprep.subr.bf16.mxu0 %v5066_v47  ;;  %v5138_v45 = vld [vmem:[#allocation7 + $0x3cc] ss:$16 sps:$4 sm:$0xff]  }
 0x1ab   : > { %3166 = vmatprep.subr.bf16.mxu1 %v5069_v48  ;;  %v5141_v47 = vld [vmem:[#allocation7 + $0x5cc] ss:$16 sps:$4 sm:$0xff]   ;;  %v5889_v48 = vpop.f32.mrf.mxu0 }
 0x1ad   : > { %3114 = vmatpush2.bf16.msra.mxu0 %v5064_v52  ;;  %v5136_v52 = vld [vmem:[#allocation7 + $0x3c8] ss:$16 sps:$4 sm:$0xff]  }
 0x1ae   : > { %3167 = vmatpush2.bf16.msra.mxu1 %v5067_v53  ;;  %3115 = vmatprep.subr.bf16.mxu0 %v5072_v54  ;;  %v5139_v53 = vld [vmem:[#allocation7 + $0x5c8] ss:$16 sps:$4 sm:$0xff]   ;;  %v5891_v54 = vpop.f32.mrf.mxu1 }
 0x1af   : > { %3168 = vmatprep.subr.bf16.mxu1 %v5075_v55 }
 0x1b1   : > { %3116 = vmatpush2.bf16.msra.mxu0 %v5070_v7  ;;  %v5144_v7 = vld [vmem:[#allocation7 + $0x3ac] ss:$16 sps:$4 sm:$0xff]  }
 0x1b2   : > { %3169 = vmatpush2.bf16.msra.mxu1 %v5073_v37  ;;  %3191 = vmatprep.subr.bf16.mxu0 %v5081_v13  ;;  %v5147_v37 = vld [vmem:[#allocation7 + $0x5ac] ss:$16 sps:$4 sm:$0xff]   ;;  %v5142_v13 = vld [vmem:[#allocation7 + $0x3a8] ss:$16 sps:$4 sm:$0xff]  }
 0x1b3   : > { %3244 = vmatprep.subr.bf16.mxu1 %v5084_v60  ;;  %v5145_v60 = vld [vmem:[#allocation7 + $0x5a8] ss:$16 sps:$4 sm:$0xff]  }
 0x1b4   : > { %3118 = vmatmul.mubr.bf16.vlgmr.msra.gmra.mxu0 %v5847_v61  ;;  %v5893_v55 = vpop.f32.mrf.mxu0 }
 0x1b5   : > { %3171 = vmatmul.mubr.bf16.vlgmr.msra.gmra.mxu1 %v5818_v49  ;;  %3192 = vmatpush1.bf16.msra.mxu0 %v5079_v62  ;;  %v5102_v49 = vld [vmem:[#allocation7 + $0x28c] ss:$16 sps:$4 sm:$0xff]   ;;  %v5895_v62 = vpop.f32.mrf.mxu1 }
 0x1b6   : > { %3245 = vmatpush1.bf16.msra.mxu1 %v5082_v20  ;;  %3193 = vmatprep.subr.bf16.mxu0 %v5087_v46  ;;  %v5897_v20 = vpop.f32.mrf.mxu0  ;;  %v5150_v46 = vld [vmem:[#allocation7 + $0x38c] ss:$16 sps:$4 sm:$0xff]  }
 0x1b7   : > { %3246 = vmatprep.subr.bf16.mxu1 %v5090_v1  ;;  %3127 = vmatprep.mubr.bf16.mxu0 %v5850_v51  ;;  %v5153_v1 = vld [vmem:[#allocation7 + $0x58c] ss:$16 sps:$4 sm:$0xff]  }
 0x1b8   : > { %3180 = vmatprep.mubr.bf16.mxu1 %v5824_v56  ;;  %v5103_v56 = vld [vmem:[#allocation7 + $0x488] ss:$16 sps:$4 sm:$0xff]  }
 0x1b9   : > { %3194 = vmatpush1.bf16.msra.mxu0 %v5085_v2 }
 0x1ba   : > { %3247 = vmatpush1.bf16.msra.mxu1 %v5088_v3  ;;  %3195 = vmatprep.subr.bf16.mxu0 %v5096_v4  ;;  %v5148_v3 = vld [vmem:[#allocation7 + $0x388] ss:$16 sps:$4 sm:$0xff]  }
 0x1bb   : > { %3248 = vmatprep.subr.bf16.mxu1 %v5099_v5  ;;  %v5151_v4 = vld [vmem:[#allocation7 + $0x588] ss:$16 sps:$4 sm:$0xff]   ;;  %v5899_v5 = vpop.f32.mrf.mxu0 }
 0x1bc   : > { %3128 = vmatmul.mubr.bf16.gmra.mxu0 %v5857_v8 }
 0x1bd   : > { %3181 = vmatmul.mubr.bf16.gmra.mxu1 %v5833_v28  ;;  %3196 = vmatpush1.bf16.msra.mxu0 %v5094_v9  ;;  %v5109_v28 = vld [vmem:[#allocation7 + $0x468] ss:$16 sps:$4 sm:$0xff]  }
 0x1be   : > { %3249 = vmatpush1.bf16.msra.mxu1 %v5097_v10  ;;  %3197 = vmatprep.subr.bf16.mxu0 %v5102_v49  ;;  %v5156_v10 = vld [vmem:[#allocation7 + $0x36c] ss:$16 sps:$4 sm:$0xff]  }
 0x1bf   : > { %3250 = vmatprep.subr.bf16.mxu1 %v5105_v14  ;;  %3223 = vmatprep.mubr.bf16.mxu0 %v5810_v59  ;;  %v5115_v59 = vld [vmem:[#allocation7 + $0x448] ss:$16 sps:$4 sm:$0xff]   ;;  %v5159_v49 = vld [vmem:[#allocation7 + $0x56c] ss:$16 sps:$4 sm:$0xff]  }
 0x1c0   : > { %3276 = vmatprep.mubr.bf16.mxu1 %v5840_v0  ;;  %v5120_v0 = vld [vmem:[#allocation7 + $0x22c] ss:$16 sps:$4 sm:$0xff]  }
 0x1c1   : > { %3198 = vmatpush1.bf16.msra.mxu0 %v5100_v15  ;;  %v5154_v15 = vld [vmem:[#allocation7 + $0x368] ss:$16 sps:$4 sm:$0xff]  }
 0x1c2   : > { %3251 = vmatpush1.bf16.msra.mxu1 %v5103_v56  ;;  %3199 = vmatprep.subr.bf16.mxu0 %v5108_v17  ;;  %v5157_v56 = vld [vmem:[#allocation7 + $0x568] ss:$16 sps:$4 sm:$0xff]   ;;  %v5905_v17 = vpop.f32.mrf.mxu0 }
 0x1c3   : > { %3252 = vmatprep.subr.bf16.mxu1 %v5111_v58  ;;  %v5162_v58 = vld [vmem:[#allocation7 + $0x34c] ss:$16 sps:$4 sm:$0xff]  }
 0x1c5   : > { %3200 = vmatpush1.bf16.msra.mxu0 %v5106_v21  ;;  %v5165_v21 = vld [vmem:[#allocation7 + $0x54c] ss:$16 sps:$4 sm:$0xff]  }
 0x1c6   : > { %3253 = vmatpush1.bf16.msra.mxu1 %v5109_v28  ;;  %3201 = vmatprep.subr.bf16.mxu0 %v5114_v23  ;;  %v5160_v23 = vld [vmem:[#allocation7 + $0x348] ss:$16 sps:$4 sm:$0xff]  }
 0x1c7   : > { %3254 = vmatprep.subr.bf16.mxu1 %v5117_v24  ;;  %v5163_v24 = vld [vmem:[#allocation7 + $0x548] ss:$16 sps:$4 sm:$0xff]  }
 0x1c9   : > { %3202 = vmatpush1.bf16.msra.mxu0 %v5112_v26  ;;  %v5907_v26 = vpop.f32.mrf.mxu0 }
 0x1ca   : > { %3255 = vmatpush1.bf16.msra.mxu1 %v5115_v59  ;;  %3203 = vmatprep.subr.bf16.mxu0 %v5120_v0  ;;  %v5168_v0 = vld [vmem:[#allocation7 + $0x32c] ss:$16 sps:$4 sm:$0xff]  }
 0x1cb   : > { %3256 = vmatprep.subr.bf16.mxu1 %v5123_v29  ;;  %v5171_v29 = vld [vmem:[#allocation7 + $0x52c] ss:$16 sps:$4 sm:$0xff]  }
 0x1cd   : > { %3204 = vmatpush1.bf16.msra.mxu0 %v5118_v32  ;;  %v5166_v32 = vld [vmem:[#allocation7 + $0x328] ss:$16 sps:$4 sm:$0xff]  }
 0x1ce   : > { %3257 = vmatpush1.bf16.msra.mxu1 %v5121_v33  ;;  %3205 = vmatprep.subr.bf16.mxu0 %v5126_v34  ;;  %v5169_v33 = vld [vmem:[#allocation7 + $0x528] ss:$16 sps:$4 sm:$0xff]   ;;  %v5909_v34 = vpop.f32.mrf.mxu0 }
 0x1cf   : > { %3258 = vmatprep.subr.bf16.mxu1 %v5129_v35 }
 0x1d1   : > { %3206 = vmatpush1.bf16.msra.mxu0 %v5124_v38  ;;  %v5174_v38 = vld [vmem:[#allocation7 + $0x30c] ss:$16 sps:$4 sm:$0xff]  }
 0x1d2   : > { %3259 = vmatpush1.bf16.msra.mxu1 %v5127_v39  ;;  %3207 = vmatprep.subr.bf16.mxu0 %v5132_v40  ;;  %v5177_v39 = vld [vmem:[#allocation7 + $0x50c] ss:$16 sps:$4 sm:$0xff]   ;;  %v5172_v40 = vld [vmem:[#allocation7 + $0x308] ss:$16 sps:$4 sm:$0xff]  }
 0x1d3   : > { %3260 = vmatprep.subr.bf16.mxu1 %v5135_v41  ;;  %v5175_v41 = vld [vmem:[#allocation7 + $0x508] ss:$16 sps:$4 sm:$0xff]  }
 0x1d5   : > { %3208 = vmatpush2.bf16.msra.mxu0 %v5130_v43  ;;  %v5911_v43 = vpop.f32.mrf.mxu0 }
 0x1d6   : > { %3261 = vmatpush2.bf16.msra.mxu1 %v5133_v44  ;;  %3209 = vmatprep.subr.bf16.mxu0 %v5138_v45  ;;  %v5178_v45 = vld [vmem:[#allocation10 + $0x78] sm:$0xff]  }
 0x1d7   : > { %3262 = vmatprep.subr.bf16.mxu1 %v5141_v47  ;;  %v5913_v47 = vpop.f32.mrf.mxu0 }
 0x1d9   : > { %3210 = vmatpush2.bf16.msra.mxu0 %v5136_v52 }
 0x1da   : > { %3263 = vmatpush2.bf16.msra.mxu1 %v5139_v53  ;;  %3211 = vmatprep.subr.bf16.mxu0 %v5144_v7  ;;  %v5179_v53 = vld [vmem:[#allocation10 + $0x38] sm:$0xff]   ;;  %v5180_v7 = vld [vmem:[#allocation10 + $0x70] sm:$0xff]  }
 0x1db   : > { %3264 = vmatprep.subr.bf16.mxu1 %v5147_v37 }
 0x1dd   : > { %v1834_v2 = vpop.f32.mrf.mxu1  ;;  %3212 = vmatpush2.bf16.msra.mxu0 %v5142_v13 }
 0x1de   : > { %3265 = vmatpush2.bf16.msra.mxu1 %v5145_v60  ;;  %3213 = vmatprep.subr.bf16.mxu0 %v5150_v46 }
 0x1df   : > { %v5901_v9 = vpop.f32.mrf.mxu1  ;;  %3266 = vmatprep.subr.bf16.mxu1 %v5153_v1 }
 0x1e1   : > { %v5903_v14 = vpop.f32.mrf.mxu1  ;;  %3214 = vmatpush2.bf16.msra.mxu0 %v5148_v3  ;;  %v5181_v3 = vld [vmem:[#allocation10 + $0x30] sm:$0xff]  }
 0x1e2   : > { %3267 = vmatpush2.bf16.msra.mxu1 %v5151_v4  ;;  %3215 = vmatprep.subr.bf16.mxu0 %v5156_v10 }
 0x1e3   : > { %3268 = vmatprep.subr.bf16.mxu1 %v5159_v49  ;;  %v1840_v28 = vpop.f32.mrf.mxu1  ;;  %v5182_v49 = vld [vmem:[#allocation10 + $0x68] sm:$0xff]  }
 0x1e5   : > { %3216 = vmatpush2.bf16.msra.mxu0 %v5154_v15  ;;  %v1844_v59 = vpop.f32.mrf.mxu1 }
 0x1e6   : > { %3269 = vmatpush2.bf16.msra.mxu1 %v5157_v56  ;;  %3217 = vmatprep.subr.bf16.mxu0 %v5162_v58 }
 0x1e7   : > { %3270 = vmatprep.subr.bf16.mxu1 %v5165_v21  ;;  %v1846_v35 = vpop.f32.mrf.mxu1 }
 0x1e9   : > { %3218 = vmatpush2.bf16.msra.mxu0 %v5160_v23  ;;  %v1848_v44 = vpop.f32.mrf.mxu1  ;;  %v5184_v23 = vld [vmem:[#allocation10 + $0x60] sm:$0xff]  }
 0x1ea   : > { %3271 = vmatpush2.bf16.msra.mxu1 %v5163_v24  ;;  %3219 = vmatprep.subr.bf16.mxu0 %v5168_v0 }
 0x1eb   : > { %3272 = vmatprep.subr.bf16.mxu1 %v5171_v29  ;;  %v1850_v52 = vpop.f32.mrf.mxu1 }
 0x1ed   : > { %3220 = vmatpush2.bf16.msra.mxu0 %v5166_v32 }
 0x1ee   : > { %3273 = vmatpush2.bf16.msra.mxu1 %v5169_v33  ;;  %3221 = vmatprep.subr.bf16.mxu0 %v5174_v38  ;;  %v5185_v33 = vld [vmem:[#allocation10 + $0x20] sm:$0xff]  }
 0x1ef   : > { %3274 = vmatprep.subr.bf16.mxu1 %v5177_v39 }
 0x1f1   : > { %3222 = vmatpush2.bf16.msra.mxu0 %v5172_v40 }
 0x1f2   : > { %3275 = vmatpush2.bf16.msra.mxu1 %v5175_v41  ;;  %4437 = vmatprep.subr.bf16.mxu0 %v5178_v45 }
 0x1f4   : > { %v1887_v37 = vpop.f32.mrf.mxu0  ;;  %3224 = vmatmul.mubr.bf16.vlgmr.msra.gmra.mxu0 %v5821_v50 }
 0x1f5   : > { %v1940_v13 = vpop.f32.mrf.mxu1  ;;  %3277 = vmatmul.mubr.bf16.vlgmr.msra.gmra.mxu1 %v5847_v61  ;;  %v1888_v60 = vadd.f32 %v1887_v37, %v1834_v2  ;;  %3233 = vmatprep.mubr.bf16.mxu0 %v5827_v57 }
 0x1f6   : > { %3286 = vmatprep.mubr.bf16.mxu1 %v5850_v51  ;;  %v1889_v46 = vpop.f32.mrf.mxu0  ;;  %4438 = vmatpush3.bf16.msra.mxu0 %v5179_v53  ;;  %v5183_v51 = vld [vmem:[#allocation10 + $0x28] sm:$0xff]  }
 0x1f7   : > { %v1942_v1 = vpop.f32.mrf.mxu1  ;;  %v5919_v4 = vadd.f32 %v1940_v13, %v1888_v60  ;;  %v1890_v10 = vadd.f32 %v1889_v46, %v5901_v9  ;;  %4439 = vmatprep.subr.bf16.mxu0 %v5180_v7  ;;  %v5187_v7 = vld [vmem:[#allocation10 + $0x18] sm:$0xff]   ;;  %v5188_v13 = vld [vmem:[#allocation10 + $0x50] sm:$0xff]   ;;  %v5190_v46 = vld [vmem:[#allocation10 + $0x48] sm:$0xff]  }
 0x1f8   : > { %v1891_v15 = vpop.f32.mrf.mxu0 }
 0x1f9   : > { %v1944_v56 = vpop.f32.mrf.mxu1  ;;  %v5922_v50 = vadd.f32 %v1942_v1, %v1890_v10  ;;  %v1892_v61 = vadd.f32 %v1891_v15, %v5903_v14  ;;  %v5191_v1 = vld [vmem:[#allocation10 + $0x8] sm:$0xff]   ;;  %v5195_v10 = vld [vmem:[#allocation10 + $0xb8] sm:$0xff]   ;;  %v5193_v15 = vld [vmem:[#allocation10] sm:$0xff]  }
 0x1fa   : > { %v1893_v2 = vpop.f32.mrf.mxu0  ;;  %4440 = vmatpush3.bf16.msra.mxu0 %v5181_v3  ;;  %v5194_v3 = vld [vmem:[#allocation10 + $0xf8] sm:$0xff]  }
 0x1fb   : > { %v1946_v57 = vpop.f32.mrf.mxu1  ;;  %v5925_v58 = vadd.f32 %v1944_v56, %v1892_v61  ;;  %v1894_v21 = vadd.f32 %v1893_v2, %v1840_v28  ;;  %4441 = vmatprep.subr.bf16.mxu0 %v5182_v49  ;;  %v5186_v28 = vld [vmem:[#allocation10 + $0x58] sm:$0xff]   ;;  %v5196_v49 = vld [vmem:[#allocation10 + $0xf0] sm:$0xff]   ;;  %4465 = vmatprep.subr.bf16.mxu1 %v5194_v3  ;;  %v5198_v56 = vld [vmem:[#allocation10 + $0xe8] sm:$0xff]  }
 0x1fc   : > { %v1897_v24 = vpop.f32.mrf.mxu0  ;;  %3234 = vmatmul.mubr.bf16.gmra.mxu0 %v5837_v63  ;;  %4466 = vmatpush3.bf16.msra.mxu1 %v5195_v10  ;;  %v5199_v61 = vld [vmem:[#allocation10 + $0xa8] sm:$0xff]   ;;  %v5200_v2 = vld [vmem:[#allocation10 + $0xe0] sm:$0xff]  }
 0x1fd   : > { %3287 = vmatmul.mubr.bf16.gmra.mxu1 %v5857_v8  ;;  %v1950_v9 = vpop.f32.mrf.mxu1  ;;  %v5929_v0 = vadd.f32 %v1946_v57, %v1894_v21  ;;  %v1898_v29 = vadd.f32 %v1897_v24, %v1844_v59  ;;  %4467 = vmatprep.subr.bf16.mxu1 %v5196_v49  ;;  %v5201_v57 = vld [vmem:[#allocation10 + $0xa0] sm:$0xff]   ;;  %v5203_v21 = vld [vmem:[#allocation10 + $0x98] sm:$0xff]   ;;  %v5205_v24 = vld [vmem:[#allocation10 + $0x90] sm:$0xff]   ;;  %v1735_v49 = vadd.f32 %v5879_v36, %v5873_v27 }
 0x1fe   : > { %v1899_v32 = vpop.f32.mrf.mxu0  ;;  %4442 = vmatpush3.bf16.msra.mxu0 %v5183_v51  ;;  %v5202_v51 = vld [vmem:[#allocation10 + $0xd8] sm:$0xff]   ;;  %v1741_v27 = vadd.f32 %v5887_v19, %v5881_v6 }
 0x1ff   : > { %v1952_v14 = vpop.f32.mrf.mxu1  ;;  %v1900_v38 = vadd.f32 %v1899_v32, %v1846_v35  ;;  %v5931_v39 = vadd.f32 %v1950_v9, %v1898_v29  ;;  %4443 = vmatprep.subr.bf16.mxu0 %v5184_v23  ;;  %v5189_v35 = vld [vmem:[#allocation10 + $0x10] sm:$0xff]   ;;  %v5206_v9 = vld [vmem:[#allocation10 + $0xc8] sm:$0xff]   ;;  %v5208_v32 = vld [vmem:[#allocation10 + $0xc0] sm:$0xff]  }
 0x200   : > { %v1901_v40 = vpop.f32.mrf.mxu0  ;;  %v5204_v23 = vld [vmem:[#allocation10 + $0xd0] sm:$0xff]   ;;  %v5207_v29 = vld [vmem:[#allocation10 + $0x88] sm:$0xff]  }
 0x201   : > { %v1954_v41 = vpop.f32.mrf.mxu1  ;;  %v1902_v45 = vadd.f32 %v1901_v40, %v1848_v44  ;;  %v5933_v53 = vadd.f32 %v1952_v14, %v1900_v38  ;;  %v5192_v44 = vld [vmem:[#allocation10 + $0x40] sm:$0xff]  }
 0x202   : > { %v1903_v63 = vpop.f32.mrf.mxu0  ;;  %4444 = vmatpush3.bf16.msra.mxu0 %v5185_v33  ;;  %v5209_v14 = vld [vmem:[#allocation10 + $0x80] sm:$0xff]  }
 0x203   : > { %v1956_v8 = vpop.f32.mrf.mxu1  ;;  %v1904_v37 = vadd.f32 %v1903_v63, %v1850_v52  ;;  %v5935_v59 = vadd.f32 %v1954_v41, %v1902_v45  ;;  %4445 = vmatprep.subr.bf16.mxu0 %v5186_v28  ;;  %v5197_v52 = vld [vmem:[#allocation10 + $0xb0] sm:$0xff]  }
 0x204   : > { %4468 = vmatpush3.bf16.msra.mxu1 %v5197_v52 }
 0x205   : > { %v5937_v60 = vadd.f32 %v1956_v8, %v1904_v37  ;;  %4469 = vmatprep.subr.bf16.mxu1 %v5198_v56  ;;  %v3299_v37 = vlaneseq }
 0x206   : > { %4446 = vmatpush3.bf16.msra.mxu0 %v5187_v7 }
 0x207   : > { %4447 = vmatprep.subr.bf16.mxu0 %v5188_v13  ;;  %v1731_v13 = vadd.f32 %v5871_v25, %v5863_v16  ;;  %v5946_v10 = vshrl.u32 %v3299_v37, 7 }
 0x208   : > { %4470 = vmatpush3.bf16.msra.mxu1 %v5199_v61 }
 0x209   : > { %4471 = vmatprep.subr.bf16.mxu1 %v5200_v2  ;;  %v1739_v2 = vadd.f32 %v5883_v12, %v5877_v31  ;;  %v1794_v12 = vadd.f32 %v5909_v34, %v1741_v27 }
 0x20a   : > { %4448 = vmatpush3.bf16.msra.mxu0 %v5189_v35 }
 0x20b   : > { %4449 = vmatprep.subr.bf16.mxu0 %v5190_v46  ;;  %v1729_v46 = vadd.f32 %v5867_v18, %v5859_v11  ;;  %v1788_v11 = vadd.f32 %v5905_v17, %v1735_v49  ;;  %v1745_v17 = vadd.f32 %v5895_v62, %v5889_v48  ;;  %v1792_v31 = vadd.f32 %v5907_v26, %v1739_v2 }
 0x20c   : > { %4472 = vmatpush3.bf16.msra.mxu1 %v5201_v57 }
 0x20d   : > { %4473 = vmatprep.subr.bf16.mxu1 %v5202_v51  ;;  %v1798_v26 = vadd.f32 %v5913_v47, %v1745_v17 }
 0x20e   : > { %4450 = vmatpush3.bf16.msra.mxu0 %v5191_v1  ;;  %v1733_v1 = vadd.f32 %v5875_v30, %v5869_v22  ;;  %v3301_v30 = vsub.s32 0, %v5946_v10 }
 0x20f   : > { %4451 = vmatprep.subr.bf16.mxu0 %v5192_v44  ;;  %v1784_v44 = vadd.f32 %v5897_v20, %v1731_v13  ;;  %v3305_v20 = vsub.s32 1, %v5946_v10 }
 0x210   : > { %4474 = vmatpush3.bf16.msra.mxu1 %v5203_v21  ;;  %v1786_v52 = vadd.f32 %v5899_v5, %v1733_v1  ;;  %v1743_v5 = vadd.f32 %v5891_v54, %v5885_v42 }
 0x211   : > { %4475 = vmatprep.subr.bf16.mxu1 %v5204_v23 }
 0x212   : > { %4452 = vmatpush3.bf16.msra.mxu0 %v5193_v15  ;;  %v1782_v15 = vadd.f32 %v5893_v55, %v1729_v46  ;;  %v5962_v55 = vld [vmem:[%s6046_s4] sm:$0xf]  ;;  %v1796_v23 = vadd.f32 %v5911_v43, %v1743_v5 }
 0x214   : > { %4476 = vmatpush3.bf16.msra.mxu1 %v5205_v24  ;;  %v3302_v24 = vrot.slane %v5962_v55, %v3301_v30 }
 0x215   : > { %4477 = vmatprep.subr.bf16.mxu1 %v5206_v9 }
 0x218   : > { %4478 = vmatpush3.bf16.msra.mxu1 %v5207_v29  ;;  %v3306_v29 = vrot.slane %v5962_v55, %v3305_v20 }
 0x219   : > { %4479 = vmatprep.subr.bf16.mxu1 %v5208_v32 }
 0x21c   : > { %4480 = vmatpush3.bf16.msra.mxu1 %v5209_v14 }
 0x234   : > { %v3013_v33 = vpop.f32.mrf.mxu0 }
 0x235   : > { %v3066_v41 = vpop.f32.mrf.mxu1  ;;  %v3014_v18 = vadd.f32 %v3013_v33, %v1782_v15 }
 0x236   : > { %v3015_v38 = vpop.f32.mrf.mxu0 }
 0x237   : > { %v3068_v63 = vpop.f32.mrf.mxu1  ;;  %v3016_v16 = vadd.f32 %v3015_v38, %v1784_v44  ;;  %v3067_v6 = vadd.f32 %v3066_v41, %v3014_v18 }
 0x238   : > { %v3017_v28 = vpop.f32.mrf.mxu0 }
 0x239   : > { %v3070_v7 = vpop.f32.mrf.mxu1  ;;  %v3018_v61 = vadd.f32 %v3017_v28, %v1786_v52  ;;  %v3069_v57 = vadd.f32 %v3068_v63, %v3016_v16 }
 0x23a   : > { %v3019_v40 = vpop.f32.mrf.mxu0 }
 0x23b   : > { %v3072_v3 = vpop.f32.mrf.mxu1  ;;  %v3020_v36 = vadd.f32 %v3019_v40, %v1788_v11  ;;  %v3071_v19 = vadd.f32 %v3070_v7, %v3018_v61 }
 0x23c   : > { %v3023_v45 = vpop.f32.mrf.mxu0 }
 0x23d   : > { %v3076_v25 = vpop.f32.mrf.mxu1  ;;  %v3073_v54 = vadd.f32 %v3072_v3, %v3020_v36  ;;  %v3024_v14 = vadd.f32 %v3023_v45, %v1792_v31 }
 0x23e   : > { %v3025_v8 = vpop.f32.mrf.mxu0 }
 0x23f   : > { %v3078_v51 = vpop.f32.mrf.mxu1  ;;  %v3026_v32 = vadd.f32 %v3025_v8, %v1794_v12  ;;  %v3077_v46 = vadd.f32 %v3076_v25, %v3024_v14  ;;  %v3313_v14 = vsub.s32 3, %v5946_v10 }
 0x240   : > { %v3027_v35 = vpop.f32.mrf.mxu0 }
 0x241   : > { %v3080_v33 = vpop.f32.mrf.mxu1  ;;  %v3028_v34 = vadd.f32 %v3027_v35, %v1796_v23  ;;  %v3079_v63 = vadd.f32 %v3078_v51, %v3026_v32 }
 0x242   : > { %v3029_v56 = vpop.f32.mrf.mxu0 }
 0x243   : > { %v3030_v7 = vadd.f32 %v3029_v56, %v1798_v26  ;;  %v3082_v1 = vpop.f32.mrf.mxu1  ;;  %v3081_v8 = vadd.f32 %v3080_v33, %v3028_v34 }
 0x245   : > { %v3083_v16 = vadd.f32 %v3082_v1, %v3030_v7  ;;  %v3314_v7 = vrot.slane %v5962_v55, %v3313_v14  ;;  %v5216_v14 = vld [vmem:[#allocation11 + $0x8] sm:$0xff]  }
 0x274   : > { %v3119_v22 = vpop.f32.mrf.mxu0 }
 0x275   : > { %v3120_v48 = vadd.f32 %v3119_v22, %v3067_v6 }
 0x276   : > { %v3121_v21 = vpop.f32.mrf.mxu0 }
 0x277   : > { %v3122_v9 = vadd.f32 %v3121_v21, %v3069_v57  ;;  %v3319_v37 = vadd.f32 %v3302_v24, %v3120_v48  ;;  %v3172_v21 = vpop.f32.mrf.mxu1 }
 0x278   : > { %v3123_v42 = vpop.f32.mrf.mxu0 }
 0x279   : > { %v3124_v62 = vadd.f32 %v3123_v42, %v3071_v19  ;;  %v3320_v41 = vadd.f32 %v3306_v29, %v3122_v9  ;;  %v3335_v47 = vmax.f32 %v3319_v37, 0.0  ;;  %v3174_v31 = vpop.f32.mrf.mxu1 }
 0x27a   : > { %v3125_v38 = vpop.f32.mrf.mxu0  ;;  %v3175_v48 = vadd.f32 %v3174_v31, %v5922_v50 }
 0x27b   : > { %v3323_v28 = vadd.f32 %v3302_v24, %v3124_v62  ;;  %v3126_v40 = vadd.f32 %v3125_v38, %v3073_v54  ;;  %v3336_v15 = vmax.f32 %v3320_v41, 0.0  ;;  %v3176_v12 = vpop.f32.mrf.mxu1 }
 0x27c   : > { %v3129_v43 = vpop.f32.mrf.mxu0  ;;  %v3177_v26 = vadd.f32 %v3176_v12, %v5925_v58 }
 0x27d   : > { %v3324_v13 = vadd.f32 %v3306_v29, %v3126_v40  ;;  %v3339_v3 = vmax.f32 %v3323_v28, 0.0  ;;  %v3130_v35 = vadd.f32 %v3129_v43, %v3077_v46  ;;  %v3178_v6 = vpop.f32.mrf.mxu1 }
 0x27e   : > { %v3131_v44 = vpop.f32.mrf.mxu0 }
 0x27f   : > { %v3340_v49 = vmax.f32 %v3324_v13, 0.0  ;;  %v3132_v45 = vadd.f32 %v3131_v44, %v3079_v63  ;;  %v3351_v22 = vpack.c.bf16 %v3339_v3, %v3335_v47  ;;  %v3327_v25 = vadd.f32 %v3302_v24, %v3130_v35  ;;  %v3182_v19 = vpop.f32.mrf.mxu1 }
 0x280   : > { %v3133_v52 = vpop.f32.mrf.mxu0 }
 0x281   : > { %v3134_v11 = vadd.f32 %v3133_v52, %v3081_v8  ;;  %v3352_v61 = vpack.c.bf16 %v3340_v49, %v3336_v15  ;;  %v3328_v30 = vadd.f32 %v3306_v29, %v3132_v45  ;;  %v3343_v17 = vmax.f32 %v3327_v25, 0.0  ;;  %v3184_v23 = vpop.f32.mrf.mxu1 }
 0x282   : > { %v3135_v18 = vpop.f32.mrf.mxu0  ;;  %v3185_v58 = vadd.f32 %v3184_v23, %v5933_v53 }
 0x283   : > { %v3331_v56 = vadd.f32 %v3302_v24, %v3134_v11  ;;  %v3136_v20 = vadd.f32 %v3135_v18, %v3083_v16  ;;  %3654 = vmatprep.mubr.bf16.mxu0 %v3352_v61  ;;  %v3344_v27 = vmax.f32 %v3328_v30, 0.0  ;;  %v3186_v9 = vpop.f32.mrf.mxu1  ;;  %v3173_v24 = vadd.f32 %v3172_v21, %v5919_v4 }
 0x284   : > { %3655 = vmatmul.mubr.bf16.vlgmr.msra.gmra.mxu0 %v3351_v22  ;;  %v3179_v4 = vadd.f32 %v3178_v6, %v5929_v0  ;;  %v3187_v18 = vadd.f32 %v3186_v9, %v5935_v59 }
 0x285   : > { %v3332_v2 = vadd.f32 %v3306_v29, %v3136_v20  ;;  %v3347_v36 = vmax.f32 %v3331_v56, 0.0  ;;  %v3188_v42 = vpop.f32.mrf.mxu1  ;;  %v3309_v29 = vsub.s32 2, %v5946_v10  ;;  %v3183_v10 = vadd.f32 %v3182_v19, %v5931_v39 }
 0x286   : > { %v3189_v39 = vadd.f32 %v3188_v42, %v5937_v60 }
 0x287   : > { %v3348_v5 = vmax.f32 %v3332_v2, 0.0  ;;  %v3355_v51 = vpack.c.bf16 %v3347_v36, %v3343_v17  ;;  %v3310_v28 = vrot.slane %v5962_v55, %v3309_v29  ;;  %v5211_v29 = vld [vmem:[#allocation11 + $0x30] sm:$0xff]  }
 0x289   : > { %v3356_v57 = vpack.c.bf16 %v3348_v5, %v3344_v27 }
 0x28b   : > { %3662 = vmatprep.mubr.bf16.mxu0 %v3356_v57 }
 0x28c   : > { %3663 = vmatmul.mubr.bf16.gmra.mxu0 %v3355_v51 }
 0x2b4   : > { %v3225_v54 = vpop.f32.mrf.mxu0 }
 0x2b5   : > { %v3278_v32 = vpop.f32.mrf.mxu1  ;;  %v3226_v62 = vadd.f32 %v3225_v54, %v3173_v24  ;;  %v5210_v24 = vld [vmem:[#allocation11 + $0x38] sm:$0xff]   ;;  %v5212_v54 = vld [vmem:[#allocation11 + $0x28] sm:$0xff]  }
 0x2b6   : > { %v3227_v33 = vpop.f32.mrf.mxu0  ;;  %4503 = vmatprep.subr.bf16.mxu0 %v5210_v24 }
 0x2b7   : > { %v3280_v38 = vpop.f32.mrf.mxu1  ;;  %v3279_v34 = vadd.f32 %v3278_v32, %v3226_v62  ;;  %v3228_v40 = vadd.f32 %v3227_v33, %v3175_v48  ;;  %4504 = vmatpush3.bf16.msra.mxu0 %v5210_v24  ;;  %v5213_v32 = vld [vmem:[#allocation11 + $0x20] sm:$0xff]   ;;  %v5214_v48 = vld [vmem:[#allocation11 + $0x18] sm:$0xff]   ;;  %v5215_v62 = vld [vmem:[#allocation11 + $0x10] sm:$0xff]  }
 0x2b8   : > { %v3229_v41 = vpop.f32.mrf.mxu0  ;;  %4505 = vmatprep.subr.bf16.mxu0 %v5211_v29  ;;  %v5217_v33 = vld [vmem:[#allocation11] sm:$0xff]  }
 0x2b9   : > { %v3282_v43 = vpop.f32.mrf.mxu1  ;;  %v3281_v63 = vadd.f32 %v3280_v38, %v3228_v40  ;;  %v3230_v37 = vadd.f32 %v3229_v41, %v3177_v26  ;;  %v3321_v46 = vadd.f32 %v3310_v28, %v3279_v34 }
 0x2ba   : > { %v3231_v50 = vpop.f32.mrf.mxu0 }
 0x2bb   : > { %v3284_v13 = vpop.f32.mrf.mxu1  ;;  %v3283_v1 = vadd.f32 %v3282_v43, %v3230_v37  ;;  %v3232_v44 = vadd.f32 %v3231_v50, %v3179_v4  ;;  %v3322_v49 = vadd.f32 %v3314_v7, %v3281_v63  ;;  %v3337_v47 = vmax.f32 %v3321_v46, 0.0  ;;  %4506 = vmatpush3.bf16.msra.mxu0 %v5211_v29  ;;  %v4389_v63 = vld [vmem:[%s6048_s6] ss:$0 sm:$0xff] }
 0x2bc   : > { %v3235_v8 = vpop.f32.mrf.mxu0  ;;  %4507 = vmatprep.subr.bf16.mxu0 %v5212_v54 }
 0x2bd   : > { %v3288_v3 = vpop.f32.mrf.mxu1  ;;  %v3325_v45 = vadd.f32 %v3310_v28, %v3283_v1  ;;  %v3285_v15 = vadd.f32 %v3284_v13, %v3232_v44  ;;  %v3236_v52 = vadd.f32 %v3235_v8, %v3183_v10  ;;  %v3338_v53 = vmax.f32 %v3322_v49, 0.0 }
 0x2be   : > { %v3237_v0 = vpop.f32.mrf.mxu0 }
 0x2bf   : > { %v3290_v16 = vpop.f32.mrf.mxu1  ;;  %v3341_v55 = vmax.f32 %v3325_v45, 0.0  ;;  %v3326_v35 = vadd.f32 %v3314_v7, %v3285_v15  ;;  %v3238_v11 = vadd.f32 %v3237_v0, %v3185_v58  ;;  %v3289_v61 = vadd.f32 %v3288_v3, %v3236_v52  ;;  %4508 = vmatpush3.bf16.msra.mxu0 %v5212_v54 }
 0x2c0   : > { %v3239_v22 = vpop.f32.mrf.mxu0  ;;  %4509 = vmatprep.subr.bf16.mxu0 %v5213_v32 }
 0x2c1   : > { %v3292_v30 = vpop.f32.mrf.mxu1  ;;  %v3353_v56 = vpack.c.bf16 %v3341_v55, %v3337_v47  ;;  %v3342_v20 = vmax.f32 %v3326_v35, 0.0  ;;  %v3291_v25 = vadd.f32 %v3290_v16, %v3238_v11  ;;  %v3240_v2 = vadd.f32 %v3239_v22, %v3187_v18 }
 0x2c2   : > { %v3241_v27 = vpop.f32.mrf.mxu0  ;;  %v3329_v17 = vadd.f32 %v3310_v28, %v3289_v61 }
 0x2c3   : > { %v3242_v36 = vadd.f32 %v3241_v27, %v3189_v39  ;;  %v3354_v5 = vpack.c.bf16 %v3342_v20, %v3338_v53  ;;  %v3293_v57 = vadd.f32 %v3292_v30, %v3240_v2  ;;  %v3294_v51 = vpop.f32.mrf.mxu1  ;;  %v3330_v21 = vadd.f32 %v3314_v7, %v3291_v25  ;;  %4510 = vmatpush3.bf16.msra.mxu0 %v5213_v32  ;;  %v4422_v2 = vld [vmem:[%s6050_s8] ss:$0 sm:$0xff] }
 0x2c4   : > { %v3345_v12 = vmax.f32 %v3329_v17, 0.0  ;;  %4511 = vmatprep.subr.bf16.mxu0 %v5214_v48 }
 0x2c5   : > { %v3295_v31 = vadd.f32 %v3294_v51, %v3242_v36  ;;  %3703 = vmatprep.mubr.bf16.mxu1 %v3354_v5  ;;  %v3333_v59 = vadd.f32 %v3310_v28, %v3293_v57  ;;  %v3346_v19 = vmax.f32 %v3330_v21, 0.0 }
 0x2c6   : > { %3704 = vmatmul.mubr.bf16.vlgmr.msra.gmra.mxu1 %v3353_v56 }
 0x2c7   : > { %v3334_v60 = vadd.f32 %v3314_v7, %v3295_v31  ;;  %v3349_v6 = vmax.f32 %v3333_v59, 0.0  ;;  %4512 = vmatpush3.bf16.msra.mxu0 %v5214_v48 }
 0x2c8   : > { %4513 = vmatprep.subr.bf16.mxu0 %v5215_v62 }
 0x2c9   : > { %v3350_v23 = vmax.f32 %v3334_v60, 0.0  ;;  %v3357_v9 = vpack.c.bf16 %v3349_v6, %v3345_v12 }
 0x2cb   : > { %v3358_v42 = vpack.c.bf16 %v3350_v23, %v3346_v19  ;;  %4514 = vmatpush3.bf16.msra.mxu0 %v5215_v62 }
 0x2cc   : > { %4515 = vmatprep.subr.bf16.mxu0 %v5216_v14 }
 0x2cd   : > { %3711 = vmatprep.mubr.bf16.mxu1 %v3358_v42 }
 0x2ce   : > { %3712 = vmatmul.mubr.bf16.gmra.mxu1 %v3357_v9 }
 0x2cf   : > { %4516 = vmatpush3.bf16.msra.mxu0 %v5216_v14 }
 0x2d0   : > { %4517 = vmatprep.subr.bf16.mxu0 %v5217_v33 }
 0x2d3   : > { %4518 = vmatpush3.bf16.msra.mxu0 %v5217_v33 }
 0x344   : > { %v4453_v38 = vpop.f32.mrf.mxu0 }
 0x346   : > { %v4454_v26 = vpop.f32.mrf.mxu0 }
 0x347   : > { %v4455_v4 = vadd.f32 %v4454_v26, %v4453_v38 }
 0x348   : > { %v4456_v34 = vpop.f32.mrf.mxu0 }
 0x349   : > { %v3657_v46 = vadd.f32 %v4455_v4, %v4389_v63 }
 0x34a   : > { %v4457_v28 = vpop.f32.mrf.mxu0 }
 0x34b   : > { %v4458_v37 = vadd.f32 %v4457_v28, %v4456_v34 }
 0x34c   : > { %v4459_v40 = vpop.f32.mrf.mxu0 }
 0x34d   : > { %v3660_v44 = vadd.f32 %v4458_v37, %v4389_v63 }
 0x34e   : > { %v4460_v41 = vpop.f32.mrf.mxu0 }
 0x34f   : > { %v4461_v45 = vadd.f32 %v4460_v41, %v4459_v40 }
 0x350   : > { %v4462_v13 = vpop.f32.mrf.mxu0 }
 0x351   : > { %v3665_v11 = vadd.f32 %v4461_v45, %v4389_v63 }
 0x352   : > { %v4463_v3 = vpop.f32.mrf.mxu0 }
 0x353   : > { %v4464_v0 = vadd.f32 %v4463_v3, %v4462_v13 }
 0x355   : > { %v3668_v61 = vadd.f32 %v4464_v0, %v4389_v63 }
 0x386   : > { %v4481_v43 = vpop.f32.mrf.mxu1 }
 0x388   : > { %v4482_v7 = vpop.f32.mrf.mxu1 }
 0x389   : > { %v4483_v50 = vadd.f32 %v4482_v7, %v4481_v43 }
 0x38a   : > { %v4484_v10 = vpop.f32.mrf.mxu1 }
 0x38b   : > { %v3706_v58 = vadd.f32 %v4483_v50, %v3657_v46 }
 0x38c   : > { %v4485_v1 = vpop.f32.mrf.mxu1 }
 0x38d   : > { %v4486_v8 = vadd.f32 %v4485_v1, %v4484_v10  ;;  %v3720_v16 = vmax.f32 %v3706_v58, 0.0 }
 0x38e   : > { %v4487_v49 = vpop.f32.mrf.mxu1 }
 0x38f   : > { %v3709_v15 = vadd.f32 %v4486_v8, %v3660_v44 }
 0x390   : > { %v4488_v52 = vpop.f32.mrf.mxu1 }
 0x391   : > { %v3721_v47 = vmax.f32 %v3709_v15, 0.0  ;;  %v4489_v55 = vadd.f32 %v4488_v52, %v4487_v49 }
 0x392   : > { %v4490_v35 = vpop.f32.mrf.mxu1 }
 0x393   : > { %v3724_v18 = vpack.c.bf16 %v3721_v47, %v3720_v16  ;;  %v3714_v22 = vadd.f32 %v4489_v55, %v3665_v11 }
 0x394   : > { %v4491_v39 = vpop.f32.mrf.mxu1 }
 0x395   : > { %v4492_v30 = vadd.f32 %v4491_v39, %v4490_v35  ;;  %4519 = vmatprep.mubr.bf16.mxu0 %v3724_v18  ;;  %v3722_v56 = vmax.f32 %v3714_v22, 0.0 }
 0x397   : > { %v3717_v53 = vadd.f32 %v4492_v30, %v3668_v61 }
 0x399   : > { %v3723_v20 = vmax.f32 %v3717_v53, 0.0 }
 0x39b   : > { %v3725_v25 = vpack.c.bf16 %v3723_v20, %v3722_v56 }
 0x39d   : > { %4520 = vmatmul.mubr.bf16.vlgmr.msra.gmra.mxu0 %v3725_v25 }
 0x45d   : > { %v4521_v27 = vpop.f32.mrf.mxu0 }
 0x45e   : > { %v3840_v36 = vadd.f32 %v4521_v27, %v4422_v2 }
 0x45f   : > { %v3831_v5 = vpop.f32.mrf.mxu0 }
 0x460   : > { %3848 = vst [vmem:[%s450_s7 + $0x10] sm:$0xff] %v3840_v36  ;;  %v3832_v17 = vadd.f32 %v4422_v2, %v3831_v5 }
 0x461   : > { %v4522_v57 = vpop.f32.mrf.mxu0 }
 0x462   : > { %3846 = vst [vmem:[%s450_s7] sm:$0xff] %v3832_v17  ;;  %v3843_v51 = vadd.f32 %v4522_v57, %v4422_v2 }
 0x463   : > { %v3834_v21 = vpop.f32.mrf.mxu0 }
 0x464   : > { %3849 = vst [vmem:[%s450_s7 + $0x18] sm:$0xff] %v3843_v51  ;;  %v3835_v31 = vadd.f32 %v4422_v2, %v3834_v21 }
 0x466   : > { %3847 = vst [vmem:[%s450_s7 + $0x8] sm:$0xff] %v3835_v31 }
 0x467   : > { %5391 = shalt.err (!%p5388_p4)
}
 0x468   : > { %s5392_s20 = scalar_lea.hbm %s5999_s2, 512  ;;  %s5396_s14 = scalar_lea.hbm %s6051_s9, 1024 }
 0x469   : > { %p5393_p8 = scmp.ne.s32.totalorder %s5999_s2, %s5392_s20  ;;  %p5397_p9 = scmp.lt.s32.totalorder %s5999_s2, %s6051_s9 }
 0x46a   : > { %p5398_p13 = scmp.lt.s32.totalorder %s5396_s14, %s5392_s20 }
 0x46b   : > { %p5394_p11 = pnand %p5393_p8, %p6083_p5 }
 0x46c   : > { %p5399_p6 = por %p5398_p13, %p5397_p9 }
 0x46d   : > { %p5395_p12 = pneg %p5394_p11 }
 0x46f   : > { %p5400_p0 = pnand %p5399_p6, %p5395_p12 }
 0x471   : > { %5403 = shalt.err (!%p5400_p0)
}
 0x472   : > { %s5476_s0 = smov 128   ;;  %s5477_s5 = smov 8  }
 0x473   : > { %4549 = dma.vmem_to_hbm [thread:$0]  (%p6083_p5), %s5994_s27, 512, %s5999_s2, %s3851_s29, %s5476_s0, %s5476_s0, %s5477_s5  }
 0x474 PF: > { %s3879_s7 = sand.u32 1, %s5446_s30   ;;  %p6084_p3 = scmp.ne.s32.totalorder %s6063_s16, 0 }
 0x475   : > { %p6085_p7 = scmp.ge.s32.totalorder %s5458_s12, 2  ;;  %s3880_s11 = scalar_lea.sflag [#allocation4], %s3879_s7 }
 0x477   : > { %p4572_p2 = pnand %p6085_p7, %p6084_p3 }
 0x479   : > { %p4573_p10 = pneg %p4572_p2 }
 0x47b   : > { %5441 = dma.done.wait (%p4573_p10), %s3880_s11, 512  }
 0x47c   : > { %5443 = vsyncadd (%p4573_p10), %s3880_s11, 4294966784  ;;  %s6086_s18 = sld [smem:[#allocation20_spill]]  ;;  %p27_p1 = scmp.ge.s32.totalorder %s5616_s24, 4  }
 0x47d   : > { %s6087_s11 = sld [smem:[#allocation21_spill]]  ;;  %s6088_s30 = smov %s5450_s10 }
 0x47e   : > { %s6090_s12 = smov %s5616_s24  ;;  %29 = sbr.rel (!%p27_p1) target bundleno = 15 (0xf), region = 130 }
 0x482   : > { %s6089_s10 = smov %s6086_s18 }
 0x483   :  { %3885 = vsyncpa [#allocation3], 1 }
 0x484   :  { %3887 = vsyncpa [#allocation3 + $0x1], 1 }
 0x485   :  { %3888 = vsyncpa [#allocation6], 1 }
 0x486   :  { %3890 = vsyncpa [#allocation6 + $0x1], 1 }
 0x487   :  { %3891 = vsyncpa [#allocation9], 1 }
 0x488   :  { %3892 = vsyncpa [#allocation12], 1 }
 0x489   :  { %3893 = vsyncpa [#allocation4], 1 }
 0x48a   :  { %3895 = vsyncpa [#allocation4 + $0x1], 1 }

</bundles_post_ra>
